<compile_context>
chip_gen: v7x
topology: tpu7x:2x2x1
jax: 0.10.0
libtpu: 0.0.40
codegen_flags: <defaults>
</compile_context>

<pallas_src>
import numpy as np
import jax
import jax.numpy as jnp
from jax.experimental import pallas as pl
from jax.experimental.pallas import tpu as pltpu

VOCAB = 64000
D = 128            # embedding / hidden dim (module hard-codes 128)
T = 3              # timesteps
N = 16             # nodes per timestep
E = 8              # edges per timestep
N_ROUNDS = 3       # propagate applied 3x per timestep in forward()
TN = T * N         # all timesteps batched into one (48, 128) slab


# ----------------------------------------------------------------------------
# Pallas kernel: single grid step.
#   gather x rows from the HBM embedding table (ids via scalar prefetch),
#   then  out = M^3 @ x @ Wt^3 + Bias
# ----------------------------------------------------------------------------
def spatial_encoding_kernel(ids_ref, emb_hbm, m3_ref, wt3_ref, bias_ref,
                            o_ref, x_vmem, sem):
    # In-kernel embedding gather: 48 row DMAs HBM -> VMEM, one counting sem.
    copies = []
    for r in range(TN):
        c = pltpu.make_async_copy(
            emb_hbm.at[pl.ds(ids_ref[r], 1), :],   # (1, D) row in HBM
            x_vmem.at[pl.ds(r, 1), :],             # (1, D) row in VMEM scratch
            sem.at[0])
        c.start()
        copies.append(c)
    for c in copies:
        c.wait()

    x = x_vmem[...].astype(jnp.bfloat16)                           # (TN, D)
    y = jnp.dot(m3_ref[...], x, preferred_element_type=jnp.float32)  # (TN, D) f32
    # TODO(synk): keep y / Wt^3 in f32 here if closer f32 parity with the
    # PyTorch path is ever required — negligible cost at this size.
    z = jnp.dot(y.astype(jnp.bfloat16), wt3_ref[...],
                preferred_element_type=jnp.float32)                 # (TN, D) f32
    o_ref[...] = z + bias_ref[...]


# ----------------------------------------------------------------------------
# Factory: precompute device-resident constants once, return a jitted forward.
# ----------------------------------------------------------------------------
def make_spatial_encoding(W, b):
    W = jnp.asarray(W, jnp.float32)
    b = jnp.asarray(b, jnp.float32)
    Wt = W.T
    Wt2 = Wt @ Wt
    Wt3_bf16 = (Wt2 @ Wt).astype(jnp.bfloat16)   # (D, D), cached on device
    bWt = b @ Wt                                  # (D,)
    bWt2 = b @ Wt2                                # (D,)

    @jax.jit
    def forward(emb_table, ids, M):
        """emb_table (VOCAB,D) f32, ids (TN,) int32, M (TN,TN) f32 block-diag."""
        # Tiny on-device per-call prep; XLA overlaps it with the kernel.
        M2 = M @ M
        M3 = M2 @ M
        # Bias = M^2·B·Wt^2 + M·B·Wt + B   with B = 1·b  ->  outer-product form.
        bias = (jnp.sum(M2, axis=1, keepdims=True) * bWt2[None, :]
                + jnp.sum(M, axis=1, keepdims=True) * bWt[None, :]
                + b[None, :])                                      # (TN, D) f32

        out = pl.pallas_call(
            spatial_encoding_kernel,
            out_shape=jax.ShapeDtypeStruct((TN, D), jnp.float32),
            grid_spec=pltpu.PrefetchScalarGridSpec(
                num_scalar_prefetch=1,                 # ids -> SMEM
                grid=(1,),
                in_specs=[
                    pl.BlockSpec(memory_space=pl.ANY),               # emb table stays in HBM
                    pl.BlockSpec((TN, TN), lambda i, ids: (0, 0)),   # M^3   (48,48)  bf16
                    pl.BlockSpec((D, D), lambda i, ids: (0, 0)),     # Wt^3  (128,128) bf16
                    pl.BlockSpec((TN, D), lambda i, ids: (0, 0)),    # Bias  (48,128) f32
                ],
                out_specs=pl.BlockSpec((TN, D), lambda i, ids: (0, 0)),
                scratch_shapes=[
                    pltpu.VMEM((TN, D), jnp.float32),                # gathered x
                    pltpu.SemaphoreType.DMA((1,)),                   # counting DMA sem
                ],
            ),
            compiler_params=pltpu.CompilerParams(
                dimension_semantics=("arbitrary",)),
        )(ids, emb_table, M3.astype(jnp.bfloat16), Wt3_bf16, bias)
        return out.reshape(T, N, D)

    return forward


# ----------------------------------------------------------------------------
# Host-side: replay the PyTorch edge loop to build the per-timestep
# propagation matrix M_t (exact, including the `updated`-list behaviour).
# This sequential data-dependent scalar loop has no Pallas equivalent.
# ----------------------------------------------------------------------------
def build_prop_matrix(src, dst, wts, n_nodes):
    C = np.eye(n_nodes, dtype=np.float32)          # n_hat = x.clone()
    updated = []
    for i in range(len(src)):
        s, d, wi = int(src[i]), int(dst[i]), float(wts[i])
        if i not in updated:                       # (verbatim PyTorch condition)
            C[d, :] = 0.0
            C[d, d] = 1.0
            C[d, s] += wi                          # n_hat[d] = x[d] + x[s]*w
            updated.append(d)
        else:
            C[d, s] += wi                          # n_hat[d] += x[s]*w
    return C


def build_block_diag_M(edge_src, edge_dst, edge_weights):
    M_big = np.zeros((TN, TN), np.float32)
    for t in range(T):
        M_big[t * N:(t + 1) * N, t * N:(t + 1) * N] = build_prop_matrix(
            edge_src[t], edge_dst[t], edge_weights[t], N)
    return M_big


# ----------------------------------------------------------------------------
# NumPy reference implementing the PyTorch forward literally (for validation).
# ----------------------------------------------------------------------------
def ref_propagate(x, src, dst, wts, W, b):
    n_hat = x.copy()
    updated = []
    for i in range(len(src)):
        s, d, wi = int(src[i]), int(dst[i]), float(wts[i])
        if i not in updated:
            n_hat[d] = x[d] + x[s] * wi
            updated.append(d)
        else:
            n_hat[d] = n_hat[d] + x[s] * wi
    return n_hat @ W.T + b


def ref_forward(emb_table, W, b, node_features, edge_src, edge_dst, edge_weights):
    outs = []
    for t in range(T):
        x = emb_table[node_features[t]].astype(np.float32)
        for _ in range(N_ROUNDS):
            x = ref_propagate(x, edge_src[t], edge_dst[t], edge_weights[t], W, b)
        outs.append(x)
    return np.stack(outs)


if __name__ == "__main__":
    key = jax.random.PRNGKey(0)
    k_emb, k_w, k_b, k_ids, k_src, k_dst, k_ew = jax.random.split(key, 7)

    # Deterministic parameters (synthetic init, shapes from the module __init__).
    emb_table = 0.02 * jax.random.normal(k_emb, (VOCAB, D), dtype=jnp.float32)
    W = (1.0 / np.sqrt(D)) * jax.random.normal(k_w, (D, D), dtype=jnp.float32)
    b = (1.0 / np.sqrt(D)) * jax.random.normal(k_b, (D,), dtype=jnp.float32)

    # Deterministic synthetic graph inputs.
    node_features = np.array(
        jax.random.randint(k_ids, (T, N), 0, VOCAB), dtype=np.int32)
    edge_src = np.array(jax.random.randint(k_src, (T, E), 0, N), dtype=np.int32)
    edge_dst = np.array(jax.random.randint(k_dst, (T, E), 0, N), dtype=np.int32)
    edge_weights = np.array(
        0.1 * jax.random.normal(k_ew, (T, E)), dtype=np.float32)

    forward = make_spatial_encoding(W, b)   # Wt^3 etc. built once, device-resident

    # Per-call host work: only the exact edge-loop replay (9 KiB matrix).
    M_big = build_block_diag_M(edge_src, edge_dst, edge_weights)
    ids = jnp.asarray(node_features.reshape(-1), jnp.int32)

    out = forward(emb_table, ids, jnp.asarray(M_big, jnp.float32))
    out = jax.block_until_ready(out)

    ref = ref_forward(np.array(emb_table), np.array(W), np.array(b),
                      node_features, edge_src, edge_dst, edge_weights)

    np.testing.assert_allclose(np.array(out), ref, rtol=2e-2, atol=3e-3)
    print("KERNEL_OK")
</pallas_src>

<mosaic_0001>
module attributes {stable_mosaic.version = 11 : i64} {
  func.func @spatial_encoding_kernel(%arg0: i32, %arg1: memref<48xi32, #tpu.memory_space<smem>>, %arg2: memref<64000x128xf32, #tpu.memory_space<any>>, %arg3: memref<48x48xbf16, #tpu.memory_space<vmem>>, %arg4: memref<128x128xbf16, #tpu.memory_space<vmem>>, %arg5: memref<48x128xf32, #tpu.memory_space<vmem>>, %arg6: memref<48x128xf32, #tpu.memory_space<vmem>>, %arg7: memref<48x128xf32, #tpu.memory_space<vmem>>, %arg8: memref<1x!tpu.dma_semaphore, #tpu.memory_space<semaphore_mem>>) attributes {dimension_semantics = [#tpu.dimension_semantics<arbitrary>], iteration_bounds = array<i64: 1>, scalar_prefetch = 1 : i64, scratch_operands = 2 : i64, tpu.core_type = #tpu.core_type<tc>, window_params = [{}, {pipeline_mode = #tpu.pipeline_mode<synchronous>, transform_indices = @transform_1, window_bounds = array<i64: 48, 48>}, {pipeline_mode = #tpu.pipeline_mode<synchronous>, transform_indices = @transform_2, window_bounds = array<i64: 128, 128>}, {pipeline_mode = #tpu.pipeline_mode<synchronous>, transform_indices = @transform_3, window_bounds = array<i64: 48, 128>}, {pipeline_mode = #tpu.pipeline_mode<synchronous>, transform_indices = @transform_4, window_bounds = array<i64: 48, 128>}]} {
    %c0 = arith.constant 0 : index
    %0 = memref.load %arg1[%c0] : memref<48xi32, #tpu.memory_space<smem>>
    %c0_i32 = arith.constant 0 : i32
    %c0_i32_0 = arith.constant 0 : i32
    %1 = tpu.memref_slice %arg2[%0, %c0_i32_0] : memref<64000x128xf32, #tpu.memory_space<any>> -> memref<1x128xf32, #tpu.memory_space<any>>
    %c0_i32_1 = arith.constant 0 : i32
    %c0_i32_2 = arith.constant 0 : i32
    %2 = tpu.memref_slice %arg7[%c0_i32_1, %c0_i32_2] : memref<48x128xf32, #tpu.memory_space<vmem>> -> memref<1x128xf32, #tpu.memory_space<vmem>>
    %3 = tpu.memref_slice %arg8[%c0_i32] : memref<1x!tpu.dma_semaphore, #tpu.memory_space<semaphore_mem>> -> memref<1x!tpu.dma_semaphore, #tpu.memory_space<semaphore_mem>>
    %4 = tpu.memref_squeeze %3 : memref<1x!tpu.dma_semaphore, #tpu.memory_space<semaphore_mem>> -> memref<!tpu.dma_semaphore, #tpu.memory_space<semaphore_mem>>
    tpu.enqueue_dma source(%1 : memref<1x128xf32, #tpu.memory_space<any>>) target(%2 : memref<1x128xf32, #tpu.memory_space<vmem>>) target_semaphore(%4 : memref<!tpu.dma_semaphore, #tpu.memory_space<semaphore_mem>>)
    %c1 = arith.constant 1 : index
    %5 = memref.load %arg1[%c1] : memref<48xi32, #tpu.memory_space<smem>>
    %c0_i32_3 = arith.constant 0 : i32
    %c0_i32_4 = arith.constant 0 : i32
    %6 = tpu.memref_slice %arg2[%5, %c0_i32_4] : memref<64000x128xf32, #tpu.memory_space<any>> -> memref<1x128xf32, #tpu.memory_space<any>>
    %c1_i32 = arith.constant 1 : i32
    %c0_i32_5 = arith.constant 0 : i32
    %7 = tpu.memref_slice %arg7[%c1_i32, %c0_i32_5] : memref<48x128xf32, #tpu.memory_space<vmem>> -> memref<1x128xf32, #tpu.memory_space<vmem>>
    %8 = tpu.memref_slice %arg8[%c0_i32_3] : memref<1x!tpu.dma_semaphore, #tpu.memory_space<semaphore_mem>> -> memref<1x!tpu.dma_semaphore, #tpu.memory_space<semaphore_mem>>
    %9 = tpu.memref_squeeze %8 : memref<1x!tpu.dma_semaphore, #tpu.memory_space<semaphore_mem>> -> memref<!tpu.dma_semaphore, #tpu.memory_space<semaphore_mem>>
    tpu.enqueue_dma source(%6 : memref<1x128xf32, #tpu.memory_space<any>>) target(%7 : memref<1x128xf32, #tpu.memory_space<vmem>>) target_semaphore(%9 : memref<!tpu.dma_semaphore, #tpu.memory_space<semaphore_mem>>)
    %c2 = arith.constant 2 : index
    %10 = memref.load %arg1[%c2] : memref<48xi32, #tpu.memory_space<smem>>
    %c0_i32_6 = arith.constant 0 : i32
    %c0_i32_7 = arith.constant 0 : i32
    %11 = tpu.memref_slice %arg2[%10, %c0_i32_7] : memref<64000x128xf32, #tpu.memory_space<any>> -> memref<1x128xf32, #tpu.memory_space<any>>
    %c2_i32 = arith.constant 2 : i32
    %c0_i32_8 = arith.constant 0 : i32
    %12 = tpu.memref_slice %arg7[%c2_i32, %c0_i32_8] : memref<48x128xf32, #tpu.memory_space<vmem>> -> memref<1x128xf32, #tpu.memory_space<vmem>>
    %13 = tpu.memref_slice %arg8[%c0_i32_6] : memref<1x!tpu.dma_semaphore, #tpu.memory_space<semaphore_mem>> -> memref<1x!tpu.dma_semaphore, #tpu.memory_space<semaphore_mem>>
    %14 = tpu.memref_squeeze %13 : memref<1x!tpu.dma_semaphore, #tpu.memory_space<semaphore_mem>> -> memref<!tpu.dma_semaphore, #tpu.memory_space<semaphore_mem>>
    tpu.enqueue_dma source(%11 : memref<1x128xf32, #tpu.memory_space<any>>) target(%12 : memref<1x128xf32, #tpu.memory_space<vmem>>) target_semaphore(%14 : memref<!tpu.dma_semaphore, #tpu.memory_space<semaphore_mem>>)
    %c3 = arith.constant 3 : index
    %15 = memref.load %arg1[%c3] : memref<48xi32, #tpu.memory_space<smem>>
    %c0_i32_9 = arith.constant 0 : i32
    %c0_i32_10 = arith.constant 0 : i32
    %16 = tpu.memref_slice %arg2[%15, %c0_i32_10] : memref<64000x128xf32, #tpu.memory_space<any>> -> memref<1x128xf32, #tpu.memory_space<any>>
    %c3_i32 = arith.constant 3 : i32
    %c0_i32_11 = arith.constant 0 : i32
    %17 = tpu.memref_slice %arg7[%c3_i32, %c0_i32_11] : memref<48x128xf32, #tpu.memory_space<vmem>> -> memref<1x128xf32, #tpu.memory_space<vmem>>
    %18 = tpu.memref_slice %arg8[%c0_i32_9] : memref<1x!tpu.dma_semaphore, #tpu.memory_space<semaphore_mem>> -> memref<1x!tpu.dma_semaphore, #tpu.memory_space<semaphore_mem>>
    %19 = tpu.memref_squeeze %18 : memref<1x!tpu.dma_semaphore, #tpu.memory_space<semaphore_mem>> -> memref<!tpu.dma_semaphore, #tpu.memory_space<semaphore_mem>>
    tpu.enqueue_dma source(%16 : memref<1x128xf32, #tpu.memory_space<any>>) target(%17 : memref<1x128xf32, #tpu.memory_space<vmem>>) target_semaphore(%19 : memref<!tpu.dma_semaphore, #tpu.memory_space<semaphore_mem>>)
    %c4 = arith.constant 4 : index
    %20 = memref.load %arg1[%c4] : memref<48xi32, #tpu.memory_space<smem>>
    %c0_i32_12 = arith.constant 0 : i32
    %c0_i32_13 = arith.constant 0 : i32
    %21 = tpu.memref_slice %arg2[%20, %c0_i32_13] : memref<64000x128xf32, #tpu.memory_space<any>> -> memref<1x128xf32, #tpu.memory_space<any>>
    %c4_i32 = arith.constant 4 : i32
    %c0_i32_14 = arith.constant 0 : i32
    %22 = tpu.memref_slice %arg7[%c4_i32, %c0_i32_14] : memref<48x128xf32, #tpu.memory_space<vmem>> -> memref<1x128xf32, #tpu.memory_space<vmem>>
    %23 = tpu.memref_slice %arg8[%c0_i32_12] : memref<1x!tpu.dma_semaphore, #tpu.memory_space<semaphore_mem>> -> memref<1x!tpu.dma_semaphore, #tpu.memory_space<semaphore_mem>>
    %24 = tpu.memref_squeeze %23 : memref<1x!tpu.dma_semaphore, #tpu.memory_space<semaphore_mem>> -> memref<!tpu.dma_semaphore, #tpu.memory_space<semaphore_mem>>
    tpu.enqueue_dma source(%21 : memref<1x128xf32, #tpu.memory_space<any>>) target(%22 : memref<1x128xf32, #tpu.memory_space<vmem>>) target_semaphore(%24 : memref<!tpu.dma_semaphore, #tpu.memory_space<semaphore_mem>>)
    %c5 = arith.constant 5 : index
    %25 = memref.load %arg1[%c5] : memref<48xi32, #tpu.memory_space<smem>>
    %c0_i32_15 = arith.constant 0 : i32
    %c0_i32_16 = arith.constant 0 : i32
    %26 = tpu.memref_slice %arg2[%25, %c0_i32_16] : memref<64000x128xf32, #tpu.memory_space<any>> -> memref<1x128xf32, #tpu.memory_space<any>>
    %c5_i32 = arith.constant 5 : i32
    %c0_i32_17 = arith.constant 0 : i32
    %27 = tpu.memref_slice %arg7[%c5_i32, %c0_i32_17] : memref<48x128xf32, #tpu.memory_space<vmem>> -> memref<1x128xf32, #tpu.memory_space<vmem>>
    %28 = tpu.memref_slice %arg8[%c0_i32_15] : memref<1x!tpu.dma_semaphore, #tpu.memory_space<semaphore_mem>> -> memref<1x!tpu.dma_semaphore, #tpu.memory_space<semaphore_mem>>
    %29 = tpu.memref_squeeze %28 : memref<1x!tpu.dma_semaphore, #tpu.memory_space<semaphore_mem>> -> memref<!tpu.dma_semaphore, #tpu.memory_space<semaphore_mem>>
    tpu.enqueue_dma source(%26 : memref<1x128xf32, #tpu.memory_space<any>>) target(%27 : memref<1x128xf32, #tpu.memory_space<vmem>>) target_semaphore(%29 : memref<!tpu.dma_semaphore, #tpu.memory_space<semaphore_mem>>)
    %c6 = arith.constant 6 : index
    %30 = memref.load %arg1[%c6] : memref<48xi32, #tpu.memory_space<smem>>
    %c0_i32_18 = arith.constant 0 : i32
    %c0_i32_19 = arith.constant 0 : i32
    %31 = tpu.memref_slice %arg2[%30, %c0_i32_19] : memref<64000x128xf32, #tpu.memory_space<any>> -> memref<1x128xf32, #tpu.memory_space<any>>
    %c6_i32 = arith.constant 6 : i32
    %c0_i32_20 = arith.constant 0 : i32
    %32 = tpu.memref_slice %arg7[%c6_i32, %c0_i32_20] : memref<48x128xf32, #tpu.memory_space<vmem>> -> memref<1x128xf32, #tpu.memory_space<vmem>>
    %33 = tpu.memref_slice %arg8[%c0_i32_18] : memref<1x!tpu.dma_semaphore, #tpu.memory_space<semaphore_mem>> -> memref<1x!tpu.dma_semaphore, #tpu.memory_space<semaphore_mem>>
    %34 = tpu.memref_squeeze %33 : memref<1x!tpu.dma_semaphore, #tpu.memory_space<semaphore_mem>> -> memref<!tpu.dma_semaphore, #tpu.memory_space<semaphore_mem>>
    tpu.enqueue_dma source(%31 : memref<1x128xf32, #tpu.memory_space<any>>) target(%32 : memref<1x128xf32, #tpu.memory_space<vmem>>) target_semaphore(%34 : memref<!tpu.dma_semaphore, #tpu.memory_space<semaphore_mem>>)
    %c7 = arith.constant 7 : index
    %35 = memref.load %arg1[%c7] : memref<48xi32, #tpu.memory_space<smem>>
    %c0_i32_21 = arith.constant 0 : i32
    %c0_i32_22 = arith.constant 0 : i32
    %36 = tpu.memref_slice %arg2[%35, %c0_i32_22] : memref<64000x128xf32, #tpu.memory_space<any>> -> memref<1x128xf32, #tpu.memory_space<any>>
    %c7_i32 = arith.constant 7 : i32
    %c0_i32_23 = arith.constant 0 : i32
    %37 = tpu.memref_slice %arg7[%c7_i32, %c0_i32_23] : memref<48x128xf32, #tpu.memory_space<vmem>> -> memref<1x128xf32, #tpu.memory_space<vmem>>
    %38 = tpu.memref_slice %arg8[%c0_i32_21] : memref<1x!tpu.dma_semaphore, #tpu.memory_space<semaphore_mem>> -> memref<1x!tpu.dma_semaphore, #tpu.memory_space<semaphore_mem>>
    %39 = tpu.memref_squeeze %38 : memref<1x!tpu.dma_semaphore, #tpu.memory_space<semaphore_mem>> -> memref<!tpu.dma_semaphore, #tpu.memory_space<semaphore_mem>>
    tpu.enqueue_dma source(%36 : memref<1x128xf32, #tpu.memory_space<any>>) target(%37 : memref<1x128xf32, #tpu.memory_space<vmem>>) target_semaphore(%39 : memref<!tpu.dma_semaphore, #tpu.memory_space<semaphore_mem>>)
    %c8 = arith.constant 8 : index
    %40 = memref.load %arg1[%c8] : memref<48xi32, #tpu.memory_space<smem>>
    %c0_i32_24 = arith.constant 0 : i32
    %c0_i32_25 = arith.constant 0 : i32
    %41 = tpu.memref_slice %arg2[%40, %c0_i32_25] : memref<64000x128xf32, #tpu.memory_space<any>> -> memref<1x128xf32, #tpu.memory_space<any>>
    %c8_i32 = arith.constant 8 : i32
    %c0_i32_26 = arith.constant 0 : i32
    %42 = tpu.memref_slice %arg7[%c8_i32, %c0_i32_26] : memref<48x128xf32, #tpu.memory_space<vmem>> -> memref<1x128xf32, #tpu.memory_space<vmem>>
    %43 = tpu.memref_slice %arg8[%c0_i32_24] : memref<1x!tpu.dma_semaphore, #tpu.memory_space<semaphore_mem>> -> memref<1x!tpu.dma_semaphore, #tpu.memory_space<semaphore_mem>>
    %44 = tpu.memref_squeeze %43 : memref<1x!tpu.dma_semaphore, #tpu.memory_space<semaphore_mem>> -> memref<!tpu.dma_semaphore, #tpu.memory_space<semaphore_mem>>
    tpu.enqueue_dma source(%41 : memref<1x128xf32, #tpu.memory_space<any>>) target(%42 : memref<1x128xf32, #tpu.memory_space<vmem>>) target_semaphore(%44 : memref<!tpu.dma_semaphore, #tpu.memory_space<semaphore_mem>>)
    %c9 = arith.constant 9 : index
    %45 = memref.load %arg1[%c9] : memref<48xi32, #tpu.memory_space<smem>>
    %c0_i32_27 = arith.constant 0 : i32
    %c0_i32_28 = arith.constant 0 : i32
    %46 = tpu.memref_slice %arg2[%45, %c0_i32_28] : memref<64000x128xf32, #tpu.memory_space<any>> -> memref<1x128xf32, #tpu.memory_space<any>>
    %c9_i32 = arith.constant 9 : i32
    %c0_i32_29 = arith.constant 0 : i32
    %47 = tpu.memref_slice %arg7[%c9_i32, %c0_i32_29] : memref<48x128xf32, #tpu.memory_space<vmem>> -> memref<1x128xf32, #tpu.memory_space<vmem>>
    %48 = tpu.memref_slice %arg8[%c0_i32_27] : memref<1x!tpu.dma_semaphore, #tpu.memory_space<semaphore_mem>> -> memref<1x!tpu.dma_semaphore, #tpu.memory_space<semaphore_mem>>
    %49 = tpu.memref_squeeze %48 : memref<1x!tpu.dma_semaphore, #tpu.memory_space<semaphore_mem>> -> memref<!tpu.dma_semaphore, #tpu.memory_space<semaphore_mem>>
    tpu.enqueue_dma source(%46 : memref<1x128xf32, #tpu.memory_space<any>>) target(%47 : memref<1x128xf32, #tpu.memory_space<vmem>>) target_semaphore(%49 : memref<!tpu.dma_semaphore, #tpu.memory_space<semaphore_mem>>)
    %c10 = arith.constant 10 : index
    %50 = memref.load %arg1[%c10] : memref<48xi32, #tpu.memory_space<smem>>
    %c0_i32_30 = arith.constant 0 : i32
    %c0_i32_31 = arith.constant 0 : i32
    %51 = tpu.memref_slice %arg2[%50, %c0_i32_31] : memref<64000x128xf32, #tpu.memory_space<any>> -> memref<1x128xf32, #tpu.memory_space<any>>
    %c10_i32 = arith.constant 10 : i32
    %c0_i32_32 = arith.constant 0 : i32
    %52 = tpu.memref_slice %arg7[%c10_i32, %c0_i32_32] : memref<48x128xf32, #tpu.memory_space<vmem>> -> memref<1x128xf32, #tpu.memory_space<vmem>>
    %53 = tpu.memref_slice %arg8[%c0_i32_30] : memref<1x!tpu.dma_semaphore, #tpu.memory_space<semaphore_mem>> -> memref<1x!tpu.dma_semaphore, #tpu.memory_space<semaphore_mem>>
    %54 = tpu.memref_squeeze %53 : memref<1x!tpu.dma_semaphore, #tpu.memory_space<semaphore_mem>> -> memref<!tpu.dma_semaphore, #tpu.memory_space<semaphore_mem>>
    tpu.enqueue_dma source(%51 : memref<1x128xf32, #tpu.memory_space<any>>) target(%52 : memref<1x128xf32, #tpu.memory_space<vmem>>) target_semaphore(%54 : memref<!tpu.dma_semaphore, #tpu.memory_space<semaphore_mem>>)
    %c11 = arith.constant 11 : index
    %55 = memref.load %arg1[%c11] : memref<48xi32, #tpu.memory_space<smem>>
    %c0_i32_33 = arith.constant 0 : i32
    %c0_i32_34 = arith.constant 0 : i32
    %56 = tpu.memref_slice %arg2[%55, %c0_i32_34] : memref<64000x128xf32, #tpu.memory_space<any>> -> memref<1x128xf32, #tpu.memory_space<any>>
    %c11_i32 = arith.constant 11 : i32
    %c0_i32_35 = arith.constant 0 : i32
    %57 = tpu.memref_slice %arg7[%c11_i32, %c0_i32_35] : memref<48x128xf32, #tpu.memory_space<vmem>> -> memref<1x128xf32, #tpu.memory_space<vmem>>
    %58 = tpu.memref_slice %arg8[%c0_i32_33] : memref<1x!tpu.dma_semaphore, #tpu.memory_space<semaphore_mem>> -> memref<1x!tpu.dma_semaphore, #tpu.memory_space<semaphore_mem>>
    %59 = tpu.memref_squeeze %58 : memref<1x!tpu.dma_semaphore, #tpu.memory_space<semaphore_mem>> -> memref<!tpu.dma_semaphore, #tpu.memory_space<semaphore_mem>>
    tpu.enqueue_dma source(%56 : memref<1x128xf32, #tpu.memory_space<any>>) target(%57 : memref<1x128xf32, #tpu.memory_space<vmem>>) target_semaphore(%59 : memref<!tpu.dma_semaphore, #tpu.memory_space<semaphore_mem>>)
    %c12 = arith.constant 12 : index
    %60 = memref.load %arg1[%c12] : memref<48xi32, #tpu.memory_space<smem>>
    %c0_i32_36 = arith.constant 0 : i32
    %c0_i32_37 = arith.constant 0 : i32
    %61 = tpu.memref_slice %arg2[%60, %c0_i32_37] : memref<64000x128xf32, #tpu.memory_space<any>> -> memref<1x128xf32, #tpu.memory_space<any>>
    %c12_i32 = arith.constant 12 : i32
    %c0_i32_38 = arith.constant 0 : i32
    %62 = tpu.memref_slice %arg7[%c12_i32, %c0_i32_38] : memref<48x128xf32, #tpu.memory_space<vmem>> -> memref<1x128xf32, #tpu.memory_space<vmem>>
    %63 = tpu.memref_slice %arg8[%c0_i32_36] : memref<1x!tpu.dma_semaphore, #tpu.memory_space<semaphore_mem>> -> memref<1x!tpu.dma_semaphore, #tpu.memory_space<semaphore_mem>>
    %64 = tpu.memref_squeeze %63 : memref<1x!tpu.dma_semaphore, #tpu.memory_space<semaphore_mem>> -> memref<!tpu.dma_semaphore, #tpu.memory_space<semaphore_mem>>
    tpu.enqueue_dma source(%61 : memref<1x128xf32, #tpu.memory_space<any>>) target(%62 : memref<1x128xf32, #tpu.memory_space<vmem>>) target_semaphore(%64 : memref<!tpu.dma_semaphore, #tpu.memory_space<semaphore_mem>>)
    %c13 = arith.constant 13 : index
    %65 = memref.load %arg1[%c13] : memref<48xi32, #tpu.memory_space<smem>>
    %c0_i32_39 = arith.constant 0 : i32
    %c0_i32_40 = arith.constant 0 : i32
    %66 = tpu.memref_slice %arg2[%65, %c0_i32_40] : memref<64000x128xf32, #tpu.memory_space<any>> -> memref<1x128xf32, #tpu.memory_space<any>>
    %c13_i32 = arith.constant 13 : i32
    %c0_i32_41 = arith.constant 0 : i32
    %67 = tpu.memref_slice %arg7[%c13_i32, %c0_i32_41] : memref<48x128xf32, #tpu.memory_space<vmem>> -> memref<1x128xf32, #tpu.memory_space<vmem>>
    %68 = tpu.memref_slice %arg8[%c0_i32_39] : memref<1x!tpu.dma_semaphore, #tpu.memory_space<semaphore_mem>> -> memref<1x!tpu.dma_semaphore, #tpu.memory_space<semaphore_mem>>
    %69 = tpu.memref_squeeze %68 : memref<1x!tpu.dma_semaphore, #tpu.memory_space<semaphore_mem>> -> memref<!tpu.dma_semaphore, #tpu.memory_space<semaphore_mem>>
    tpu.enqueue_dma source(%66 : memref<1x128xf32, #tpu.memory_space<any>>) target(%67 : memref<1x128xf32, #tpu.memory_space<vmem>>) target_semaphore(%69 : memref<!tpu.dma_semaphore, #tpu.memory_space<semaphore_mem>>)
    %c14 = arith.constant 14 : index
    %70 = memref.load %arg1[%c14] : memref<48xi32, #tpu.memory_space<smem>>
    %c0_i32_42 = arith.constant 0 : i32
    %c0_i32_43 = arith.constant 0 : i32
    %71 = tpu.memref_slice %arg2[%70, %c0_i32_43] : memref<64000x128xf32, #tpu.memory_space<any>> -> memref<1x128xf32, #tpu.memory_space<any>>
    %c14_i32 = arith.constant 14 : i32
    %c0_i32_44 = arith.constant 0 : i32
    %72 = tpu.memref_slice %arg7[%c14_i32, %c0_i32_44] : memref<48x128xf32, #tpu.memory_space<vmem>> -> memref<1x128xf32, #tpu.memory_space<vmem>>
    %73 = tpu.memref_slice %arg8[%c0_i32_42] : memref<1x!tpu.dma_semaphore, #tpu.memory_space<semaphore_mem>> -> memref<1x!tpu.dma_semaphore, #tpu.memory_space<semaphore_mem>>
    %74 = tpu.memref_squeeze %73 : memref<1x!tpu.dma_semaphore, #tpu.memory_space<semaphore_mem>> -> memref<!tpu.dma_semaphore, #tpu.memory_space<semaphore_mem>>
    tpu.enqueue_dma source(%71 : memref<1x128xf32, #tpu.memory_space<any>>) target(%72 : memref<1x128xf32, #tpu.memory_space<vmem>>) target_semaphore(%74 : memref<!tpu.dma_semaphore, #tpu.memory_space<semaphore_mem>>)
    %c15 = arith.constant 15 : index
    %75 = memref.load %arg1[%c15] : memref<48xi32, #tpu.memory_space<smem>>
    %c0_i32_45 = arith.constant 0 : i32
    %c0_i32_46 = arith.constant 0 : i32
    %76 = tpu.memref_slice %arg2[%75, %c0_i32_46] : memref<64000x128xf32, #tpu.memory_space<any>> -> memref<1x128xf32, #tpu.memory_space<any>>
    %c15_i32 = arith.constant 15 : i32
    %c0_i32_47 = arith.constant 0 : i32
    %77 = tpu.memref_slice %arg7[%c15_i32, %c0_i32_47] : memref<48x128xf32, #tpu.memory_space<vmem>> -> memref<1x128xf32, #tpu.memory_space<vmem>>
    %78 = tpu.memref_slice %arg8[%c0_i32_45] : memref<1x!tpu.dma_semaphore, #tpu.memory_space<semaphore_mem>> -> memref<1x!tpu.dma_semaphore, #tpu.memory_space<semaphore_mem>>
    %79 = tpu.memref_squeeze %78 : memref<1x!tpu.dma_semaphore, #tpu.memory_space<semaphore_mem>> -> memref<!tpu.dma_semaphore, #tpu.memory_space<semaphore_mem>>
    tpu.enqueue_dma source(%76 : memref<1x128xf32, #tpu.memory_space<any>>) target(%77 : memref<1x128xf32, #tpu.memory_space<vmem>>) target_semaphore(%79 : memref<!tpu.dma_semaphore, #tpu.memory_space<semaphore_mem>>)
    %c16 = arith.constant 16 : index
    %80 = memref.load %arg1[%c16] : memref<48xi32, #tpu.memory_space<smem>>
    %c0_i32_48 = arith.constant 0 : i32
    %c0_i32_49 = arith.constant 0 : i32
    %81 = tpu.memref_slice %arg2[%80, %c0_i32_49] : memref<64000x128xf32, #tpu.memory_space<any>> -> memref<1x128xf32, #tpu.memory_space<any>>
    %c16_i32 = arith.constant 16 : i32
    %c0_i32_50 = arith.constant 0 : i32
    %82 = tpu.memref_slice %arg7[%c16_i32, %c0_i32_50] : memref<48x128xf32, #tpu.memory_space<vmem>> -> memref<1x128xf32, #tpu.memory_space<vmem>>
    %83 = tpu.memref_slice %arg8[%c0_i32_48] : memref<1x!tpu.dma_semaphore, #tpu.memory_space<semaphore_mem>> -> memref<1x!tpu.dma_semaphore, #tpu.memory_space<semaphore_mem>>
    %84 = tpu.memref_squeeze %83 : memref<1x!tpu.dma_semaphore, #tpu.memory_space<semaphore_mem>> -> memref<!tpu.dma_semaphore, #tpu.memory_space<semaphore_mem>>
    tpu.enqueue_dma source(%81 : memref<1x128xf32, #tpu.memory_space<any>>) target(%82 : memref<1x128xf32, #tpu.memory_space<vmem>>) target_semaphore(%84 : memref<!tpu.dma_semaphore, #tpu.memory_space<semaphore_mem>>)
    %c17 = arith.constant 17 : index
    %85 = memref.load %arg1[%c17] : memref<48xi32, #tpu.memory_space<smem>>
    %c0_i32_51 = arith.constant 0 : i32
    %c0_i32_52 = arith.constant 0 : i32
    %86 = tpu.memref_slice %arg2[%85, %c0_i32_52] : memref<64000x128xf32, #tpu.memory_space<any>> -> memref<1x128xf32, #tpu.memory_space<any>>
    %c17_i32 = arith.constant 17 : i32
    %c0_i32_53 = arith.constant 0 : i32
    %87 = tpu.memref_slice %arg7[%c17_i32, %c0_i32_53] : memref<48x128xf32, #tpu.memory_space<vmem>> -> memref<1x128xf32, #tpu.memory_space<vmem>>
    %88 = tpu.memref_slice %arg8[%c0_i32_51] : memref<1x!tpu.dma_semaphore, #tpu.memory_space<semaphore_mem>> -> memref<1x!tpu.dma_semaphore, #tpu.memory_space<semaphore_mem>>
    %89 = tpu.memref_squeeze %88 : memref<1x!tpu.dma_semaphore, #tpu.memory_space<semaphore_mem>> -> memref<!tpu.dma_semaphore, #tpu.memory_space<semaphore_mem>>
    tpu.enqueue_dma source(%86 : memref<1x128xf32, #tpu.memory_space<any>>) target(%87 : memref<1x128xf32, #tpu.memory_space<vmem>>) target_semaphore(%89 : memref<!tpu.dma_semaphore, #tpu.memory_space<semaphore_mem>>)
    %c18 = arith.constant 18 : index
    %90 = memref.load %arg1[%c18] : memref<48xi32, #tpu.memory_space<smem>>
    %c0_i32_54 = arith.constant 0 : i32
    %c0_i32_55 = arith.constant 0 : i32
    %91 = tpu.memref_slice %arg2[%90, %c0_i32_55] : memref<64000x128xf32, #tpu.memory_space<any>> -> memref<1x128xf32, #tpu.memory_space<any>>
    %c18_i32 = arith.constant 18 : i32
    %c0_i32_56 = arith.constant 0 : i32
    %92 = tpu.memref_slice %arg7[%c18_i32, %c0_i32_56] : memref<48x128xf32, #tpu.memory_space<vmem>> -> memref<1x128xf32, #tpu.memory_space<vmem>>
    %93 = tpu.memref_slice %arg8[%c0_i32_54] : memref<1x!tpu.dma_semaphore, #tpu.memory_space<semaphore_mem>> -> memref<1x!tpu.dma_semaphore, #tpu.memory_space<semaphore_mem>>
    %94 = tpu.memref_squeeze %93 : memref<1x!tpu.dma_semaphore, #tpu.memory_space<semaphore_mem>> -> memref<!tpu.dma_semaphore, #tpu.memory_space<semaphore_mem>>
    tpu.enqueue_dma source(%91 : memref<1x128xf32, #tpu.memory_space<any>>) target(%92 : memref<1x128xf32, #tpu.memory_space<vmem>>) target_semaphore(%94 : memref<!tpu.dma_semaphore, #tpu.memory_space<semaphore_mem>>)
    %c19 = arith.constant 19 : index
    %95 = memref.load %arg1[%c19] : memref<48xi32, #tpu.memory_space<smem>>
    %c0_i32_57 = arith.constant 0 : i32
    %c0_i32_58 = arith.constant 0 : i32
    %96 = tpu.memref_slice %arg2[%95, %c0_i32_58] : memref<64000x128xf32, #tpu.memory_space<any>> -> memref<1x128xf32, #tpu.memory_space<any>>
    %c19_i32 = arith.constant 19 : i32
    %c0_i32_59 = arith.constant 0 : i32
    %97 = tpu.memref_slice %arg7[%c19_i32, %c0_i32_59] : memref<48x128xf32, #tpu.memory_space<vmem>> -> memref<1x128xf32, #tpu.memory_space<vmem>>
    %98 = tpu.memref_slice %arg8[%c0_i32_57] : memref<1x!tpu.dma_semaphore, #tpu.memory_space<semaphore_mem>> -> memref<1x!tpu.dma_semaphore, #tpu.memory_space<semaphore_mem>>
    %99 = tpu.memref_squeeze %98 : memref<1x!tpu.dma_semaphore, #tpu.memory_space<semaphore_mem>> -> memref<!tpu.dma_semaphore, #tpu.memory_space<semaphore_mem>>
    tpu.enqueue_dma source(%96 : memref<1x128xf32, #tpu.memory_space<any>>) target(%97 : memref<1x128xf32, #tpu.memory_space<vmem>>) target_semaphore(%99 : memref<!tpu.dma_semaphore, #tpu.memory_space<semaphore_mem>>)
    %c20 = arith.constant 20 : index
    %100 = memref.load %arg1[%c20] : memref<48xi32, #tpu.memory_space<smem>>
    %c0_i32_60 = arith.constant 0 : i32
    %c0_i32_61 = arith.constant 0 : i32
    %101 = tpu.memref_slice %arg2[%100, %c0_i32_61] : memref<64000x128xf32, #tpu.memory_space<any>> -> memref<1x128xf32, #tpu.memory_space<any>>
    %c20_i32 = arith.constant 20 : i32
    %c0_i32_62 = arith.constant 0 : i32
    %102 = tpu.memref_slice %arg7[%c20_i32, %c0_i32_62] : memref<48x128xf32, #tpu.memory_space<vmem>> -> memref<1x128xf32, #tpu.memory_space<vmem>>
    %103 = tpu.memref_slice %arg8[%c0_i32_60] : memref<1x!tpu.dma_semaphore, #tpu.memory_space<semaphore_mem>> -> memref<1x!tpu.dma_semaphore, #tpu.memory_space<semaphore_mem>>
    %104 = tpu.memref_squeeze %103 : memref<1x!tpu.dma_semaphore, #tpu.memory_space<semaphore_mem>> -> memref<!tpu.dma_semaphore, #tpu.memory_space<semaphore_mem>>
    tpu.enqueue_dma source(%101 : memref<1x128xf32, #tpu.memory_space<any>>) target(%102 : memref<1x128xf32, #tpu.memory_space<vmem>>) target_semaphore(%104 : memref<!tpu.dma_semaphore, #tpu.memory_space<semaphore_mem>>)
    %c21 = arith.constant 21 : index
    %105 = memref.load %arg1[%c21] : memref<48xi32, #tpu.memory_space<smem>>
    %c0_i32_63 = arith.constant 0 : i32
    %c0_i32_64 = arith.constant 0 : i32
    %106 = tpu.memref_slice %arg2[%105, %c0_i32_64] : memref<64000x128xf32, #tpu.memory_space<any>> -> memref<1x128xf32, #tpu.memory_space<any>>
    %c21_i32 = arith.constant 21 : i32
    %c0_i32_65 = arith.constant 0 : i32
    %107 = tpu.memref_slice %arg7[%c21_i32, %c0_i32_65] : memref<48x128xf32, #tpu.memory_space<vmem>> -> memref<1x128xf32, #tpu.memory_space<vmem>>
    %108 = tpu.memref_slice %arg8[%c0_i32_63] : memref<1x!tpu.dma_semaphore, #tpu.memory_space<semaphore_mem>> -> memref<1x!tpu.dma_semaphore, #tpu.memory_space<semaphore_mem>>
    %109 = tpu.memref_squeeze %108 : memref<1x!tpu.dma_semaphore, #tpu.memory_space<semaphore_mem>> -> memref<!tpu.dma_semaphore, #tpu.memory_space<semaphore_mem>>
    tpu.enqueue_dma source(%106 : memref<1x128xf32, #tpu.memory_space<any>>) target(%107 : memref<1x128xf32, #tpu.memory_space<vmem>>) target_semaphore(%109 : memref<!tpu.dma_semaphore, #tpu.memory_space<semaphore_mem>>)
    %c22 = arith.constant 22 : index
    %110 = memref.load %arg1[%c22] : memref<48xi32, #tpu.memory_space<smem>>
    %c0_i32_66 = arith.constant 0 : i32
    %c0_i32_67 = arith.constant 0 : i32
    %111 = tpu.memref_slice %arg2[%110, %c0_i32_67] : memref<64000x128xf32, #tpu.memory_space<any>> -> memref<1x128xf32, #tpu.memory_space<any>>
    %c22_i32 = arith.constant 22 : i32
    %c0_i32_68 = arith.constant 0 : i32
    %112 = tpu.memref_slice %arg7[%c22_i32, %c0_i32_68] : memref<48x128xf32, #tpu.memory_space<vmem>> -> memref<1x128xf32, #tpu.memory_space<vmem>>
    %113 = tpu.memref_slice %arg8[%c0_i32_66] : memref<1x!tpu.dma_semaphore, #tpu.memory_space<semaphore_mem>> -> memref<1x!tpu.dma_semaphore, #tpu.memory_space<semaphore_mem>>
    %114 = tpu.memref_squeeze %113 : memref<1x!tpu.dma_semaphore, #tpu.memory_space<semaphore_mem>> -> memref<!tpu.dma_semaphore, #tpu.memory_space<semaphore_mem>>
    tpu.enqueue_dma source(%111 : memref<1x128xf32, #tpu.memory_space<any>>) target(%112 : memref<1x128xf32, #tpu.memory_space<vmem>>) target_semaphore(%114 : memref<!tpu.dma_semaphore, #tpu.memory_space<semaphore_mem>>)
    %c23 = arith.constant 23 : index
    %115 = memref.load %arg1[%c23] : memref<48xi32, #tpu.memory_space<smem>>
    %c0_i32_69 = arith.constant 0 : i32
    %c0_i32_70 = arith.constant 0 : i32
    %116 = tpu.memref_slice %arg2[%115, %c0_i32_70] : memref<64000x128xf32, #tpu.memory_space<any>> -> memref<1x128xf32, #tpu.memory_space<any>>
    %c23_i32 = arith.constant 23 : i32
    %c0_i32_71 = arith.constant 0 : i32
    %117 = tpu.memref_slice %arg7[%c23_i32, %c0_i32_71] : memref<48x128xf32, #tpu.memory_space<vmem>> -> memref<1x128xf32, #tpu.memory_space<vmem>>
    %118 = tpu.memref_slice %arg8[%c0_i32_69] : memref<1x!tpu.dma_semaphore, #tpu.memory_space<semaphore_mem>> -> memref<1x!tpu.dma_semaphore, #tpu.memory_space<semaphore_mem>>
    %119 = tpu.memref_squeeze %118 : memref<1x!tpu.dma_semaphore, #tpu.memory_space<semaphore_mem>> -> memref<!tpu.dma_semaphore, #tpu.memory_space<semaphore_mem>>
    tpu.enqueue_dma source(%116 : memref<1x128xf32, #tpu.memory_space<any>>) target(%117 : memref<1x128xf32, #tpu.memory_space<vmem>>) target_semaphore(%119 : memref<!tpu.dma_semaphore, #tpu.memory_space<semaphore_mem>>)
    %c24 = arith.constant 24 : index
    %120 = memref.load %arg1[%c24] : memref<48xi32, #tpu.memory_space<smem>>
    %c0_i32_72 = arith.constant 0 : i32
    %c0_i32_73 = arith.constant 0 : i32
    %121 = tpu.memref_slice %arg2[%120, %c0_i32_73] : memref<64000x128xf32, #tpu.memory_space<any>> -> memref<1x128xf32, #tpu.memory_space<any>>
    %c24_i32 = arith.constant 24 : i32
    %c0_i32_74 = arith.constant 0 : i32
    %122 = tpu.memref_slice %arg7[%c24_i32, %c0_i32_74] : memref<48x128xf32, #tpu.memory_space<vmem>> -> memref<1x128xf32, #tpu.memory_space<vmem>>
    %123 = tpu.memref_slice %arg8[%c0_i32_72] : memref<1x!tpu.dma_semaphore, #tpu.memory_space<semaphore_mem>> -> memref<1x!tpu.dma_semaphore, #tpu.memory_space<semaphore_mem>>
    %124 = tpu.memref_squeeze %123 : memref<1x!tpu.dma_semaphore, #tpu.memory_space<semaphore_mem>> -> memref<!tpu.dma_semaphore, #tpu.memory_space<semaphore_mem>>
    tpu.enqueue_dma source(%121 : memref<1x128xf32, #tpu.memory_space<any>>) target(%122 : memref<1x128xf32, #tpu.memory_space<vmem>>) target_semaphore(%124 : memref<!tpu.dma_semaphore, #tpu.memory_space<semaphore_mem>>)
    %c25 = arith.constant 25 : index
    %125 = memref.load %arg1[%c25] : memref<48xi32, #tpu.memory_space<smem>>
    %c0_i32_75 = arith.constant 0 : i32
    %c0_i32_76 = arith.constant 0 : i32
    %126 = tpu.memref_slice %arg2[%125, %c0_i32_76] : memref<64000x128xf32, #tpu.memory_space<any>> -> memref<1x128xf32, #tpu.memory_space<any>>
    %c25_i32 = arith.constant 25 : i32
    %c0_i32_77 = arith.constant 0 : i32
    %127 = tpu.memref_slice %arg7[%c25_i32, %c0_i32_77] : memref<48x128xf32, #tpu.memory_space<vmem>> -> memref<1x128xf32, #tpu.memory_space<vmem>>
    %128 = tpu.memref_slice %arg8[%c0_i32_75] : memref<1x!tpu.dma_semaphore, #tpu.memory_space<semaphore_mem>> -> memref<1x!tpu.dma_semaphore, #tpu.memory_space<semaphore_mem>>
    %129 = tpu.memref_squeeze %128 : memref<1x!tpu.dma_semaphore, #tpu.memory_space<semaphore_mem>> -> memref<!tpu.dma_semaphore, #tpu.memory_space<semaphore_mem>>
    tpu.enqueue_dma source(%126 : memref<1x128xf32, #tpu.memory_space<any>>) target(%127 : memref<1x128xf32, #tpu.memory_space<vmem>>) target_semaphore(%129 : memref<!tpu.dma_semaphore, #tpu.memory_space<semaphore_mem>>)
    %c26 = arith.constant 26 : index
    %130 = memref.load %arg1[%c26] : memref<48xi32, #tpu.memory_space<smem>>
    %c0_i32_78 = arith.constant 0 : i32
    %c0_i32_79 = arith.constant 0 : i32
    %131 = tpu.memref_slice %arg2[%130, %c0_i32_79] : memref<64000x128xf32, #tpu.memory_space<any>> -> memref<1x128xf32, #tpu.memory_space<any>>
    %c26_i32 = arith.constant 26 : i32
    %c0_i32_80 = arith.constant 0 : i32
    %132 = tpu.memref_slice %arg7[%c26_i32, %c0_i32_80] : memref<48x128xf32, #tpu.memory_space<vmem>> -> memref<1x128xf32, #tpu.memory_space<vmem>>
    %133 = tpu.memref_slice %arg8[%c0_i32_78] : memref<1x!tpu.dma_semaphore, #tpu.memory_space<semaphore_mem>> -> memref<1x!tpu.dma_semaphore, #tpu.memory_space<semaphore_mem>>
    %134 = tpu.memref_squeeze %133 : memref<1x!tpu.dma_semaphore, #tpu.memory_space<semaphore_mem>> -> memref<!tpu.dma_semaphore, #tpu.memory_space<semaphore_mem>>
    tpu.enqueue_dma source(%131 : memref<1x128xf32, #tpu.memory_space<any>>) target(%132 : memref<1x128xf32, #tpu.memory_space<vmem>>) target_semaphore(%134 : memref<!tpu.dma_semaphore, #tpu.memory_space<semaphore_mem>>)
    %c27 = arith.constant 27 : index
    %135 = memref.load %arg1[%c27] : memref<48xi32, #tpu.memory_space<smem>>
    %c0_i32_81 = arith.constant 0 : i32
    %c0_i32_82 = arith.constant 0 : i32
    %136 = tpu.memref_slice %arg2[%135, %c0_i32_82] : memref<64000x128xf32, #tpu.memory_space<any>> -> memref<1x128xf32, #tpu.memory_space<any>>
    %c27_i32 = arith.constant 27 : i32
    %c0_i32_83 = arith.constant 0 : i32
    %137 = tpu.memref_slice %arg7[%c27_i32, %c0_i32_83] : memref<48x128xf32, #tpu.memory_space<vmem>> -> memref<1x128xf32, #tpu.memory_space<vmem>>
    %138 = tpu.memref_slice %arg8[%c0_i32_81] : memref<1x!tpu.dma_semaphore, #tpu.memory_space<semaphore_mem>> -> memref<1x!tpu.dma_semaphore, #tpu.memory_space<semaphore_mem>>
    %139 = tpu.memref_squeeze %138 : memref<1x!tpu.dma_semaphore, #tpu.memory_space<semaphore_mem>> -> memref<!tpu.dma_semaphore, #tpu.memory_space<semaphore_mem>>
    tpu.enqueue_dma source(%136 : memref<1x128xf32, #tpu.memory_space<any>>) target(%137 : memref<1x128xf32, #tpu.memory_space<vmem>>) target_semaphore(%139 : memref<!tpu.dma_semaphore, #tpu.memory_space<semaphore_mem>>)
    %c28 = arith.constant 28 : index
    %140 = memref.load %arg1[%c28] : memref<48xi32, #tpu.memory_space<smem>>
    %c0_i32_84 = arith.constant 0 : i32
    %c0_i32_85 = arith.constant 0 : i32
    %141 = tpu.memref_slice %arg2[%140, %c0_i32_85] : memref<64000x128xf32, #tpu.memory_space<any>> -> memref<1x128xf32, #tpu.memory_space<any>>
    %c28_i32 = arith.constant 28 : i32
    %c0_i32_86 = arith.constant 0 : i32
    %142 = tpu.memref_slice %arg7[%c28_i32, %c0_i32_86] : memref<48x128xf32, #tpu.memory_space<vmem>> -> memref<1x128xf32, #tpu.memory_space<vmem>>
    %143 = tpu.memref_slice %arg8[%c0_i32_84] : memref<1x!tpu.dma_semaphore, #tpu.memory_space<semaphore_mem>> -> memref<1x!tpu.dma_semaphore, #tpu.memory_space<semaphore_mem>>
    %144 = tpu.memref_squeeze %143 : memref<1x!tpu.dma_semaphore, #tpu.memory_space<semaphore_mem>> -> memref<!tpu.dma_semaphore, #tpu.memory_space<semaphore_mem>>
    tpu.enqueue_dma source(%141 : memref<1x128xf32, #tpu.memory_space<any>>) target(%142 : memref<1x128xf32, #tpu.memory_space<vmem>>) target_semaphore(%144 : memref<!tpu.dma_semaphore, #tpu.memory_space<semaphore_mem>>)
    %c29 = arith.constant 29 : index
    %145 = memref.load %arg1[%c29] : memref<48xi32, #tpu.memory_space<smem>>
    %c0_i32_87 = arith.constant 0 : i32
    %c0_i32_88 = arith.constant 0 : i32
    %146 = tpu.memref_slice %arg2[%145, %c0_i32_88] : memref<64000x128xf32, #tpu.memory_space<any>> -> memref<1x128xf32, #tpu.memory_space<any>>
    %c29_i32 = arith.constant 29 : i32
    %c0_i32_89 = arith.constant 0 : i32
    %147 = tpu.memref_slice %arg7[%c29_i32, %c0_i32_89] : memref<48x128xf32, #tpu.memory_space<vmem>> -> memref<1x128xf32, #tpu.memory_space<vmem>>
    %148 = tpu.memref_slice %arg8[%c0_i32_87] : memref<1x!tpu.dma_semaphore, #tpu.memory_space<semaphore_mem>> -> memref<1x!tpu.dma_semaphore, #tpu.memory_space<semaphore_mem>>
    %149 = tpu.memref_squeeze %148 : memref<1x!tpu.dma_semaphore, #tpu.memory_space<semaphore_mem>> -> memref<!tpu.dma_semaphore, #tpu.memory_space<semaphore_mem>>
    tpu.enqueue_dma source(%146 : memref<1x128xf32, #tpu.memory_space<any>>) target(%147 : memref<1x128xf32, #tpu.memory_space<vmem>>) target_semaphore(%149 : memref<!tpu.dma_semaphore, #tpu.memory_space<semaphore_mem>>)
    %c30 = arith.constant 30 : index
    %150 = memref.load %arg1[%c30] : memref<48xi32, #tpu.memory_space<smem>>
    %c0_i32_90 = arith.constant 0 : i32
    %c0_i32_91 = arith.constant 0 : i32
    %151 = tpu.memref_slice %arg2[%150, %c0_i32_91] : memref<64000x128xf32, #tpu.memory_space<any>> -> memref<1x128xf32, #tpu.memory_space<any>>
    %c30_i32 = arith.constant 30 : i32
    %c0_i32_92 = arith.constant 0 : i32
    %152 = tpu.memref_slice %arg7[%c30_i32, %c0_i32_92] : memref<48x128xf32, #tpu.memory_space<vmem>> -> memref<1x128xf32, #tpu.memory_space<vmem>>
    %153 = tpu.memref_slice %arg8[%c0_i32_90] : memref<1x!tpu.dma_semaphore, #tpu.memory_space<semaphore_mem>> -> memref<1x!tpu.dma_semaphore, #tpu.memory_space<semaphore_mem>>
    %154 = tpu.memref_squeeze %153 : memref<1x!tpu.dma_semaphore, #tpu.memory_space<semaphore_mem>> -> memref<!tpu.dma_semaphore, #tpu.memory_space<semaphore_mem>>
    tpu.enqueue_dma source(%151 : memref<1x128xf32, #tpu.memory_space<any>>) target(%152 : memref<1x128xf32, #tpu.memory_space<vmem>>) target_semaphore(%154 : memref<!tpu.dma_semaphore, #tpu.memory_space<semaphore_mem>>)
    %c31 = arith.constant 31 : index
    %155 = memref.load %arg1[%c31] : memref<48xi32, #tpu.memory_space<smem>>
    %c0_i32_93 = arith.constant 0 : i32
    %c0_i32_94 = arith.constant 0 : i32
    %156 = tpu.memref_slice %arg2[%155, %c0_i32_94] : memref<64000x128xf32, #tpu.memory_space<any>> -> memref<1x128xf32, #tpu.memory_space<any>>
    %c31_i32 = arith.constant 31 : i32
    %c0_i32_95 = arith.constant 0 : i32
    %157 = tpu.memref_slice %arg7[%c31_i32, %c0_i32_95] : memref<48x128xf32, #tpu.memory_space<vmem>> -> memref<1x128xf32, #tpu.memory_space<vmem>>
    %158 = tpu.memref_slice %arg8[%c0_i32_93] : memref<1x!tpu.dma_semaphore, #tpu.memory_space<semaphore_mem>> -> memref<1x!tpu.dma_semaphore, #tpu.memory_space<semaphore_mem>>
    %159 = tpu.memref_squeeze %158 : memref<1x!tpu.dma_semaphore, #tpu.memory_space<semaphore_mem>> -> memref<!tpu.dma_semaphore, #tpu.memory_space<semaphore_mem>>
    tpu.enqueue_dma source(%156 : memref<1x128xf32, #tpu.memory_space<any>>) target(%157 : memref<1x128xf32, #tpu.memory_space<vmem>>) target_semaphore(%159 : memref<!tpu.dma_semaphore, #tpu.memory_space<semaphore_mem>>)
    %c32 = arith.constant 32 : index
    %160 = memref.load %arg1[%c32] : memref<48xi32, #tpu.memory_space<smem>>
    %c0_i32_96 = arith.constant 0 : i32
    %c0_i32_97 = arith.constant 0 : i32
    %161 = tpu.memref_slice %arg2[%160, %c0_i32_97] : memref<64000x128xf32, #tpu.memory_space<any>> -> memref<1x128xf32, #tpu.memory_space<any>>
    %c32_i32 = arith.constant 32 : i32
    %c0_i32_98 = arith.constant 0 : i32
    %162 = tpu.memref_slice %arg7[%c32_i32, %c0_i32_98] : memref<48x128xf32, #tpu.memory_space<vmem>> -> memref<1x128xf32, #tpu.memory_space<vmem>>
    %163 = tpu.memref_slice %arg8[%c0_i32_96] : memref<1x!tpu.dma_semaphore, #tpu.memory_space<semaphore_mem>> -> memref<1x!tpu.dma_semaphore, #tpu.memory_space<semaphore_mem>>
    %164 = tpu.memref_squeeze %163 : memref<1x!tpu.dma_semaphore, #tpu.memory_space<semaphore_mem>> -> memref<!tpu.dma_semaphore, #tpu.memory_space<semaphore_mem>>
    tpu.enqueue_dma source(%161 : memref<1x128xf32, #tpu.memory_space<any>>) target(%162 : memref<1x128xf32, #tpu.memory_space<vmem>>) target_semaphore(%164 : memref<!tpu.dma_semaphore, #tpu.memory_space<semaphore_mem>>)
    %c33 = arith.constant 33 : index
    %165 = memref.load %arg1[%c33] : memref<48xi32, #tpu.memory_space<smem>>
    %c0_i32_99 = arith.constant 0 : i32
    %c0_i32_100 = arith.constant 0 : i32
    %166 = tpu.memref_slice %arg2[%165, %c0_i32_100] : memref<64000x128xf32, #tpu.memory_space<any>> -> memref<1x128xf32, #tpu.memory_space<any>>
    %c33_i32 = arith.constant 33 : i32
    %c0_i32_101 = arith.constant 0 : i32
    %167 = tpu.memref_slice %arg7[%c33_i32, %c0_i32_101] : memref<48x128xf32, #tpu.memory_space<vmem>> -> memref<1x128xf32, #tpu.memory_space<vmem>>
    %168 = tpu.memref_slice %arg8[%c0_i32_99] : memref<1x!tpu.dma_semaphore, #tpu.memory_space<semaphore_mem>> -> memref<1x!tpu.dma_semaphore, #tpu.memory_space<semaphore_mem>>
    %169 = tpu.memref_squeeze %168 : memref<1x!tpu.dma_semaphore, #tpu.memory_space<semaphore_mem>> -> memref<!tpu.dma_semaphore, #tpu.memory_space<semaphore_mem>>
    tpu.enqueue_dma source(%166 : memref<1x128xf32, #tpu.memory_space<any>>) target(%167 : memref<1x128xf32, #tpu.memory_space<vmem>>) target_semaphore(%169 : memref<!tpu.dma_semaphore, #tpu.memory_space<semaphore_mem>>)
    %c34 = arith.constant 34 : index
    %170 = memref.load %arg1[%c34] : memref<48xi32, #tpu.memory_space<smem>>
    %c0_i32_102 = arith.constant 0 : i32
    %c0_i32_103 = arith.constant 0 : i32
    %171 = tpu.memref_slice %arg2[%170, %c0_i32_103] : memref<64000x128xf32, #tpu.memory_space<any>> -> memref<1x128xf32, #tpu.memory_space<any>>
    %c34_i32 = arith.constant 34 : i32
    %c0_i32_104 = arith.constant 0 : i32
    %172 = tpu.memref_slice %arg7[%c34_i32, %c0_i32_104] : memref<48x128xf32, #tpu.memory_space<vmem>> -> memref<1x128xf32, #tpu.memory_space<vmem>>
    %173 = tpu.memref_slice %arg8[%c0_i32_102] : memref<1x!tpu.dma_semaphore, #tpu.memory_space<semaphore_mem>> -> memref<1x!tpu.dma_semaphore, #tpu.memory_space<semaphore_mem>>
    %174 = tpu.memref_squeeze %173 : memref<1x!tpu.dma_semaphore, #tpu.memory_space<semaphore_mem>> -> memref<!tpu.dma_semaphore, #tpu.memory_space<semaphore_mem>>
    tpu.enqueue_dma source(%171 : memref<1x128xf32, #tpu.memory_space<any>>) target(%172 : memref<1x128xf32, #tpu.memory_space<vmem>>) target_semaphore(%174 : memref<!tpu.dma_semaphore, #tpu.memory_space<semaphore_mem>>)
    %c35 = arith.constant 35 : index
    %175 = memref.load %arg1[%c35] : memref<48xi32, #tpu.memory_space<smem>>
    %c0_i32_105 = arith.constant 0 : i32
    %c0_i32_106 = arith.constant 0 : i32
    %176 = tpu.memref_slice %arg2[%175, %c0_i32_106] : memref<64000x128xf32, #tpu.memory_space<any>> -> memref<1x128xf32, #tpu.memory_space<any>>
    %c35_i32 = arith.constant 35 : i32
    %c0_i32_107 = arith.constant 0 : i32
    %177 = tpu.memref_slice %arg7[%c35_i32, %c0_i32_107] : memref<48x128xf32, #tpu.memory_space<vmem>> -> memref<1x128xf32, #tpu.memory_space<vmem>>
    %178 = tpu.memref_slice %arg8[%c0_i32_105] : memref<1x!tpu.dma_semaphore, #tpu.memory_space<semaphore_mem>> -> memref<1x!tpu.dma_semaphore, #tpu.memory_space<semaphore_mem>>
    %179 = tpu.memref_squeeze %178 : memref<1x!tpu.dma_semaphore, #tpu.memory_space<semaphore_mem>> -> memref<!tpu.dma_semaphore, #tpu.memory_space<semaphore_mem>>
    tpu.enqueue_dma source(%176 : memref<1x128xf32, #tpu.memory_space<any>>) target(%177 : memref<1x128xf32, #tpu.memory_space<vmem>>) target_semaphore(%179 : memref<!tpu.dma_semaphore, #tpu.memory_space<semaphore_mem>>)
    %c36 = arith.constant 36 : index
    %180 = memref.load %arg1[%c36] : memref<48xi32, #tpu.memory_space<smem>>
    %c0_i32_108 = arith.constant 0 : i32
    %c0_i32_109 = arith.constant 0 : i32
    %181 = tpu.memref_slice %arg2[%180, %c0_i32_109] : memref<64000x128xf32, #tpu.memory_space<any>> -> memref<1x128xf32, #tpu.memory_space<any>>
    %c36_i32 = arith.constant 36 : i32
    %c0_i32_110 = arith.constant 0 : i32
    %182 = tpu.memref_slice %arg7[%c36_i32, %c0_i32_110] : memref<48x128xf32, #tpu.memory_space<vmem>> -> memref<1x128xf32, #tpu.memory_space<vmem>>
    %183 = tpu.memref_slice %arg8[%c0_i32_108] : memref<1x!tpu.dma_semaphore, #tpu.memory_space<semaphore_mem>> -> memref<1x!tpu.dma_semaphore, #tpu.memory_space<semaphore_mem>>
    %184 = tpu.memref_squeeze %183 : memref<1x!tpu.dma_semaphore, #tpu.memory_space<semaphore_mem>> -> memref<!tpu.dma_semaphore, #tpu.memory_space<semaphore_mem>>
    tpu.enqueue_dma source(%181 : memref<1x128xf32, #tpu.memory_space<any>>) target(%182 : memref<1x128xf32, #tpu.memory_space<vmem>>) target_semaphore(%184 : memref<!tpu.dma_semaphore, #tpu.memory_space<semaphore_mem>>)
    %c37 = arith.constant 37 : index
    %185 = memref.load %arg1[%c37] : memref<48xi32, #tpu.memory_space<smem>>
    %c0_i32_111 = arith.constant 0 : i32
    %c0_i32_112 = arith.constant 0 : i32
    %186 = tpu.memref_slice %arg2[%185, %c0_i32_112] : memref<64000x128xf32, #tpu.memory_space<any>> -> memref<1x128xf32, #tpu.memory_space<any>>
    %c37_i32 = arith.constant 37 : i32
    %c0_i32_113 = arith.constant 0 : i32
    %187 = tpu.memref_slice %arg7[%c37_i32, %c0_i32_113] : memref<48x128xf32, #tpu.memory_space<vmem>> -> memref<1x128xf32, #tpu.memory_space<vmem>>
    %188 = tpu.memref_slice %arg8[%c0_i32_111] : memref<1x!tpu.dma_semaphore, #tpu.memory_space<semaphore_mem>> -> memref<1x!tpu.dma_semaphore, #tpu.memory_space<semaphore_mem>>
    %189 = tpu.memref_squeeze %188 : memref<1x!tpu.dma_semaphore, #tpu.memory_space<semaphore_mem>> -> memref<!tpu.dma_semaphore, #tpu.memory_space<semaphore_mem>>
    tpu.enqueue_dma source(%186 : memref<1x128xf32, #tpu.memory_space<any>>) target(%187 : memref<1x128xf32, #tpu.memory_space<vmem>>) target_semaphore(%189 : memref<!tpu.dma_semaphore, #tpu.memory_space<semaphore_mem>>)
    %c38 = arith.constant 38 : index
    %190 = memref.load %arg1[%c38] : memref<48xi32, #tpu.memory_space<smem>>
    %c0_i32_114 = arith.constant 0 : i32
    %c0_i32_115 = arith.constant 0 : i32
    %191 = tpu.memref_slice %arg2[%190, %c0_i32_115] : memref<64000x128xf32, #tpu.memory_space<any>> -> memref<1x128xf32, #tpu.memory_space<any>>
    %c38_i32 = arith.constant 38 : i32
    %c0_i32_116 = arith.constant 0 : i32
    %192 = tpu.memref_slice %arg7[%c38_i32, %c0_i32_116] : memref<48x128xf32, #tpu.memory_space<vmem>> -> memref<1x128xf32, #tpu.memory_space<vmem>>
    %193 = tpu.memref_slice %arg8[%c0_i32_114] : memref<1x!tpu.dma_semaphore, #tpu.memory_space<semaphore_mem>> -> memref<1x!tpu.dma_semaphore, #tpu.memory_space<semaphore_mem>>
    %194 = tpu.memref_squeeze %193 : memref<1x!tpu.dma_semaphore, #tpu.memory_space<semaphore_mem>> -> memref<!tpu.dma_semaphore, #tpu.memory_space<semaphore_mem>>
    tpu.enqueue_dma source(%191 : memref<1x128xf32, #tpu.memory_space<any>>) target(%192 : memref<1x128xf32, #tpu.memory_space<vmem>>) target_semaphore(%194 : memref<!tpu.dma_semaphore, #tpu.memory_space<semaphore_mem>>)
    %c39 = arith.constant 39 : index
    %195 = memref.load %arg1[%c39] : memref<48xi32, #tpu.memory_space<smem>>
    %c0_i32_117 = arith.constant 0 : i32
    %c0_i32_118 = arith.constant 0 : i32
    %196 = tpu.memref_slice %arg2[%195, %c0_i32_118] : memref<64000x128xf32, #tpu.memory_space<any>> -> memref<1x128xf32, #tpu.memory_space<any>>
    %c39_i32 = arith.constant 39 : i32
    %c0_i32_119 = arith.constant 0 : i32
    %197 = tpu.memref_slice %arg7[%c39_i32, %c0_i32_119] : memref<48x128xf32, #tpu.memory_space<vmem>> -> memref<1x128xf32, #tpu.memory_space<vmem>>
    %198 = tpu.memref_slice %arg8[%c0_i32_117] : memref<1x!tpu.dma_semaphore, #tpu.memory_space<semaphore_mem>> -> memref<1x!tpu.dma_semaphore, #tpu.memory_space<semaphore_mem>>
    %199 = tpu.memref_squeeze %198 : memref<1x!tpu.dma_semaphore, #tpu.memory_space<semaphore_mem>> -> memref<!tpu.dma_semaphore, #tpu.memory_space<semaphore_mem>>
    tpu.enqueue_dma source(%196 : memref<1x128xf32, #tpu.memory_space<any>>) target(%197 : memref<1x128xf32, #tpu.memory_space<vmem>>) target_semaphore(%199 : memref<!tpu.dma_semaphore, #tpu.memory_space<semaphore_mem>>)
    %c40 = arith.constant 40 : index
    %200 = memref.load %arg1[%c40] : memref<48xi32, #tpu.memory_space<smem>>
    %c0_i32_120 = arith.constant 0 : i32
    %c0_i32_121 = arith.constant 0 : i32
    %201 = tpu.memref_slice %arg2[%200, %c0_i32_121] : memref<64000x128xf32, #tpu.memory_space<any>> -> memref<1x128xf32, #tpu.memory_space<any>>
    %c40_i32 = arith.constant 40 : i32
    %c0_i32_122 = arith.constant 0 : i32
    %202 = tpu.memref_slice %arg7[%c40_i32, %c0_i32_122] : memref<48x128xf32, #tpu.memory_space<vmem>> -> memref<1x128xf32, #tpu.memory_space<vmem>>
    %203 = tpu.memref_slice %arg8[%c0_i32_120] : memref<1x!tpu.dma_semaphore, #tpu.memory_space<semaphore_mem>> -> memref<1x!tpu.dma_semaphore, #tpu.memory_space<semaphore_mem>>
    %204 = tpu.memref_squeeze %203 : memref<1x!tpu.dma_semaphore, #tpu.memory_space<semaphore_mem>> -> memref<!tpu.dma_semaphore, #tpu.memory_space<semaphore_mem>>
    tpu.enqueue_dma source(%201 : memref<1x128xf32, #tpu.memory_space<any>>) target(%202 : memref<1x128xf32, #tpu.memory_space<vmem>>) target_semaphore(%204 : memref<!tpu.dma_semaphore, #tpu.memory_space<semaphore_mem>>)
    %c41 = arith.constant 41 : index
    %205 = memref.load %arg1[%c41] : memref<48xi32, #tpu.memory_space<smem>>
    %c0_i32_123 = arith.constant 0 : i32
    %c0_i32_124 = arith.constant 0 : i32
    %206 = tpu.memref_slice %arg2[%205, %c0_i32_124] : memref<64000x128xf32, #tpu.memory_space<any>> -> memref<1x128xf32, #tpu.memory_space<any>>
    %c41_i32 = arith.constant 41 : i32
    %c0_i32_125 = arith.constant 0 : i32
    %207 = tpu.memref_slice %arg7[%c41_i32, %c0_i32_125] : memref<48x128xf32, #tpu.memory_space<vmem>> -> memref<1x128xf32, #tpu.memory_space<vmem>>
    %208 = tpu.memref_slice %arg8[%c0_i32_123] : memref<1x!tpu.dma_semaphore, #tpu.memory_space<semaphore_mem>> -> memref<1x!tpu.dma_semaphore, #tpu.memory_space<semaphore_mem>>
    %209 = tpu.memref_squeeze %208 : memref<1x!tpu.dma_semaphore, #tpu.memory_space<semaphore_mem>> -> memref<!tpu.dma_semaphore, #tpu.memory_space<semaphore_mem>>
    tpu.enqueue_dma source(%206 : memref<1x128xf32, #tpu.memory_space<any>>) target(%207 : memref<1x128xf32, #tpu.memory_space<vmem>>) target_semaphore(%209 : memref<!tpu.dma_semaphore, #tpu.memory_space<semaphore_mem>>)
    %c42 = arith.constant 42 : index
    %210 = memref.load %arg1[%c42] : memref<48xi32, #tpu.memory_space<smem>>
    %c0_i32_126 = arith.constant 0 : i32
    %c0_i32_127 = arith.constant 0 : i32
    %211 = tpu.memref_slice %arg2[%210, %c0_i32_127] : memref<64000x128xf32, #tpu.memory_space<any>> -> memref<1x128xf32, #tpu.memory_space<any>>
    %c42_i32 = arith.constant 42 : i32
    %c0_i32_128 = arith.constant 0 : i32
    %212 = tpu.memref_slice %arg7[%c42_i32, %c0_i32_128] : memref<48x128xf32, #tpu.memory_space<vmem>> -> memref<1x128xf32, #tpu.memory_space<vmem>>
    %213 = tpu.memref_slice %arg8[%c0_i32_126] : memref<1x!tpu.dma_semaphore, #tpu.memory_space<semaphore_mem>> -> memref<1x!tpu.dma_semaphore, #tpu.memory_space<semaphore_mem>>
    %214 = tpu.memref_squeeze %213 : memref<1x!tpu.dma_semaphore, #tpu.memory_space<semaphore_mem>> -> memref<!tpu.dma_semaphore, #tpu.memory_space<semaphore_mem>>
    tpu.enqueue_dma source(%211 : memref<1x128xf32, #tpu.memory_space<any>>) target(%212 : memref<1x128xf32, #tpu.memory_space<vmem>>) target_semaphore(%214 : memref<!tpu.dma_semaphore, #tpu.memory_space<semaphore_mem>>)
    %c43 = arith.constant 43 : index
    %215 = memref.load %arg1[%c43] : memref<48xi32, #tpu.memory_space<smem>>
    %c0_i32_129 = arith.constant 0 : i32
    %c0_i32_130 = arith.constant 0 : i32
    %216 = tpu.memref_slice %arg2[%215, %c0_i32_130] : memref<64000x128xf32, #tpu.memory_space<any>> -> memref<1x128xf32, #tpu.memory_space<any>>
    %c43_i32 = arith.constant 43 : i32
    %c0_i32_131 = arith.constant 0 : i32
    %217 = tpu.memref_slice %arg7[%c43_i32, %c0_i32_131] : memref<48x128xf32, #tpu.memory_space<vmem>> -> memref<1x128xf32, #tpu.memory_space<vmem>>
    %218 = tpu.memref_slice %arg8[%c0_i32_129] : memref<1x!tpu.dma_semaphore, #tpu.memory_space<semaphore_mem>> -> memref<1x!tpu.dma_semaphore, #tpu.memory_space<semaphore_mem>>
    %219 = tpu.memref_squeeze %218 : memref<1x!tpu.dma_semaphore, #tpu.memory_space<semaphore_mem>> -> memref<!tpu.dma_semaphore, #tpu.memory_space<semaphore_mem>>
    tpu.enqueue_dma source(%216 : memref<1x128xf32, #tpu.memory_space<any>>) target(%217 : memref<1x128xf32, #tpu.memory_space<vmem>>) target_semaphore(%219 : memref<!tpu.dma_semaphore, #tpu.memory_space<semaphore_mem>>)
    %c44 = arith.constant 44 : index
    %220 = memref.load %arg1[%c44] : memref<48xi32, #tpu.memory_space<smem>>
    %c0_i32_132 = arith.constant 0 : i32
    %c0_i32_133 = arith.constant 0 : i32
    %221 = tpu.memref_slice %arg2[%220, %c0_i32_133] : memref<64000x128xf32, #tpu.memory_space<any>> -> memref<1x128xf32, #tpu.memory_space<any>>
    %c44_i32 = arith.constant 44 : i32
    %c0_i32_134 = arith.constant 0 : i32
    %222 = tpu.memref_slice %arg7[%c44_i32, %c0_i32_134] : memref<48x128xf32, #tpu.memory_space<vmem>> -> memref<1x128xf32, #tpu.memory_space<vmem>>
    %223 = tpu.memref_slice %arg8[%c0_i32_132] : memref<1x!tpu.dma_semaphore, #tpu.memory_space<semaphore_mem>> -> memref<1x!tpu.dma_semaphore, #tpu.memory_space<semaphore_mem>>
    %224 = tpu.memref_squeeze %223 : memref<1x!tpu.dma_semaphore, #tpu.memory_space<semaphore_mem>> -> memref<!tpu.dma_semaphore, #tpu.memory_space<semaphore_mem>>
    tpu.enqueue_dma source(%221 : memref<1x128xf32, #tpu.memory_space<any>>) target(%222 : memref<1x128xf32, #tpu.memory_space<vmem>>) target_semaphore(%224 : memref<!tpu.dma_semaphore, #tpu.memory_space<semaphore_mem>>)
    %c45 = arith.constant 45 : index
    %225 = memref.load %arg1[%c45] : memref<48xi32, #tpu.memory_space<smem>>
    %c0_i32_135 = arith.constant 0 : i32
    %c0_i32_136 = arith.constant 0 : i32
    %226 = tpu.memref_slice %arg2[%225, %c0_i32_136] : memref<64000x128xf32, #tpu.memory_space<any>> -> memref<1x128xf32, #tpu.memory_space<any>>
    %c45_i32 = arith.constant 45 : i32
    %c0_i32_137 = arith.constant 0 : i32
    %227 = tpu.memref_slice %arg7[%c45_i32, %c0_i32_137] : memref<48x128xf32, #tpu.memory_space<vmem>> -> memref<1x128xf32, #tpu.memory_space<vmem>>
    %228 = tpu.memref_slice %arg8[%c0_i32_135] : memref<1x!tpu.dma_semaphore, #tpu.memory_space<semaphore_mem>> -> memref<1x!tpu.dma_semaphore, #tpu.memory_space<semaphore_mem>>
    %229 = tpu.memref_squeeze %228 : memref<1x!tpu.dma_semaphore, #tpu.memory_space<semaphore_mem>> -> memref<!tpu.dma_semaphore, #tpu.memory_space<semaphore_mem>>
    tpu.enqueue_dma source(%226 : memref<1x128xf32, #tpu.memory_space<any>>) target(%227 : memref<1x128xf32, #tpu.memory_space<vmem>>) target_semaphore(%229 : memref<!tpu.dma_semaphore, #tpu.memory_space<semaphore_mem>>)
    %c46 = arith.constant 46 : index
    %230 = memref.load %arg1[%c46] : memref<48xi32, #tpu.memory_space<smem>>
    %c0_i32_138 = arith.constant 0 : i32
    %c0_i32_139 = arith.constant 0 : i32
    %231 = tpu.memref_slice %arg2[%230, %c0_i32_139] : memref<64000x128xf32, #tpu.memory_space<any>> -> memref<1x128xf32, #tpu.memory_space<any>>
    %c46_i32 = arith.constant 46 : i32
    %c0_i32_140 = arith.constant 0 : i32
    %232 = tpu.memref_slice %arg7[%c46_i32, %c0_i32_140] : memref<48x128xf32, #tpu.memory_space<vmem>> -> memref<1x128xf32, #tpu.memory_space<vmem>>
    %233 = tpu.memref_slice %arg8[%c0_i32_138] : memref<1x!tpu.dma_semaphore, #tpu.memory_space<semaphore_mem>> -> memref<1x!tpu.dma_semaphore, #tpu.memory_space<semaphore_mem>>
    %234 = tpu.memref_squeeze %233 : memref<1x!tpu.dma_semaphore, #tpu.memory_space<semaphore_mem>> -> memref<!tpu.dma_semaphore, #tpu.memory_space<semaphore_mem>>
    tpu.enqueue_dma source(%231 : memref<1x128xf32, #tpu.memory_space<any>>) target(%232 : memref<1x128xf32, #tpu.memory_space<vmem>>) target_semaphore(%234 : memref<!tpu.dma_semaphore, #tpu.memory_space<semaphore_mem>>)
    %c47 = arith.constant 47 : index
    %235 = memref.load %arg1[%c47] : memref<48xi32, #tpu.memory_space<smem>>
    %c0_i32_141 = arith.constant 0 : i32
    %c0_i32_142 = arith.constant 0 : i32
    %236 = tpu.memref_slice %arg2[%235, %c0_i32_142] : memref<64000x128xf32, #tpu.memory_space<any>> -> memref<1x128xf32, #tpu.memory_space<any>>
    %c47_i32 = arith.constant 47 : i32
    %c0_i32_143 = arith.constant 0 : i32
    %237 = tpu.memref_slice %arg7[%c47_i32, %c0_i32_143] : memref<48x128xf32, #tpu.memory_space<vmem>> -> memref<1x128xf32, #tpu.memory_space<vmem>>
    %238 = tpu.memref_slice %arg8[%c0_i32_141] : memref<1x!tpu.dma_semaphore, #tpu.memory_space<semaphore_mem>> -> memref<1x!tpu.dma_semaphore, #tpu.memory_space<semaphore_mem>>
    %239 = tpu.memref_squeeze %238 : memref<1x!tpu.dma_semaphore, #tpu.memory_space<semaphore_mem>> -> memref<!tpu.dma_semaphore, #tpu.memory_space<semaphore_mem>>
    tpu.enqueue_dma source(%236 : memref<1x128xf32, #tpu.memory_space<any>>) target(%237 : memref<1x128xf32, #tpu.memory_space<vmem>>) target_semaphore(%239 : memref<!tpu.dma_semaphore, #tpu.memory_space<semaphore_mem>>)
    %c0_i32_144 = arith.constant 0 : i32
    %c0_i32_145 = arith.constant 0 : i32
    %240 = tpu.memref_slice %arg2[%0, %c0_i32_145] : memref<64000x128xf32, #tpu.memory_space<any>> -> memref<1x128xf32, #tpu.memory_space<any>>
    %c0_i32_146 = arith.constant 0 : i32
    %c0_i32_147 = arith.constant 0 : i32
    %241 = tpu.memref_slice %arg7[%c0_i32_146, %c0_i32_147] : memref<48x128xf32, #tpu.memory_space<vmem>> -> memref<1x128xf32, #tpu.memory_space<vmem>>
    %242 = tpu.memref_slice %arg8[%c0_i32_144] : memref<1x!tpu.dma_semaphore, #tpu.memory_space<semaphore_mem>> -> memref<1x!tpu.dma_semaphore, #tpu.memory_space<semaphore_mem>>
    %243 = tpu.memref_squeeze %242 : memref<1x!tpu.dma_semaphore, #tpu.memory_space<semaphore_mem>> -> memref<!tpu.dma_semaphore, #tpu.memory_space<semaphore_mem>>
    tpu.wait_dma2 semaphore(%243 : memref<!tpu.dma_semaphore, #tpu.memory_space<semaphore_mem>>) src(%240 : memref<1x128xf32, #tpu.memory_space<any>>) dst(%241 : memref<1x128xf32, #tpu.memory_space<vmem>>)
    %c0_i32_148 = arith.constant 0 : i32
    %c0_i32_149 = arith.constant 0 : i32
    %244 = tpu.memref_slice %arg2[%5, %c0_i32_149] : memref<64000x128xf32, #tpu.memory_space<any>> -> memref<1x128xf32, #tpu.memory_space<any>>
    %c1_i32_150 = arith.constant 1 : i32
    %c0_i32_151 = arith.constant 0 : i32
    %245 = tpu.memref_slice %arg7[%c1_i32_150, %c0_i32_151] : memref<48x128xf32, #tpu.memory_space<vmem>> -> memref<1x128xf32, #tpu.memory_space<vmem>>
    %246 = tpu.memref_slice %arg8[%c0_i32_148] : memref<1x!tpu.dma_semaphore, #tpu.memory_space<semaphore_mem>> -> memref<1x!tpu.dma_semaphore, #tpu.memory_space<semaphore_mem>>
    %247 = tpu.memref_squeeze %246 : memref<1x!tpu.dma_semaphore, #tpu.memory_space<semaphore_mem>> -> memref<!tpu.dma_semaphore, #tpu.memory_space<semaphore_mem>>
    tpu.wait_dma2 semaphore(%247 : memref<!tpu.dma_semaphore, #tpu.memory_space<semaphore_mem>>) src(%244 : memref<1x128xf32, #tpu.memory_space<any>>) dst(%245 : memref<1x128xf32, #tpu.memory_space<vmem>>)
    %c0_i32_152 = arith.constant 0 : i32
    %c0_i32_153 = arith.constant 0 : i32
    %248 = tpu.memref_slice %arg2[%10, %c0_i32_153] : memref<64000x128xf32, #tpu.memory_space<any>> -> memref<1x128xf32, #tpu.memory_space<any>>
    %c2_i32_154 = arith.constant 2 : i32
    %c0_i32_155 = arith.constant 0 : i32
    %249 = tpu.memref_slice %arg7[%c2_i32_154, %c0_i32_155] : memref<48x128xf32, #tpu.memory_space<vmem>> -> memref<1x128xf32, #tpu.memory_space<vmem>>
    %250 = tpu.memref_slice %arg8[%c0_i32_152] : memref<1x!tpu.dma_semaphore, #tpu.memory_space<semaphore_mem>> -> memref<1x!tpu.dma_semaphore, #tpu.memory_space<semaphore_mem>>
    %251 = tpu.memref_squeeze %250 : memref<1x!tpu.dma_semaphore, #tpu.memory_space<semaphore_mem>> -> memref<!tpu.dma_semaphore, #tpu.memory_space<semaphore_mem>>
    tpu.wait_dma2 semaphore(%251 : memref<!tpu.dma_semaphore, #tpu.memory_space<semaphore_mem>>) src(%248 : memref<1x128xf32, #tpu.memory_space<any>>) dst(%249 : memref<1x128xf32, #tpu.memory_space<vmem>>)
    %c0_i32_156 = arith.constant 0 : i32
    %c0_i32_157 = arith.constant 0 : i32
    %252 = tpu.memref_slice %arg2[%15, %c0_i32_157] : memref<64000x128xf32, #tpu.memory_space<any>> -> memref<1x128xf32, #tpu.memory_space<any>>
    %c3_i32_158 = arith.constant 3 : i32
    %c0_i32_159 = arith.constant 0 : i32
    %253 = tpu.memref_slice %arg7[%c3_i32_158, %c0_i32_159] : memref<48x128xf32, #tpu.memory_space<vmem>> -> memref<1x128xf32, #tpu.memory_space<vmem>>
    %254 = tpu.memref_slice %arg8[%c0_i32_156] : memref<1x!tpu.dma_semaphore, #tpu.memory_space<semaphore_mem>> -> memref<1x!tpu.dma_semaphore, #tpu.memory_space<semaphore_mem>>
    %255 = tpu.memref_squeeze %254 : memref<1x!tpu.dma_semaphore, #tpu.memory_space<semaphore_mem>> -> memref<!tpu.dma_semaphore, #tpu.memory_space<semaphore_mem>>
    tpu.wait_dma2 semaphore(%255 : memref<!tpu.dma_semaphore, #tpu.memory_space<semaphore_mem>>) src(%252 : memref<1x128xf32, #tpu.memory_space<any>>) dst(%253 : memref<1x128xf32, #tpu.memory_space<vmem>>)
    %c0_i32_160 = arith.constant 0 : i32
    %c0_i32_161 = arith.constant 0 : i32
    %256 = tpu.memref_slice %arg2[%20, %c0_i32_161] : memref<64000x128xf32, #tpu.memory_space<any>> -> memref<1x128xf32, #tpu.memory_space<any>>
    %c4_i32_162 = arith.constant 4 : i32
    %c0_i32_163 = arith.constant 0 : i32
    %257 = tpu.memref_slice %arg7[%c4_i32_162, %c0_i32_163] : memref<48x128xf32, #tpu.memory_space<vmem>> -> memref<1x128xf32, #tpu.memory_space<vmem>>
    %258 = tpu.memref_slice %arg8[%c0_i32_160] : memref<1x!tpu.dma_semaphore, #tpu.memory_space<semaphore_mem>> -> memref<1x!tpu.dma_semaphore, #tpu.memory_space<semaphore_mem>>
    %259 = tpu.memref_squeeze %258 : memref<1x!tpu.dma_semaphore, #tpu.memory_space<semaphore_mem>> -> memref<!tpu.dma_semaphore, #tpu.memory_space<semaphore_mem>>
    tpu.wait_dma2 semaphore(%259 : memref<!tpu.dma_semaphore, #tpu.memory_space<semaphore_mem>>) src(%256 : memref<1x128xf32, #tpu.memory_space<any>>) dst(%257 : memref<1x128xf32, #tpu.memory_space<vmem>>)
    %c0_i32_164 = arith.constant 0 : i32
    %c0_i32_165 = arith.constant 0 : i32
    %260 = tpu.memref_slice %arg2[%25, %c0_i32_165] : memref<64000x128xf32, #tpu.memory_space<any>> -> memref<1x128xf32, #tpu.memory_space<any>>
    %c5_i32_166 = arith.constant 5 : i32
    %c0_i32_167 = arith.constant 0 : i32
    %261 = tpu.memref_slice %arg7[%c5_i32_166, %c0_i32_167] : memref<48x128xf32, #tpu.memory_space<vmem>> -> memref<1x128xf32, #tpu.memory_space<vmem>>
    %262 = tpu.memref_slice %arg8[%c0_i32_164] : memref<1x!tpu.dma_semaphore, #tpu.memory_space<semaphore_mem>> -> memref<1x!tpu.dma_semaphore, #tpu.memory_space<semaphore_mem>>
    %263 = tpu.memref_squeeze %262 : memref<1x!tpu.dma_semaphore, #tpu.memory_space<semaphore_mem>> -> memref<!tpu.dma_semaphore, #tpu.memory_space<semaphore_mem>>
    tpu.wait_dma2 semaphore(%263 : memref<!tpu.dma_semaphore, #tpu.memory_space<semaphore_mem>>) src(%260 : memref<1x128xf32, #tpu.memory_space<any>>) dst(%261 : memref<1x128xf32, #tpu.memory_space<vmem>>)
    %c0_i32_168 = arith.constant 0 : i32
    %c0_i32_169 = arith.constant 0 : i32
    %264 = tpu.memref_slice %arg2[%30, %c0_i32_169] : memref<64000x128xf32, #tpu.memory_space<any>> -> memref<1x128xf32, #tpu.memory_space<any>>
    %c6_i32_170 = arith.constant 6 : i32
    %c0_i32_171 = arith.constant 0 : i32
    %265 = tpu.memref_slice %arg7[%c6_i32_170, %c0_i32_171] : memref<48x128xf32, #tpu.memory_space<vmem>> -> memref<1x128xf32, #tpu.memory_space<vmem>>
    %266 = tpu.memref_slice %arg8[%c0_i32_168] : memref<1x!tpu.dma_semaphore, #tpu.memory_space<semaphore_mem>> -> memref<1x!tpu.dma_semaphore, #tpu.memory_space<semaphore_mem>>
    %267 = tpu.memref_squeeze %266 : memref<1x!tpu.dma_semaphore, #tpu.memory_space<semaphore_mem>> -> memref<!tpu.dma_semaphore, #tpu.memory_space<semaphore_mem>>
    tpu.wait_dma2 semaphore(%267 : memref<!tpu.dma_semaphore, #tpu.memory_space<semaphore_mem>>) src(%264 : memref<1x128xf32, #tpu.memory_space<any>>) dst(%265 : memref<1x128xf32, #tpu.memory_space<vmem>>)
    %c0_i32_172 = arith.constant 0 : i32
    %c0_i32_173 = arith.constant 0 : i32
    %268 = tpu.memref_slice %arg2[%35, %c0_i32_173] : memref<64000x128xf32, #tpu.memory_space<any>> -> memref<1x128xf32, #tpu.memory_space<any>>
    %c7_i32_174 = arith.constant 7 : i32
    %c0_i32_175 = arith.constant 0 : i32
    %269 = tpu.memref_slice %arg7[%c7_i32_174, %c0_i32_175] : memref<48x128xf32, #tpu.memory_space<vmem>> -> memref<1x128xf32, #tpu.memory_space<vmem>>
    %270 = tpu.memref_slice %arg8[%c0_i32_172] : memref<1x!tpu.dma_semaphore, #tpu.memory_space<semaphore_mem>> -> memref<1x!tpu.dma_semaphore, #tpu.memory_space<semaphore_mem>>
    %271 = tpu.memref_squeeze %270 : memref<1x!tpu.dma_semaphore, #tpu.memory_space<semaphore_mem>> -> memref<!tpu.dma_semaphore, #tpu.memory_space<semaphore_mem>>
    tpu.wait_dma2 semaphore(%271 : memref<!tpu.dma_semaphore, #tpu.memory_space<semaphore_mem>>) src(%268 : memref<1x128xf32, #tpu.memory_space<any>>) dst(%269 : memref<1x128xf32, #tpu.memory_space<vmem>>)
    %c0_i32_176 = arith.constant 0 : i32
    %c0_i32_177 = arith.constant 0 : i32
    %272 = tpu.memref_slice %arg2[%40, %c0_i32_177] : memref<64000x128xf32, #tpu.memory_space<any>> -> memref<1x128xf32, #tpu.memory_space<any>>
    %c8_i32_178 = arith.constant 8 : i32
    %c0_i32_179 = arith.constant 0 : i32
    %273 = tpu.memref_slice %arg7[%c8_i32_178, %c0_i32_179] : memref<48x128xf32, #tpu.memory_space<vmem>> -> memref<1x128xf32, #tpu.memory_space<vmem>>
    %274 = tpu.memref_slice %arg8[%c0_i32_176] : memref<1x!tpu.dma_semaphore, #tpu.memory_space<semaphore_mem>> -> memref<1x!tpu.dma_semaphore, #tpu.memory_space<semaphore_mem>>
    %275 = tpu.memref_squeeze %274 : memref<1x!tpu.dma_semaphore, #tpu.memory_space<semaphore_mem>> -> memref<!tpu.dma_semaphore, #tpu.memory_space<semaphore_mem>>
    tpu.wait_dma2 semaphore(%275 : memref<!tpu.dma_semaphore, #tpu.memory_space<semaphore_mem>>) src(%272 : memref<1x128xf32, #tpu.memory_space<any>>) dst(%273 : memref<1x128xf32, #tpu.memory_space<vmem>>)
    %c0_i32_180 = arith.constant 0 : i32
    %c0_i32_181 = arith.constant 0 : i32
    %276 = tpu.memref_slice %arg2[%45, %c0_i32_181] : memref<64000x128xf32, #tpu.memory_space<any>> -> memref<1x128xf32, #tpu.memory_space<any>>
    %c9_i32_182 = arith.constant 9 : i32
    %c0_i32_183 = arith.constant 0 : i32
    %277 = tpu.memref_slice %arg7[%c9_i32_182, %c0_i32_183] : memref<48x128xf32, #tpu.memory_space<vmem>> -> memref<1x128xf32, #tpu.memory_space<vmem>>
    %278 = tpu.memref_slice %arg8[%c0_i32_180] : memref<1x!tpu.dma_semaphore, #tpu.memory_space<semaphore_mem>> -> memref<1x!tpu.dma_semaphore, #tpu.memory_space<semaphore_mem>>
    %279 = tpu.memref_squeeze %278 : memref<1x!tpu.dma_semaphore, #tpu.memory_space<semaphore_mem>> -> memref<!tpu.dma_semaphore, #tpu.memory_space<semaphore_mem>>
    tpu.wait_dma2 semaphore(%279 : memref<!tpu.dma_semaphore, #tpu.memory_space<semaphore_mem>>) src(%276 : memref<1x128xf32, #tpu.memory_space<any>>) dst(%277 : memref<1x128xf32, #tpu.memory_space<vmem>>)
    %c0_i32_184 = arith.constant 0 : i32
    %c0_i32_185 = arith.constant 0 : i32
    %280 = tpu.memref_slice %arg2[%50, %c0_i32_185] : memref<64000x128xf32, #tpu.memory_space<any>> -> memref<1x128xf32, #tpu.memory_space<any>>
    %c10_i32_186 = arith.constant 10 : i32
    %c0_i32_187 = arith.constant 0 : i32
    %281 = tpu.memref_slice %arg7[%c10_i32_186, %c0_i32_187] : memref<48x128xf32, #tpu.memory_space<vmem>> -> memref<1x128xf32, #tpu.memory_space<vmem>>
    %282 = tpu.memref_slice %arg8[%c0_i32_184] : memref<1x!tpu.dma_semaphore, #tpu.memory_space<semaphore_mem>> -> memref<1x!tpu.dma_semaphore, #tpu.memory_space<semaphore_mem>>
    %283 = tpu.memref_squeeze %282 : memref<1x!tpu.dma_semaphore, #tpu.memory_space<semaphore_mem>> -> memref<!tpu.dma_semaphore, #tpu.memory_space<semaphore_mem>>
    tpu.wait_dma2 semaphore(%283 : memref<!tpu.dma_semaphore, #tpu.memory_space<semaphore_mem>>) src(%280 : memref<1x128xf32, #tpu.memory_space<any>>) dst(%281 : memref<1x128xf32, #tpu.memory_space<vmem>>)
    %c0_i32_188 = arith.constant 0 : i32
    %c0_i32_189 = arith.constant 0 : i32
    %284 = tpu.memref_slice %arg2[%55, %c0_i32_189] : memref<64000x128xf32, #tpu.memory_space<any>> -> memref<1x128xf32, #tpu.memory_space<any>>
    %c11_i32_190 = arith.constant 11 : i32
    %c0_i32_191 = arith.constant 0 : i32
    %285 = tpu.memref_slice %arg7[%c11_i32_190, %c0_i32_191] : memref<48x128xf32, #tpu.memory_space<vmem>> -> memref<1x128xf32, #tpu.memory_space<vmem>>
    %286 = tpu.memref_slice %arg8[%c0_i32_188] : memref<1x!tpu.dma_semaphore, #tpu.memory_space<semaphore_mem>> -> memref<1x!tpu.dma_semaphore, #tpu.memory_space<semaphore_mem>>
    %287 = tpu.memref_squeeze %286 : memref<1x!tpu.dma_semaphore, #tpu.memory_space<semaphore_mem>> -> memref<!tpu.dma_semaphore, #tpu.memory_space<semaphore_mem>>
    tpu.wait_dma2 semaphore(%287 : memref<!tpu.dma_semaphore, #tpu.memory_space<semaphore_mem>>) src(%284 : memref<1x128xf32, #tpu.memory_space<any>>) dst(%285 : memref<1x128xf32, #tpu.memory_space<vmem>>)
    %c0_i32_192 = arith.constant 0 : i32
    %c0_i32_193 = arith.constant 0 : i32
    %288 = tpu.memref_slice %arg2[%60, %c0_i32_193] : memref<64000x128xf32, #tpu.memory_space<any>> -> memref<1x128xf32, #tpu.memory_space<any>>
    %c12_i32_194 = arith.constant 12 : i32
    %c0_i32_195 = arith.constant 0 : i32
    %289 = tpu.memref_slice %arg7[%c12_i32_194, %c0_i32_195] : memref<48x128xf32, #tpu.memory_space<vmem>> -> memref<1x128xf32, #tpu.memory_space<vmem>>
    %290 = tpu.memref_slice %arg8[%c0_i32_192] : memref<1x!tpu.dma_semaphore, #tpu.memory_space<semaphore_mem>> -> memref<1x!tpu.dma_semaphore, #tpu.memory_space<semaphore_mem>>
    %291 = tpu.memref_squeeze %290 : memref<1x!tpu.dma_semaphore, #tpu.memory_space<semaphore_mem>> -> memref<!tpu.dma_semaphore, #tpu.memory_space<semaphore_mem>>
    tpu.wait_dma2 semaphore(%291 : memref<!tpu.dma_semaphore, #tpu.memory_space<semaphore_mem>>) src(%288 : memref<1x128xf32, #tpu.memory_space<any>>) dst(%289 : memref<1x128xf32, #tpu.memory_space<vmem>>)
    %c0_i32_196 = arith.constant 0 : i32
    %c0_i32_197 = arith.constant 0 : i32
    %292 = tpu.memref_slice %arg2[%65, %c0_i32_197] : memref<64000x128xf32, #tpu.memory_space<any>> -> memref<1x128xf32, #tpu.memory_space<any>>
    %c13_i32_198 = arith.constant 13 : i32
    %c0_i32_199 = arith.constant 0 : i32
    %293 = tpu.memref_slice %arg7[%c13_i32_198, %c0_i32_199] : memref<48x128xf32, #tpu.memory_space<vmem>> -> memref<1x128xf32, #tpu.memory_space<vmem>>
    %294 = tpu.memref_slice %arg8[%c0_i32_196] : memref<1x!tpu.dma_semaphore, #tpu.memory_space<semaphore_mem>> -> memref<1x!tpu.dma_semaphore, #tpu.memory_space<semaphore_mem>>
    %295 = tpu.memref_squeeze %294 : memref<1x!tpu.dma_semaphore, #tpu.memory_space<semaphore_mem>> -> memref<!tpu.dma_semaphore, #tpu.memory_space<semaphore_mem>>
    tpu.wait_dma2 semaphore(%295 : memref<!tpu.dma_semaphore, #tpu.memory_space<semaphore_mem>>) src(%292 : memref<1x128xf32, #tpu.memory_space<any>>) dst(%293 : memref<1x128xf32, #tpu.memory_space<vmem>>)
    %c0_i32_200 = arith.constant 0 : i32
    %c0_i32_201 = arith.constant 0 : i32
    %296 = tpu.memref_slice %arg2[%70, %c0_i32_201] : memref<64000x128xf32, #tpu.memory_space<any>> -> memref<1x128xf32, #tpu.memory_space<any>>
    %c14_i32_202 = arith.constant 14 : i32
    %c0_i32_203 = arith.constant 0 : i32
    %297 = tpu.memref_slice %arg7[%c14_i32_202, %c0_i32_203] : memref<48x128xf32, #tpu.memory_space<vmem>> -> memref<1x128xf32, #tpu.memory_space<vmem>>
    %298 = tpu.memref_slice %arg8[%c0_i32_200] : memref<1x!tpu.dma_semaphore, #tpu.memory_space<semaphore_mem>> -> memref<1x!tpu.dma_semaphore, #tpu.memory_space<semaphore_mem>>
    %299 = tpu.memref_squeeze %298 : memref<1x!tpu.dma_semaphore, #tpu.memory_space<semaphore_mem>> -> memref<!tpu.dma_semaphore, #tpu.memory_space<semaphore_mem>>
    tpu.wait_dma2 semaphore(%299 : memref<!tpu.dma_semaphore, #tpu.memory_space<semaphore_mem>>) src(%296 : memref<1x128xf32, #tpu.memory_space<any>>) dst(%297 : memref<1x128xf32, #tpu.memory_space<vmem>>)
    %c0_i32_204 = arith.constant 0 : i32
    %c0_i32_205 = arith.constant 0 : i32
    %300 = tpu.memref_slice %arg2[%75, %c0_i32_205] : memref<64000x128xf32, #tpu.memory_space<any>> -> memref<1x128xf32, #tpu.memory_space<any>>
    %c15_i32_206 = arith.constant 15 : i32
    %c0_i32_207 = arith.constant 0 : i32
    %301 = tpu.memref_slice %arg7[%c15_i32_206, %c0_i32_207] : memref<48x128xf32, #tpu.memory_space<vmem>> -> memref<1x128xf32, #tpu.memory_space<vmem>>
    %302 = tpu.memref_slice %arg8[%c0_i32_204] : memref<1x!tpu.dma_semaphore, #tpu.memory_space<semaphore_mem>> -> memref<1x!tpu.dma_semaphore, #tpu.memory_space<semaphore_mem>>
    %303 = tpu.memref_squeeze %302 : memref<1x!tpu.dma_semaphore, #tpu.memory_space<semaphore_mem>> -> memref<!tpu.dma_semaphore, #tpu.memory_space<semaphore_mem>>
    tpu.wait_dma2 semaphore(%303 : memref<!tpu.dma_semaphore, #tpu.memory_space<semaphore_mem>>) src(%300 : memref<1x128xf32, #tpu.memory_space<any>>) dst(%301 : memref<1x128xf32, #tpu.memory_space<vmem>>)
    %c0_i32_208 = arith.constant 0 : i32
    %c0_i32_209 = arith.constant 0 : i32
    %304 = tpu.memref_slice %arg2[%80, %c0_i32_209] : memref<64000x128xf32, #tpu.memory_space<any>> -> memref<1x128xf32, #tpu.memory_space<any>>
    %c16_i32_210 = arith.constant 16 : i32
    %c0_i32_211 = arith.constant 0 : i32
    %305 = tpu.memref_slice %arg7[%c16_i32_210, %c0_i32_211] : memref<48x128xf32, #tpu.memory_space<vmem>> -> memref<1x128xf32, #tpu.memory_space<vmem>>
    %306 = tpu.memref_slice %arg8[%c0_i32_208] : memref<1x!tpu.dma_semaphore, #tpu.memory_space<semaphore_mem>> -> memref<1x!tpu.dma_semaphore, #tpu.memory_space<semaphore_mem>>
    %307 = tpu.memref_squeeze %306 : memref<1x!tpu.dma_semaphore, #tpu.memory_space<semaphore_mem>> -> memref<!tpu.dma_semaphore, #tpu.memory_space<semaphore_mem>>
    tpu.wait_dma2 semaphore(%307 : memref<!tpu.dma_semaphore, #tpu.memory_space<semaphore_mem>>) src(%304 : memref<1x128xf32, #tpu.memory_space<any>>) dst(%305 : memref<1x128xf32, #tpu.memory_space<vmem>>)
    %c0_i32_212 = arith.constant 0 : i32
    %c0_i32_213 = arith.constant 0 : i32
    %308 = tpu.memref_slice %arg2[%85, %c0_i32_213] : memref<64000x128xf32, #tpu.memory_space<any>> -> memref<1x128xf32, #tpu.memory_space<any>>
    %c17_i32_214 = arith.constant 17 : i32
    %c0_i32_215 = arith.constant 0 : i32
    %309 = tpu.memref_slice %arg7[%c17_i32_214, %c0_i32_215] : memref<48x128xf32, #tpu.memory_space<vmem>> -> memref<1x128xf32, #tpu.memory_space<vmem>>
    %310 = tpu.memref_slice %arg8[%c0_i32_212] : memref<1x!tpu.dma_semaphore, #tpu.memory_space<semaphore_mem>> -> memref<1x!tpu.dma_semaphore, #tpu.memory_space<semaphore_mem>>
    %311 = tpu.memref_squeeze %310 : memref<1x!tpu.dma_semaphore, #tpu.memory_space<semaphore_mem>> -> memref<!tpu.dma_semaphore, #tpu.memory_space<semaphore_mem>>
    tpu.wait_dma2 semaphore(%311 : memref<!tpu.dma_semaphore, #tpu.memory_space<semaphore_mem>>) src(%308 : memref<1x128xf32, #tpu.memory_space<any>>) dst(%309 : memref<1x128xf32, #tpu.memory_space<vmem>>)
    %c0_i32_216 = arith.constant 0 : i32
    %c0_i32_217 = arith.constant 0 : i32
    %312 = tpu.memref_slice %arg2[%90, %c0_i32_217] : memref<64000x128xf32, #tpu.memory_space<any>> -> memref<1x128xf32, #tpu.memory_space<any>>
    %c18_i32_218 = arith.constant 18 : i32
    %c0_i32_219 = arith.constant 0 : i32
    %313 = tpu.memref_slice %arg7[%c18_i32_218, %c0_i32_219] : memref<48x128xf32, #tpu.memory_space<vmem>> -> memref<1x128xf32, #tpu.memory_space<vmem>>
    %314 = tpu.memref_slice %arg8[%c0_i32_216] : memref<1x!tpu.dma_semaphore, #tpu.memory_space<semaphore_mem>> -> memref<1x!tpu.dma_semaphore, #tpu.memory_space<semaphore_mem>>
    %315 = tpu.memref_squeeze %314 : memref<1x!tpu.dma_semaphore, #tpu.memory_space<semaphore_mem>> -> memref<!tpu.dma_semaphore, #tpu.memory_space<semaphore_mem>>
    tpu.wait_dma2 semaphore(%315 : memref<!tpu.dma_semaphore, #tpu.memory_space<semaphore_mem>>) src(%312 : memref<1x128xf32, #tpu.memory_space<any>>) dst(%313 : memref<1x128xf32, #tpu.memory_space<vmem>>)
    %c0_i32_220 = arith.constant 0 : i32
    %c0_i32_221 = arith.constant 0 : i32
    %316 = tpu.memref_slice %arg2[%95, %c0_i32_221] : memref<64000x128xf32, #tpu.memory_space<any>> -> memref<1x128xf32, #tpu.memory_space<any>>
    %c19_i32_222 = arith.constant 19 : i32
    %c0_i32_223 = arith.constant 0 : i32
    %317 = tpu.memref_slice %arg7[%c19_i32_222, %c0_i32_223] : memref<48x128xf32, #tpu.memory_space<vmem>> -> memref<1x128xf32, #tpu.memory_space<vmem>>
    %318 = tpu.memref_slice %arg8[%c0_i32_220] : memref<1x!tpu.dma_semaphore, #tpu.memory_space<semaphore_mem>> -> memref<1x!tpu.dma_semaphore, #tpu.memory_space<semaphore_mem>>
    %319 = tpu.memref_squeeze %318 : memref<1x!tpu.dma_semaphore, #tpu.memory_space<semaphore_mem>> -> memref<!tpu.dma_semaphore, #tpu.memory_space<semaphore_mem>>
    tpu.wait_dma2 semaphore(%319 : memref<!tpu.dma_semaphore, #tpu.memory_space<semaphore_mem>>) src(%316 : memref<1x128xf32, #tpu.memory_space<any>>) dst(%317 : memref<1x128xf32, #tpu.memory_space<vmem>>)
    %c0_i32_224 = arith.constant 0 : i32
    %c0_i32_225 = arith.constant 0 : i32
    %320 = tpu.memref_slice %arg2[%100, %c0_i32_225] : memref<64000x128xf32, #tpu.memory_space<any>> -> memref<1x128xf32, #tpu.memory_space<any>>
    %c20_i32_226 = arith.constant 20 : i32
    %c0_i32_227 = arith.constant 0 : i32
    %321 = tpu.memref_slice %arg7[%c20_i32_226, %c0_i32_227] : memref<48x128xf32, #tpu.memory_space<vmem>> -> memref<1x128xf32, #tpu.memory_space<vmem>>
    %322 = tpu.memref_slice %arg8[%c0_i32_224] : memref<1x!tpu.dma_semaphore, #tpu.memory_space<semaphore_mem>> -> memref<1x!tpu.dma_semaphore, #tpu.memory_space<semaphore_mem>>
    %323 = tpu.memref_squeeze %322 : memref<1x!tpu.dma_semaphore, #tpu.memory_space<semaphore_mem>> -> memref<!tpu.dma_semaphore, #tpu.memory_space<semaphore_mem>>
    tpu.wait_dma2 semaphore(%323 : memref<!tpu.dma_semaphore, #tpu.memory_space<semaphore_mem>>) src(%320 : memref<1x128xf32, #tpu.memory_space<any>>) dst(%321 : memref<1x128xf32, #tpu.memory_space<vmem>>)
    %c0_i32_228 = arith.constant 0 : i32
    %c0_i32_229 = arith.constant 0 : i32
    %324 = tpu.memref_slice %arg2[%105, %c0_i32_229] : memref<64000x128xf32, #tpu.memory_space<any>> -> memref<1x128xf32, #tpu.memory_space<any>>
    %c21_i32_230 = arith.constant 21 : i32
    %c0_i32_231 = arith.constant 0 : i32
    %325 = tpu.memref_slice %arg7[%c21_i32_230, %c0_i32_231] : memref<48x128xf32, #tpu.memory_space<vmem>> -> memref<1x128xf32, #tpu.memory_space<vmem>>
    %326 = tpu.memref_slice %arg8[%c0_i32_228] : memref<1x!tpu.dma_semaphore, #tpu.memory_space<semaphore_mem>> -> memref<1x!tpu.dma_semaphore, #tpu.memory_space<semaphore_mem>>
    %327 = tpu.memref_squeeze %326 : memref<1x!tpu.dma_semaphore, #tpu.memory_space<semaphore_mem>> -> memref<!tpu.dma_semaphore, #tpu.memory_space<semaphore_mem>>
    tpu.wait_dma2 semaphore(%327 : memref<!tpu.dma_semaphore, #tpu.memory_space<semaphore_mem>>) src(%324 : memref<1x128xf32, #tpu.memory_space<any>>) dst(%325 : memref<1x128xf32, #tpu.memory_space<vmem>>)
    %c0_i32_232 = arith.constant 0 : i32
    %c0_i32_233 = arith.constant 0 : i32
    %328 = tpu.memref_slice %arg2[%110, %c0_i32_233] : memref<64000x128xf32, #tpu.memory_space<any>> -> memref<1x128xf32, #tpu.memory_space<any>>
    %c22_i32_234 = arith.constant 22 : i32
    %c0_i32_235 = arith.constant 0 : i32
    %329 = tpu.memref_slice %arg7[%c22_i32_234, %c0_i32_235] : memref<48x128xf32, #tpu.memory_space<vmem>> -> memref<1x128xf32, #tpu.memory_space<vmem>>
    %330 = tpu.memref_slice %arg8[%c0_i32_232] : memref<1x!tpu.dma_semaphore, #tpu.memory_space<semaphore_mem>> -> memref<1x!tpu.dma_semaphore, #tpu.memory_space<semaphore_mem>>
    %331 = tpu.memref_squeeze %330 : memref<1x!tpu.dma_semaphore, #tpu.memory_space<semaphore_mem>> -> memref<!tpu.dma_semaphore, #tpu.memory_space<semaphore_mem>>
    tpu.wait_dma2 semaphore(%331 : memref<!tpu.dma_semaphore, #tpu.memory_space<semaphore_mem>>) src(%328 : memref<1x128xf32, #tpu.memory_space<any>>) dst(%329 : memref<1x128xf32, #tpu.memory_space<vmem>>)
    %c0_i32_236 = arith.constant 0 : i32
    %c0_i32_237 = arith.constant 0 : i32
    %332 = tpu.memref_slice %arg2[%115, %c0_i32_237] : memref<64000x128xf32, #tpu.memory_space<any>> -> memref<1x128xf32, #tpu.memory_space<any>>
    %c23_i32_238 = arith.constant 23 : i32
    %c0_i32_239 = arith.constant 0 : i32
    %333 = tpu.memref_slice %arg7[%c23_i32_238, %c0_i32_239] : memref<48x128xf32, #tpu.memory_space<vmem>> -> memref<1x128xf32, #tpu.memory_space<vmem>>
    %334 = tpu.memref_slice %arg8[%c0_i32_236] : memref<1x!tpu.dma_semaphore, #tpu.memory_space<semaphore_mem>> -> memref<1x!tpu.dma_semaphore, #tpu.memory_space<semaphore_mem>>
    %335 = tpu.memref_squeeze %334 : memref<1x!tpu.dma_semaphore, #tpu.memory_space<semaphore_mem>> -> memref<!tpu.dma_semaphore, #tpu.memory_space<semaphore_mem>>
    tpu.wait_dma2 semaphore(%335 : memref<!tpu.dma_semaphore, #tpu.memory_space<semaphore_mem>>) src(%332 : memref<1x128xf32, #tpu.memory_space<any>>) dst(%333 : memref<1x128xf32, #tpu.memory_space<vmem>>)
    %c0_i32_240 = arith.constant 0 : i32
    %c0_i32_241 = arith.constant 0 : i32
    %336 = tpu.memref_slice %arg2[%120, %c0_i32_241] : memref<64000x128xf32, #tpu.memory_space<any>> -> memref<1x128xf32, #tpu.memory_space<any>>
    %c24_i32_242 = arith.constant 24 : i32
    %c0_i32_243 = arith.constant 0 : i32
    %337 = tpu.memref_slice %arg7[%c24_i32_242, %c0_i32_243] : memref<48x128xf32, #tpu.memory_space<vmem>> -> memref<1x128xf32, #tpu.memory_space<vmem>>
    %338 = tpu.memref_slice %arg8[%c0_i32_240] : memref<1x!tpu.dma_semaphore, #tpu.memory_space<semaphore_mem>> -> memref<1x!tpu.dma_semaphore, #tpu.memory_space<semaphore_mem>>
    %339 = tpu.memref_squeeze %338 : memref<1x!tpu.dma_semaphore, #tpu.memory_space<semaphore_mem>> -> memref<!tpu.dma_semaphore, #tpu.memory_space<semaphore_mem>>
    tpu.wait_dma2 semaphore(%339 : memref<!tpu.dma_semaphore, #tpu.memory_space<semaphore_mem>>) src(%336 : memref<1x128xf32, #tpu.memory_space<any>>) dst(%337 : memref<1x128xf32, #tpu.memory_space<vmem>>)
    %c0_i32_244 = arith.constant 0 : i32
    %c0_i32_245 = arith.constant 0 : i32
    %340 = tpu.memref_slice %arg2[%125, %c0_i32_245] : memref<64000x128xf32, #tpu.memory_space<any>> -> memref<1x128xf32, #tpu.memory_space<any>>
    %c25_i32_246 = arith.constant 25 : i32
    %c0_i32_247 = arith.constant 0 : i32
    %341 = tpu.memref_slice %arg7[%c25_i32_246, %c0_i32_247] : memref<48x128xf32, #tpu.memory_space<vmem>> -> memref<1x128xf32, #tpu.memory_space<vmem>>
    %342 = tpu.memref_slice %arg8[%c0_i32_244] : memref<1x!tpu.dma_semaphore, #tpu.memory_space<semaphore_mem>> -> memref<1x!tpu.dma_semaphore, #tpu.memory_space<semaphore_mem>>
    %343 = tpu.memref_squeeze %342 : memref<1x!tpu.dma_semaphore, #tpu.memory_space<semaphore_mem>> -> memref<!tpu.dma_semaphore, #tpu.memory_space<semaphore_mem>>
    tpu.wait_dma2 semaphore(%343 : memref<!tpu.dma_semaphore, #tpu.memory_space<semaphore_mem>>) src(%340 : memref<1x128xf32, #tpu.memory_space<any>>) dst(%341 : memref<1x128xf32, #tpu.memory_space<vmem>>)
    %c0_i32_248 = arith.constant 0 : i32
    %c0_i32_249 = arith.constant 0 : i32
    %344 = tpu.memref_slice %arg2[%130, %c0_i32_249] : memref<64000x128xf32, #tpu.memory_space<any>> -> memref<1x128xf32, #tpu.memory_space<any>>
    %c26_i32_250 = arith.constant 26 : i32
    %c0_i32_251 = arith.constant 0 : i32
    %345 = tpu.memref_slice %arg7[%c26_i32_250, %c0_i32_251] : memref<48x128xf32, #tpu.memory_space<vmem>> -> memref<1x128xf32, #tpu.memory_space<vmem>>
    %346 = tpu.memref_slice %arg8[%c0_i32_248] : memref<1x!tpu.dma_semaphore, #tpu.memory_space<semaphore_mem>> -> memref<1x!tpu.dma_semaphore, #tpu.memory_space<semaphore_mem>>
    %347 = tpu.memref_squeeze %346 : memref<1x!tpu.dma_semaphore, #tpu.memory_space<semaphore_mem>> -> memref<!tpu.dma_semaphore, #tpu.memory_space<semaphore_mem>>
    tpu.wait_dma2 semaphore(%347 : memref<!tpu.dma_semaphore, #tpu.memory_space<semaphore_mem>>) src(%344 : memref<1x128xf32, #tpu.memory_space<any>>) dst(%345 : memref<1x128xf32, #tpu.memory_space<vmem>>)
    %c0_i32_252 = arith.constant 0 : i32
    %c0_i32_253 = arith.constant 0 : i32
    %348 = tpu.memref_slice %arg2[%135, %c0_i32_253] : memref<64000x128xf32, #tpu.memory_space<any>> -> memref<1x128xf32, #tpu.memory_space<any>>
    %c27_i32_254 = arith.constant 27 : i32
    %c0_i32_255 = arith.constant 0 : i32
    %349 = tpu.memref_slice %arg7[%c27_i32_254, %c0_i32_255] : memref<48x128xf32, #tpu.memory_space<vmem>> -> memref<1x128xf32, #tpu.memory_space<vmem>>
    %350 = tpu.memref_slice %arg8[%c0_i32_252] : memref<1x!tpu.dma_semaphore, #tpu.memory_space<semaphore_mem>> -> memref<1x!tpu.dma_semaphore, #tpu.memory_space<semaphore_mem>>
    %351 = tpu.memref_squeeze %350 : memref<1x!tpu.dma_semaphore, #tpu.memory_space<semaphore_mem>> -> memref<!tpu.dma_semaphore, #tpu.memory_space<semaphore_mem>>
    tpu.wait_dma2 semaphore(%351 : memref<!tpu.dma_semaphore, #tpu.memory_space<semaphore_mem>>) src(%348 : memref<1x128xf32, #tpu.memory_space<any>>) dst(%349 : memref<1x128xf32, #tpu.memory_space<vmem>>)
    %c0_i32_256 = arith.constant 0 : i32
    %c0_i32_257 = arith.constant 0 : i32
    %352 = tpu.memref_slice %arg2[%140, %c0_i32_257] : memref<64000x128xf32, #tpu.memory_space<any>> -> memref<1x128xf32, #tpu.memory_space<any>>
    %c28_i32_258 = arith.constant 28 : i32
    %c0_i32_259 = arith.constant 0 : i32
    %353 = tpu.memref_slice %arg7[%c28_i32_258, %c0_i32_259] : memref<48x128xf32, #tpu.memory_space<vmem>> -> memref<1x128xf32, #tpu.memory_space<vmem>>
    %354 = tpu.memref_slice %arg8[%c0_i32_256] : memref<1x!tpu.dma_semaphore, #tpu.memory_space<semaphore_mem>> -> memref<1x!tpu.dma_semaphore, #tpu.memory_space<semaphore_mem>>
    %355 = tpu.memref_squeeze %354 : memref<1x!tpu.dma_semaphore, #tpu.memory_space<semaphore_mem>> -> memref<!tpu.dma_semaphore, #tpu.memory_space<semaphore_mem>>
    tpu.wait_dma2 semaphore(%355 : memref<!tpu.dma_semaphore, #tpu.memory_space<semaphore_mem>>) src(%352 : memref<1x128xf32, #tpu.memory_space<any>>) dst(%353 : memref<1x128xf32, #tpu.memory_space<vmem>>)
    %c0_i32_260 = arith.constant 0 : i32
    %c0_i32_261 = arith.constant 0 : i32
    %356 = tpu.memref_slice %arg2[%145, %c0_i32_261] : memref<64000x128xf32, #tpu.memory_space<any>> -> memref<1x128xf32, #tpu.memory_space<any>>
    %c29_i32_262 = arith.constant 29 : i32
    %c0_i32_263 = arith.constant 0 : i32
    %357 = tpu.memref_slice %arg7[%c29_i32_262, %c0_i32_263] : memref<48x128xf32, #tpu.memory_space<vmem>> -> memref<1x128xf32, #tpu.memory_space<vmem>>
    %358 = tpu.memref_slice %arg8[%c0_i32_260] : memref<1x!tpu.dma_semaphore, #tpu.memory_space<semaphore_mem>> -> memref<1x!tpu.dma_semaphore, #tpu.memory_space<semaphore_mem>>
    %359 = tpu.memref_squeeze %358 : memref<1x!tpu.dma_semaphore, #tpu.memory_space<semaphore_mem>> -> memref<!tpu.dma_semaphore, #tpu.memory_space<semaphore_mem>>
    tpu.wait_dma2 semaphore(%359 : memref<!tpu.dma_semaphore, #tpu.memory_space<semaphore_mem>>) src(%356 : memref<1x128xf32, #tpu.memory_space<any>>) dst(%357 : memref<1x128xf32, #tpu.memory_space<vmem>>)
    %c0_i32_264 = arith.constant 0 : i32
    %c0_i32_265 = arith.constant 0 : i32
    %360 = tpu.memref_slice %arg2[%150, %c0_i32_265] : memref<64000x128xf32, #tpu.memory_space<any>> -> memref<1x128xf32, #tpu.memory_space<any>>
    %c30_i32_266 = arith.constant 30 : i32
    %c0_i32_267 = arith.constant 0 : i32
    %361 = tpu.memref_slice %arg7[%c30_i32_266, %c0_i32_267] : memref<48x128xf32, #tpu.memory_space<vmem>> -> memref<1x128xf32, #tpu.memory_space<vmem>>
    %362 = tpu.memref_slice %arg8[%c0_i32_264] : memref<1x!tpu.dma_semaphore, #tpu.memory_space<semaphore_mem>> -> memref<1x!tpu.dma_semaphore, #tpu.memory_space<semaphore_mem>>
    %363 = tpu.memref_squeeze %362 : memref<1x!tpu.dma_semaphore, #tpu.memory_space<semaphore_mem>> -> memref<!tpu.dma_semaphore, #tpu.memory_space<semaphore_mem>>
    tpu.wait_dma2 semaphore(%363 : memref<!tpu.dma_semaphore, #tpu.memory_space<semaphore_mem>>) src(%360 : memref<1x128xf32, #tpu.memory_space<any>>) dst(%361 : memref<1x128xf32, #tpu.memory_space<vmem>>)
    %c0_i32_268 = arith.constant 0 : i32
    %c0_i32_269 = arith.constant 0 : i32
    %364 = tpu.memref_slice %arg2[%155, %c0_i32_269] : memref<64000x128xf32, #tpu.memory_space<any>> -> memref<1x128xf32, #tpu.memory_space<any>>
    %c31_i32_270 = arith.constant 31 : i32
    %c0_i32_271 = arith.constant 0 : i32
    %365 = tpu.memref_slice %arg7[%c31_i32_270, %c0_i32_271] : memref<48x128xf32, #tpu.memory_space<vmem>> -> memref<1x128xf32, #tpu.memory_space<vmem>>
    %366 = tpu.memref_slice %arg8[%c0_i32_268] : memref<1x!tpu.dma_semaphore, #tpu.memory_space<semaphore_mem>> -> memref<1x!tpu.dma_semaphore, #tpu.memory_space<semaphore_mem>>
    %367 = tpu.memref_squeeze %366 : memref<1x!tpu.dma_semaphore, #tpu.memory_space<semaphore_mem>> -> memref<!tpu.dma_semaphore, #tpu.memory_space<semaphore_mem>>
    tpu.wait_dma2 semaphore(%367 : memref<!tpu.dma_semaphore, #tpu.memory_space<semaphore_mem>>) src(%364 : memref<1x128xf32, #tpu.memory_space<any>>) dst(%365 : memref<1x128xf32, #tpu.memory_space<vmem>>)
    %c0_i32_272 = arith.constant 0 : i32
    %c0_i32_273 = arith.constant 0 : i32
    %368 = tpu.memref_slice %arg2[%160, %c0_i32_273] : memref<64000x128xf32, #tpu.memory_space<any>> -> memref<1x128xf32, #tpu.memory_space<any>>
    %c32_i32_274 = arith.constant 32 : i32
    %c0_i32_275 = arith.constant 0 : i32
    %369 = tpu.memref_slice %arg7[%c32_i32_274, %c0_i32_275] : memref<48x128xf32, #tpu.memory_space<vmem>> -> memref<1x128xf32, #tpu.memory_space<vmem>>
    %370 = tpu.memref_slice %arg8[%c0_i32_272] : memref<1x!tpu.dma_semaphore, #tpu.memory_space<semaphore_mem>> -> memref<1x!tpu.dma_semaphore, #tpu.memory_space<semaphore_mem>>
    %371 = tpu.memref_squeeze %370 : memref<1x!tpu.dma_semaphore, #tpu.memory_space<semaphore_mem>> -> memref<!tpu.dma_semaphore, #tpu.memory_space<semaphore_mem>>
    tpu.wait_dma2 semaphore(%371 : memref<!tpu.dma_semaphore, #tpu.memory_space<semaphore_mem>>) src(%368 : memref<1x128xf32, #tpu.memory_space<any>>) dst(%369 : memref<1x128xf32, #tpu.memory_space<vmem>>)
    %c0_i32_276 = arith.constant 0 : i32
    %c0_i32_277 = arith.constant 0 : i32
    %372 = tpu.memref_slice %arg2[%165, %c0_i32_277] : memref<64000x128xf32, #tpu.memory_space<any>> -> memref<1x128xf32, #tpu.memory_space<any>>
    %c33_i32_278 = arith.constant 33 : i32
    %c0_i32_279 = arith.constant 0 : i32
    %373 = tpu.memref_slice %arg7[%c33_i32_278, %c0_i32_279] : memref<48x128xf32, #tpu.memory_space<vmem>> -> memref<1x128xf32, #tpu.memory_space<vmem>>
    %374 = tpu.memref_slice %arg8[%c0_i32_276] : memref<1x!tpu.dma_semaphore, #tpu.memory_space<semaphore_mem>> -> memref<1x!tpu.dma_semaphore, #tpu.memory_space<semaphore_mem>>
    %375 = tpu.memref_squeeze %374 : memref<1x!tpu.dma_semaphore, #tpu.memory_space<semaphore_mem>> -> memref<!tpu.dma_semaphore, #tpu.memory_space<semaphore_mem>>
    tpu.wait_dma2 semaphore(%375 : memref<!tpu.dma_semaphore, #tpu.memory_space<semaphore_mem>>) src(%372 : memref<1x128xf32, #tpu.memory_space<any>>) dst(%373 : memref<1x128xf32, #tpu.memory_space<vmem>>)
    %c0_i32_280 = arith.constant 0 : i32
    %c0_i32_281 = arith.constant 0 : i32
    %376 = tpu.memref_slice %arg2[%170, %c0_i32_281] : memref<64000x128xf32, #tpu.memory_space<any>> -> memref<1x128xf32, #tpu.memory_space<any>>
    %c34_i32_282 = arith.constant 34 : i32
    %c0_i32_283 = arith.constant 0 : i32
    %377 = tpu.memref_slice %arg7[%c34_i32_282, %c0_i32_283] : memref<48x128xf32, #tpu.memory_space<vmem>> -> memref<1x128xf32, #tpu.memory_space<vmem>>
    %378 = tpu.memref_slice %arg8[%c0_i32_280] : memref<1x!tpu.dma_semaphore, #tpu.memory_space<semaphore_mem>> -> memref<1x!tpu.dma_semaphore, #tpu.memory_space<semaphore_mem>>
    %379 = tpu.memref_squeeze %378 : memref<1x!tpu.dma_semaphore, #tpu.memory_space<semaphore_mem>> -> memref<!tpu.dma_semaphore, #tpu.memory_space<semaphore_mem>>
    tpu.wait_dma2 semaphore(%379 : memref<!tpu.dma_semaphore, #tpu.memory_space<semaphore_mem>>) src(%376 : memref<1x128xf32, #tpu.memory_space<any>>) dst(%377 : memref<1x128xf32, #tpu.memory_space<vmem>>)
    %c0_i32_284 = arith.constant 0 : i32
    %c0_i32_285 = arith.constant 0 : i32
    %380 = tpu.memref_slice %arg2[%175, %c0_i32_285] : memref<64000x128xf32, #tpu.memory_space<any>> -> memref<1x128xf32, #tpu.memory_space<any>>
    %c35_i32_286 = arith.constant 35 : i32
    %c0_i32_287 = arith.constant 0 : i32
    %381 = tpu.memref_slice %arg7[%c35_i32_286, %c0_i32_287] : memref<48x128xf32, #tpu.memory_space<vmem>> -> memref<1x128xf32, #tpu.memory_space<vmem>>
    %382 = tpu.memref_slice %arg8[%c0_i32_284] : memref<1x!tpu.dma_semaphore, #tpu.memory_space<semaphore_mem>> -> memref<1x!tpu.dma_semaphore, #tpu.memory_space<semaphore_mem>>
    %383 = tpu.memref_squeeze %382 : memref<1x!tpu.dma_semaphore, #tpu.memory_space<semaphore_mem>> -> memref<!tpu.dma_semaphore, #tpu.memory_space<semaphore_mem>>
    tpu.wait_dma2 semaphore(%383 : memref<!tpu.dma_semaphore, #tpu.memory_space<semaphore_mem>>) src(%380 : memref<1x128xf32, #tpu.memory_space<any>>) dst(%381 : memref<1x128xf32, #tpu.memory_space<vmem>>)
    %c0_i32_288 = arith.constant 0 : i32
    %c0_i32_289 = arith.constant 0 : i32
    %384 = tpu.memref_slice %arg2[%180, %c0_i32_289] : memref<64000x128xf32, #tpu.memory_space<any>> -> memref<1x128xf32, #tpu.memory_space<any>>
    %c36_i32_290 = arith.constant 36 : i32
    %c0_i32_291 = arith.constant 0 : i32
    %385 = tpu.memref_slice %arg7[%c36_i32_290, %c0_i32_291] : memref<48x128xf32, #tpu.memory_space<vmem>> -> memref<1x128xf32, #tpu.memory_space<vmem>>
    %386 = tpu.memref_slice %arg8[%c0_i32_288] : memref<1x!tpu.dma_semaphore, #tpu.memory_space<semaphore_mem>> -> memref<1x!tpu.dma_semaphore, #tpu.memory_space<semaphore_mem>>
    %387 = tpu.memref_squeeze %386 : memref<1x!tpu.dma_semaphore, #tpu.memory_space<semaphore_mem>> -> memref<!tpu.dma_semaphore, #tpu.memory_space<semaphore_mem>>
    tpu.wait_dma2 semaphore(%387 : memref<!tpu.dma_semaphore, #tpu.memory_space<semaphore_mem>>) src(%384 : memref<1x128xf32, #tpu.memory_space<any>>) dst(%385 : memref<1x128xf32, #tpu.memory_space<vmem>>)
    %c0_i32_292 = arith.constant 0 : i32
    %c0_i32_293 = arith.constant 0 : i32
    %388 = tpu.memref_slice %arg2[%185, %c0_i32_293] : memref<64000x128xf32, #tpu.memory_space<any>> -> memref<1x128xf32, #tpu.memory_space<any>>
    %c37_i32_294 = arith.constant 37 : i32
    %c0_i32_295 = arith.constant 0 : i32
    %389 = tpu.memref_slice %arg7[%c37_i32_294, %c0_i32_295] : memref<48x128xf32, #tpu.memory_space<vmem>> -> memref<1x128xf32, #tpu.memory_space<vmem>>
    %390 = tpu.memref_slice %arg8[%c0_i32_292] : memref<1x!tpu.dma_semaphore, #tpu.memory_space<semaphore_mem>> -> memref<1x!tpu.dma_semaphore, #tpu.memory_space<semaphore_mem>>
    %391 = tpu.memref_squeeze %390 : memref<1x!tpu.dma_semaphore, #tpu.memory_space<semaphore_mem>> -> memref<!tpu.dma_semaphore, #tpu.memory_space<semaphore_mem>>
    tpu.wait_dma2 semaphore(%391 : memref<!tpu.dma_semaphore, #tpu.memory_space<semaphore_mem>>) src(%388 : memref<1x128xf32, #tpu.memory_space<any>>) dst(%389 : memref<1x128xf32, #tpu.memory_space<vmem>>)
    %c0_i32_296 = arith.constant 0 : i32
    %c0_i32_297 = arith.constant 0 : i32
    %392 = tpu.memref_slice %arg2[%190, %c0_i32_297] : memref<64000x128xf32, #tpu.memory_space<any>> -> memref<1x128xf32, #tpu.memory_space<any>>
    %c38_i32_298 = arith.constant 38 : i32
    %c0_i32_299 = arith.constant 0 : i32
    %393 = tpu.memref_slice %arg7[%c38_i32_298, %c0_i32_299] : memref<48x128xf32, #tpu.memory_space<vmem>> -> memref<1x128xf32, #tpu.memory_space<vmem>>
    %394 = tpu.memref_slice %arg8[%c0_i32_296] : memref<1x!tpu.dma_semaphore, #tpu.memory_space<semaphore_mem>> -> memref<1x!tpu.dma_semaphore, #tpu.memory_space<semaphore_mem>>
    %395 = tpu.memref_squeeze %394 : memref<1x!tpu.dma_semaphore, #tpu.memory_space<semaphore_mem>> -> memref<!tpu.dma_semaphore, #tpu.memory_space<semaphore_mem>>
    tpu.wait_dma2 semaphore(%395 : memref<!tpu.dma_semaphore, #tpu.memory_space<semaphore_mem>>) src(%392 : memref<1x128xf32, #tpu.memory_space<any>>) dst(%393 : memref<1x128xf32, #tpu.memory_space<vmem>>)
    %c0_i32_300 = arith.constant 0 : i32
    %c0_i32_301 = arith.constant 0 : i32
    %396 = tpu.memref_slice %arg2[%195, %c0_i32_301] : memref<64000x128xf32, #tpu.memory_space<any>> -> memref<1x128xf32, #tpu.memory_space<any>>
    %c39_i32_302 = arith.constant 39 : i32
    %c0_i32_303 = arith.constant 0 : i32
    %397 = tpu.memref_slice %arg7[%c39_i32_302, %c0_i32_303] : memref<48x128xf32, #tpu.memory_space<vmem>> -> memref<1x128xf32, #tpu.memory_space<vmem>>
    %398 = tpu.memref_slice %arg8[%c0_i32_300] : memref<1x!tpu.dma_semaphore, #tpu.memory_space<semaphore_mem>> -> memref<1x!tpu.dma_semaphore, #tpu.memory_space<semaphore_mem>>
    %399 = tpu.memref_squeeze %398 : memref<1x!tpu.dma_semaphore, #tpu.memory_space<semaphore_mem>> -> memref<!tpu.dma_semaphore, #tpu.memory_space<semaphore_mem>>
    tpu.wait_dma2 semaphore(%399 : memref<!tpu.dma_semaphore, #tpu.memory_space<semaphore_mem>>) src(%396 : memref<1x128xf32, #tpu.memory_space<any>>) dst(%397 : memref<1x128xf32, #tpu.memory_space<vmem>>)
    %c0_i32_304 = arith.constant 0 : i32
    %c0_i32_305 = arith.constant 0 : i32
    %400 = tpu.memref_slice %arg2[%200, %c0_i32_305] : memref<64000x128xf32, #tpu.memory_space<any>> -> memref<1x128xf32, #tpu.memory_space<any>>
    %c40_i32_306 = arith.constant 40 : i32
    %c0_i32_307 = arith.constant 0 : i32
    %401 = tpu.memref_slice %arg7[%c40_i32_306, %c0_i32_307] : memref<48x128xf32, #tpu.memory_space<vmem>> -> memref<1x128xf32, #tpu.memory_space<vmem>>
    %402 = tpu.memref_slice %arg8[%c0_i32_304] : memref<1x!tpu.dma_semaphore, #tpu.memory_space<semaphore_mem>> -> memref<1x!tpu.dma_semaphore, #tpu.memory_space<semaphore_mem>>
    %403 = tpu.memref_squeeze %402 : memref<1x!tpu.dma_semaphore, #tpu.memory_space<semaphore_mem>> -> memref<!tpu.dma_semaphore, #tpu.memory_space<semaphore_mem>>
    tpu.wait_dma2 semaphore(%403 : memref<!tpu.dma_semaphore, #tpu.memory_space<semaphore_mem>>) src(%400 : memref<1x128xf32, #tpu.memory_space<any>>) dst(%401 : memref<1x128xf32, #tpu.memory_space<vmem>>)
    %c0_i32_308 = arith.constant 0 : i32
    %c0_i32_309 = arith.constant 0 : i32
    %404 = tpu.memref_slice %arg2[%205, %c0_i32_309] : memref<64000x128xf32, #tpu.memory_space<any>> -> memref<1x128xf32, #tpu.memory_space<any>>
    %c41_i32_310 = arith.constant 41 : i32
    %c0_i32_311 = arith.constant 0 : i32
    %405 = tpu.memref_slice %arg7[%c41_i32_310, %c0_i32_311] : memref<48x128xf32, #tpu.memory_space<vmem>> -> memref<1x128xf32, #tpu.memory_space<vmem>>
    %406 = tpu.memref_slice %arg8[%c0_i32_308] : memref<1x!tpu.dma_semaphore, #tpu.memory_space<semaphore_mem>> -> memref<1x!tpu.dma_semaphore, #tpu.memory_space<semaphore_mem>>
    %407 = tpu.memref_squeeze %406 : memref<1x!tpu.dma_semaphore, #tpu.memory_space<semaphore_mem>> -> memref<!tpu.dma_semaphore, #tpu.memory_space<semaphore_mem>>
    tpu.wait_dma2 semaphore(%407 : memref<!tpu.dma_semaphore, #tpu.memory_space<semaphore_mem>>) src(%404 : memref<1x128xf32, #tpu.memory_space<any>>) dst(%405 : memref<1x128xf32, #tpu.memory_space<vmem>>)
    %c0_i32_312 = arith.constant 0 : i32
    %c0_i32_313 = arith.constant 0 : i32
    %408 = tpu.memref_slice %arg2[%210, %c0_i32_313] : memref<64000x128xf32, #tpu.memory_space<any>> -> memref<1x128xf32, #tpu.memory_space<any>>
    %c42_i32_314 = arith.constant 42 : i32
    %c0_i32_315 = arith.constant 0 : i32
    %409 = tpu.memref_slice %arg7[%c42_i32_314, %c0_i32_315] : memref<48x128xf32, #tpu.memory_space<vmem>> -> memref<1x128xf32, #tpu.memory_space<vmem>>
    %410 = tpu.memref_slice %arg8[%c0_i32_312] : memref<1x!tpu.dma_semaphore, #tpu.memory_space<semaphore_mem>> -> memref<1x!tpu.dma_semaphore, #tpu.memory_space<semaphore_mem>>
    %411 = tpu.memref_squeeze %410 : memref<1x!tpu.dma_semaphore, #tpu.memory_space<semaphore_mem>> -> memref<!tpu.dma_semaphore, #tpu.memory_space<semaphore_mem>>
    tpu.wait_dma2 semaphore(%411 : memref<!tpu.dma_semaphore, #tpu.memory_space<semaphore_mem>>) src(%408 : memref<1x128xf32, #tpu.memory_space<any>>) dst(%409 : memref<1x128xf32, #tpu.memory_space<vmem>>)
    %c0_i32_316 = arith.constant 0 : i32
    %c0_i32_317 = arith.constant 0 : i32
    %412 = tpu.memref_slice %arg2[%215, %c0_i32_317] : memref<64000x128xf32, #tpu.memory_space<any>> -> memref<1x128xf32, #tpu.memory_space<any>>
    %c43_i32_318 = arith.constant 43 : i32
    %c0_i32_319 = arith.constant 0 : i32
    %413 = tpu.memref_slice %arg7[%c43_i32_318, %c0_i32_319] : memref<48x128xf32, #tpu.memory_space<vmem>> -> memref<1x128xf32, #tpu.memory_space<vmem>>
    %414 = tpu.memref_slice %arg8[%c0_i32_316] : memref<1x!tpu.dma_semaphore, #tpu.memory_space<semaphore_mem>> -> memref<1x!tpu.dma_semaphore, #tpu.memory_space<semaphore_mem>>
    %415 = tpu.memref_squeeze %414 : memref<1x!tpu.dma_semaphore, #tpu.memory_space<semaphore_mem>> -> memref<!tpu.dma_semaphore, #tpu.memory_space<semaphore_mem>>
    tpu.wait_dma2 semaphore(%415 : memref<!tpu.dma_semaphore, #tpu.memory_space<semaphore_mem>>) src(%412 : memref<1x128xf32, #tpu.memory_space<any>>) dst(%413 : memref<1x128xf32, #tpu.memory_space<vmem>>)
    %c0_i32_320 = arith.constant 0 : i32
    %c0_i32_321 = arith.constant 0 : i32
    %416 = tpu.memref_slice %arg2[%220, %c0_i32_321] : memref<64000x128xf32, #tpu.memory_space<any>> -> memref<1x128xf32, #tpu.memory_space<any>>
    %c44_i32_322 = arith.constant 44 : i32
    %c0_i32_323 = arith.constant 0 : i32
    %417 = tpu.memref_slice %arg7[%c44_i32_322, %c0_i32_323] : memref<48x128xf32, #tpu.memory_space<vmem>> -> memref<1x128xf32, #tpu.memory_space<vmem>>
    %418 = tpu.memref_slice %arg8[%c0_i32_320] : memref<1x!tpu.dma_semaphore, #tpu.memory_space<semaphore_mem>> -> memref<1x!tpu.dma_semaphore, #tpu.memory_space<semaphore_mem>>
    %419 = tpu.memref_squeeze %418 : memref<1x!tpu.dma_semaphore, #tpu.memory_space<semaphore_mem>> -> memref<!tpu.dma_semaphore, #tpu.memory_space<semaphore_mem>>
    tpu.wait_dma2 semaphore(%419 : memref<!tpu.dma_semaphore, #tpu.memory_space<semaphore_mem>>) src(%416 : memref<1x128xf32, #tpu.memory_space<any>>) dst(%417 : memref<1x128xf32, #tpu.memory_space<vmem>>)
    %c0_i32_324 = arith.constant 0 : i32
    %c0_i32_325 = arith.constant 0 : i32
    %420 = tpu.memref_slice %arg2[%225, %c0_i32_325] : memref<64000x128xf32, #tpu.memory_space<any>> -> memref<1x128xf32, #tpu.memory_space<any>>
    %c45_i32_326 = arith.constant 45 : i32
    %c0_i32_327 = arith.constant 0 : i32
    %421 = tpu.memref_slice %arg7[%c45_i32_326, %c0_i32_327] : memref<48x128xf32, #tpu.memory_space<vmem>> -> memref<1x128xf32, #tpu.memory_space<vmem>>
    %422 = tpu.memref_slice %arg8[%c0_i32_324] : memref<1x!tpu.dma_semaphore, #tpu.memory_space<semaphore_mem>> -> memref<1x!tpu.dma_semaphore, #tpu.memory_space<semaphore_mem>>
    %423 = tpu.memref_squeeze %422 : memref<1x!tpu.dma_semaphore, #tpu.memory_space<semaphore_mem>> -> memref<!tpu.dma_semaphore, #tpu.memory_space<semaphore_mem>>
    tpu.wait_dma2 semaphore(%423 : memref<!tpu.dma_semaphore, #tpu.memory_space<semaphore_mem>>) src(%420 : memref<1x128xf32, #tpu.memory_space<any>>) dst(%421 : memref<1x128xf32, #tpu.memory_space<vmem>>)
    %c0_i32_328 = arith.constant 0 : i32
    %c0_i32_329 = arith.constant 0 : i32
    %424 = tpu.memref_slice %arg2[%230, %c0_i32_329] : memref<64000x128xf32, #tpu.memory_space<any>> -> memref<1x128xf32, #tpu.memory_space<any>>
    %c46_i32_330 = arith.constant 46 : i32
    %c0_i32_331 = arith.constant 0 : i32
    %425 = tpu.memref_slice %arg7[%c46_i32_330, %c0_i32_331] : memref<48x128xf32, #tpu.memory_space<vmem>> -> memref<1x128xf32, #tpu.memory_space<vmem>>
    %426 = tpu.memref_slice %arg8[%c0_i32_328] : memref<1x!tpu.dma_semaphore, #tpu.memory_space<semaphore_mem>> -> memref<1x!tpu.dma_semaphore, #tpu.memory_space<semaphore_mem>>
    %427 = tpu.memref_squeeze %426 : memref<1x!tpu.dma_semaphore, #tpu.memory_space<semaphore_mem>> -> memref<!tpu.dma_semaphore, #tpu.memory_space<semaphore_mem>>
    tpu.wait_dma2 semaphore(%427 : memref<!tpu.dma_semaphore, #tpu.memory_space<semaphore_mem>>) src(%424 : memref<1x128xf32, #tpu.memory_space<any>>) dst(%425 : memref<1x128xf32, #tpu.memory_space<vmem>>)
    %c0_i32_332 = arith.constant 0 : i32
    %c0_i32_333 = arith.constant 0 : i32
    %428 = tpu.memref_slice %arg2[%235, %c0_i32_333] : memref<64000x128xf32, #tpu.memory_space<any>> -> memref<1x128xf32, #tpu.memory_space<any>>
    %c47_i32_334 = arith.constant 47 : i32
    %c0_i32_335 = arith.constant 0 : i32
    %429 = tpu.memref_slice %arg7[%c47_i32_334, %c0_i32_335] : memref<48x128xf32, #tpu.memory_space<vmem>> -> memref<1x128xf32, #tpu.memory_space<vmem>>
    %430 = tpu.memref_slice %arg8[%c0_i32_332] : memref<1x!tpu.dma_semaphore, #tpu.memory_space<semaphore_mem>> -> memref<1x!tpu.dma_semaphore, #tpu.memory_space<semaphore_mem>>
    %431 = tpu.memref_squeeze %430 : memref<1x!tpu.dma_semaphore, #tpu.memory_space<semaphore_mem>> -> memref<!tpu.dma_semaphore, #tpu.memory_space<semaphore_mem>>
    tpu.wait_dma2 semaphore(%431 : memref<!tpu.dma_semaphore, #tpu.memory_space<semaphore_mem>>) src(%428 : memref<1x128xf32, #tpu.memory_space<any>>) dst(%429 : memref<1x128xf32, #tpu.memory_space<vmem>>)
    %c0_336 = arith.constant 0 : index
    %c0_337 = arith.constant 0 : index
    %432 = vector.load %arg7[%c0_336, %c0_337] : memref<48x128xf32, #tpu.memory_space<vmem>>, vector<48x128xf32>
    %433 = arith.truncf %432 : vector<48x128xf32> to vector<48x128xbf16>
    %c0_338 = arith.constant 0 : index
    %c0_339 = arith.constant 0 : index
    %434 = vector.load %arg3[%c0_338, %c0_339] : memref<48x48xbf16, #tpu.memory_space<vmem>>, vector<48x48xbf16>
    %cst = arith.constant dense<0.000000e+00> : vector<48x128xf32>
    %435 = tpu.matmul %434, %433, %cst {dimension_numbers = #tpu.dot_dimension_numbers<[1], [0], [0], [1], [0, 0, 1, 1], [], []>} : vector<48x48xbf16>, vector<48x128xbf16>, vector<48x128xf32> -> vector<48x128xf32>
    %436 = arith.truncf %435 : vector<48x128xf32> to vector<48x128xbf16>
    %c0_340 = arith.constant 0 : index
    %c0_341 = arith.constant 0 : index
    %437 = vector.load %arg4[%c0_340, %c0_341] : memref<128x128xbf16, #tpu.memory_space<vmem>>, vector<128x128xbf16>
    %cst_342 = arith.constant dense<0.000000e+00> : vector<48x128xf32>
    %438 = tpu.matmul %436, %437, %cst_342 {dimension_numbers = #tpu.dot_dimension_numbers<[1], [0], [0], [1], [0, 0, 1, 1], [], []>} : vector<48x128xbf16>, vector<128x128xbf16>, vector<48x128xf32> -> vector<48x128xf32>
    %c0_343 = arith.constant 0 : index
    %c0_344 = arith.constant 0 : index
    %439 = vector.load %arg5[%c0_343, %c0_344] : memref<48x128xf32, #tpu.memory_space<vmem>>, vector<48x128xf32>
    %440 = arith.addf %438, %439 : vector<48x128xf32>
    %c0_345 = arith.constant 0 : index
    %c0_346 = arith.constant 0 : index
    %441 = vector.load %arg6[%c0_345, %c0_346] : memref<48x128xf32, #tpu.memory_space<vmem>>, vector<48x128xf32>
    tpu.vector_store %arg6[%c0_345, %c0_346], %440 {strides = array<i32>} : memref<48x128xf32, #tpu.memory_space<vmem>>, vector<48x128xf32>,
    return
  }
  func.func @transform_1(%arg0: i32, %arg1: memref<48xi32, #tpu.memory_space<smem>>) -> (i32, i32) {
    %c0_i32 = arith.constant 0 : i32
    %c0_i32_0 = arith.constant 0 : i32
    %c0_i32_1 = arith.constant 0 : i32
    return %c0_i32, %c0_i32_0 : i32, i32
  }
  func.func @transform_2(%arg0: i32, %arg1: memref<48xi32, #tpu.memory_space<smem>>) -> (i32, i32) {
    %c0_i32 = arith.constant 0 : i32
    %c0_i32_0 = arith.constant 0 : i32
    %c0_i32_1 = arith.constant 0 : i32
    return %c0_i32, %c0_i32_0 : i32, i32
  }
  func.func @transform_3(%arg0: i32, %arg1: memref<48xi32, #tpu.memory_space<smem>>) -> (i32, i32) {
    %c0_i32 = arith.constant 0 : i32
    %c0_i32_0 = arith.constant 0 : i32
    %c0_i32_1 = arith.constant 0 : i32
    return %c0_i32, %c0_i32_0 : i32, i32
  }
  func.func @transform_4(%arg0: i32, %arg1: memref<48xi32, #tpu.memory_space<smem>>) -> (i32, i32) {
    %c0_i32 = arith.constant 0 : i32
    %c0_i32_0 = arith.constant 0 : i32
    %c0_i32_1 = arith.constant 0 : i32
    return %c0_i32, %c0_i32_0 : i32, i32
  }
}

</mosaic_0001>

<bundles_post_ra>
// kernel: forward.1
= control target key start
LH: loop header
LB: loop body
LE: loop exit
PB: predicated region body
PF: predicated region fallthrough
CT: control target
= control target key end

     0   :  { %s3599_s0 = inlined_call_operand.hbm [shape: s32[48], index: 0, kind: input, shape index: {}]   ;;  %s3600_s1 = inlined_call_operand.hbm [shape: f32[64000,128], index: 1, kind: input, shape index: {}]   ;;  %s3601_s2 = inlined_call_operand.vmem [shape: bf16[48,48], index: 2, kind: input, shape index: {}]   ;;  %s3602_s3 = inlined_call_operand.hbm [shape: bf16[128,128], index: 3, kind: input, shape index: {}]   ;;  %s3603_s4 = inlined_call_operand.vmem [shape: f32[48,128], index: 4, kind: input, shape index: {}]   ;;  %s3604_s5 = inlined_call_operand.hbm [shape: f32[48,128], index: 5, kind: output, shape index: {}]  }
   0x1   :  { %s1445_s20 = scalar_lea.hbm %s3599_s0, 16 }
   0x2   :  { %p1446_p0 = scmp.ne.s32.totalorder %s3599_s0, %s1445_s20  ;;  %p1449_p1 = scmp.lt.u32.totalorder %s1445_s20, %s3599_s0 }
   0x4   :  { %p1451_p2 = pnand %p1449_p1, %p1446_p0 }
   0x6   :  { %1454 = shalt.err (!%p1451_p2)  }
   0x7   :  { %s2659_s25 = smov [#allocation5]  }
   0x8   :  { %11 = dma.hbm_to_smem %s3599_s0, 16, %s2659_s25, [#allocation4] }
   0x9   :  { %2651 = dma.done.wait [#allocation4], 16 }
   0xa   :  { %2652 = vsyncadd [#allocation4], 4294967280 }
   0xb   :  { %13 = sfence }
   0xc   :  { %14 = vsyncpa [#allocation7], 0 }
   0xd   :  { %15 = vsyncpa [#allocation8], 0  ;;  %s2660_s28 = smov [#allocation6]   ;;  %s1455_s7 = scalar_lea.hbm %s3602_s3, 1024 }
   0xe   :  { %s23_s29 = sshll.u32 %s2660_s28, 4  ;;  %p1456_p3 = scmp.ne.s32.totalorder %s3602_s3, %s1455_s7  ;;  %s24_s29 = int_to_ptr.vmem [resolvable:$true] %s23_s29 }
   0xf   :  { %p1459_p4 = scmp.lt.u32.totalorder %s1455_s7, %s3602_s3 }
  0x11   :  { %p1461_p5 = pnand %p1459_p4, %p1456_p3 }
  0x13   :  { %1464 = shalt.err (!%p1461_p5)
}
  0x14   :  { %s1465_s0 = scalar_lea.vmem %s24_s29, 1024  ;;  %p1470_p7 = scmp.lt.s32.totalorder %s24_s29, %s24_s29 }
  0x15   :  { %p1466_p6 = scmp.ne.s32.totalorder %s24_s29, %s1465_s0  ;;  %p1471_p8 = scmp.lt.s32.totalorder %s1465_s0, %s1465_s0 }
  0x17   :  { %p1472_p9 = por %p1471_p8, %p1470_p7 }
  0x19   :  { %p1473_p10 = pnand %p1472_p9, %p1466_p6 }
  0x1b   :  { %1476 = shalt.err (!%p1473_p10)
}
  0x1c   :  { %s2661_s12 = smov 64   ;;  %s2662_s13 = smov 4  }
  0x1d   :  { %29 = dma.hbm_to_vmem [thread:$0]  %s3602_s3, 1024, %s24_s29, [#allocation7], %s2661_s12, %s2661_s12, %s2662_s13  }
  0x1e   :  { %2653 = dma.done.wait [#allocation7], 1024  }
  0x1f   :  { %2654 = vsyncadd [#allocation7], 4294966272  ;;  %s36_s16 = sld [smem:[#allocation5]]  ;;  %s2663_s17 = smov [#allocation2]  }
  0x20   :  { %s46_s18 = sshll.u32 %s2663_s17, 4  ;;  %s2772_s19 = sld [smem:[#allocation5 + $0x1]]  ;;  %s2770_s18 = int_to_ptr.vmem [resolvable:$true] %s46_s18 }
  0x21   :  { %s2664_s20 = smov [#allocation2 + $0x1]   ;;  %s2774_s22 = sld [smem:[#allocation5 + $0x2]] }
  0x22   :  { %s61_s21 = sshll.u32 %s2664_s20, 4  ;;  %s2665_s23 = smov [#allocation2 + $0x2]   ;;  %s2776_s21 = int_to_ptr.vmem [resolvable:$true] %s61_s21 }
  0x23   :  { %s76_s24 = sshll.u32 %s2665_s23, 4  ;;  %s2778_s25 = sld [smem:[#allocation5 + $0x3]]  ;;  %s2780_s24 = int_to_ptr.vmem [resolvable:$true] %s76_s24 }
  0x24   :  { %s2666_s26 = smov [#allocation2 + $0x3]   ;;  %s2791_s10 = scalar_lea.hbm %s3600_s1, 1024000 }
  0x25   :  { %s1204_s3 = sshll.u32 %s36_s16, 4  ;;  %s2782_s27 = sshll.u32 %s2666_s26, 4  ;;  %s92_s27 = int_to_ptr.vmem [resolvable:$true] %s2782_s27 }
  0x26   :  { %s38_s30 = scalar_lea.hbm %s3600_s1, %s1204_s3  ;;  %s1206_s6 = sshll.u32 %s2772_s19, 4 }
  0x27   :  { %s1477_s7 = scalar_lea.hbm %s38_s30, 16  ;;  %p1480_p12 = scmp.lt.u32.totalorder %s38_s30, %s3600_s1 }
  0x28   :  { %p1478_p11 = scmp.ne.s32.totalorder %s38_s30, %s1477_s7  ;;  %p1481_p13 = scmp.lt.u32.totalorder %s2791_s10, %s1477_s7 }
  0x29   :  { %p1483_p1 = scmp.lt.u32.totalorder %s1477_s7, %s38_s30 }
  0x2a   :  { %p1482_p0 = por %p1481_p13, %p1480_p12 }
  0x2c   :  { %p1484_p2 = por %p1483_p1, %p1482_p0 }
  0x2e   :  { %p1485_p3 = pnand %p1484_p2, %p1478_p11 }
  0x30   :  { %1488 = shalt.err (!%p1485_p3)  }
  0x31   :  { %s1489_s12 = scalar_lea.vmem %s2770_s18, 16  ;;  %s2800_s13 = scalar_lea.vmem %s2770_s18, 768 }
  0x32   :  { %p1490_p4 = scmp.ne.s32.totalorder %s2770_s18, %s1489_s12  ;;  %p1494_p5 = scmp.lt.s32.totalorder %s2770_s18, %s2770_s18 }
  0x33   :  { %p1495_p6 = scmp.lt.s32.totalorder %s2800_s13, %s1489_s12 }
  0x35   :  { %p1496_p7 = por %p1495_p6, %p1494_p5 }
  0x37   :  { %p1497_p8 = pnand %p1496_p7, %p1490_p4 }
  0x39   :  { %1500 = shalt.err (!%p1497_p8)  }
  0x3a   :  { %49 = dma.hbm_to_vmem [thread:$0]  %s38_s30, 16, %s2770_s18, [#allocation3] }
  0x3b   :  { %s52_s16 = scalar_lea.hbm %s3600_s1, %s1206_s6  ;;  %s1208_s17 = sshll.u32 %s2774_s22, 4 }
  0x3c   :  { %s1501_s19 = scalar_lea.hbm %s52_s16, 16  ;;  %p1504_p10 = scmp.lt.u32.totalorder %s52_s16, %s3600_s1 }
  0x3d   :  { %p1502_p9 = scmp.ne.s32.totalorder %s52_s16, %s1501_s19  ;;  %p1505_p11 = scmp.lt.u32.totalorder %s2791_s10, %s1501_s19 }
  0x3e   :  { %p1507_p13 = scmp.lt.u32.totalorder %s1501_s19, %s52_s16 }
  0x3f   :  { %p1506_p12 = por %p1505_p11, %p1504_p10 }
  0x41   :  { %p1508_p0 = por %p1507_p13, %p1506_p12 }
  0x43   :  { %p1509_p1 = pnand %p1508_p0, %p1502_p9 }
  0x45   :  { %1512 = shalt.err (!%p1509_p1)  }
  0x46   :  { %s1513_s3 = scalar_lea.vmem %s2776_s21, 16  ;;  %p1518_p3 = scmp.lt.s32.totalorder %s2776_s21, %s2770_s18 }
  0x47   :  { %p1514_p2 = scmp.ne.s32.totalorder %s2776_s21, %s1513_s3  ;;  %p1519_p4 = scmp.lt.s32.totalorder %s2800_s13, %s1513_s3 }
  0x49   :  { %p1520_p5 = por %p1519_p4, %p1518_p3 }
  0x4b   :  { %p1521_p6 = pnand %p1520_p5, %p1514_p2 }
  0x4d   :  { %1524 = shalt.err (!%p1521_p6)  }
  0x4e   :  { %64 = dma.hbm_to_vmem [thread:$0]  %s52_s16, 16, %s2776_s21, [#allocation3] }
  0x4f   :  { %s67_s28 = scalar_lea.hbm %s3600_s1, %s1208_s17  ;;  %s1210_s29 = sshll.u32 %s2778_s25, 4 }
  0x50   :  { %s1525_s30 = scalar_lea.hbm %s67_s28, 16  ;;  %p1528_p8 = scmp.lt.u32.totalorder %s67_s28, %s3600_s1 }
  0x51   :  { %p1526_p7 = scmp.ne.s32.totalorder %s67_s28, %s1525_s30  ;;  %p1529_p9 = scmp.lt.u32.totalorder %s2791_s10, %s1525_s30 }
  0x52   :  { %p1531_p11 = scmp.lt.u32.totalorder %s1525_s30, %s67_s28 }
  0x53   :  { %p1530_p10 = por %p1529_p9, %p1528_p8 }
  0x55   :  { %p1532_p12 = por %p1531_p11, %p1530_p10 }
  0x57   :  { %p1533_p13 = pnand %p1532_p12, %p1526_p7 }
  0x59   :  { %1536 = shalt.err (!%p1533_p13)  }
  0x5a   :  { %s1537_s21 = scalar_lea.vmem %s2780_s24, 16  ;;  %p1542_p1 = scmp.lt.s32.totalorder %s2780_s24, %s2770_s18 }
  0x5b   :  { %p1538_p0 = scmp.ne.s32.totalorder %s2780_s24, %s1537_s21  ;;  %p1543_p2 = scmp.lt.s32.totalorder %s2800_s13, %s1537_s21 }
  0x5d   :  { %p1544_p3 = por %p1543_p2, %p1542_p1 }
  0x5f   :  { %p1545_p4 = pnand %p1544_p3, %p1538_p0 }
  0x61   :  { %1548 = shalt.err (!%p1545_p4)  }
  0x62   :  { %79 = dma.hbm_to_vmem [thread:$0]  %s67_s28, 16, %s2780_s24, [#allocation3] }
  0x63   :  { %s82_s9 = scalar_lea.hbm %s3600_s1, %s1210_s29 }
  0x64   :  { %s1549_s11 = scalar_lea.hbm %s82_s9, 16  ;;  %p1552_p6 = scmp.lt.u32.totalorder %s82_s9, %s3600_s1 }
  0x65   :  { %p1550_p5 = scmp.ne.s32.totalorder %s82_s9, %s1549_s11  ;;  %p1553_p7 = scmp.lt.u32.totalorder %s2791_s10, %s1549_s11 }
  0x66   :  { %p1555_p9 = scmp.lt.u32.totalorder %s1549_s11, %s82_s9 }
  0x67   :  { %p1554_p8 = por %p1553_p7, %p1552_p6 }
  0x69   :  { %p1556_p10 = por %p1555_p9, %p1554_p8 }
  0x6b   :  { %p1557_p11 = pnand %p1556_p10, %p1550_p5 }
  0x6d   :  { %1560 = shalt.err (!%p1557_p11)  }
  0x6e   :  { %s1561_s14 = scalar_lea.vmem %s92_s27, 16  ;;  %p1566_p13 = scmp.lt.s32.totalorder %s92_s27, %s2770_s18 }
  0x6f   :  { %p1562_p12 = scmp.ne.s32.totalorder %s92_s27, %s1561_s14  ;;  %p1567_p0 = scmp.lt.s32.totalorder %s2800_s13, %s1561_s14 }
  0x71   :  { %p1568_p1 = por %p1567_p0, %p1566_p13 }
  0x73   :  { %p1569_p2 = pnand %p1568_p1, %p1562_p12 }
  0x75   :  { %1572 = shalt.err (!%p1569_p2)  }
  0x76   :  { %94 = dma.hbm_to_vmem [thread:$0]  %s82_s9, 16, %s92_s27, [#allocation3] }
  0x77   :  { %s1211_s24 = sld [smem:[#allocation5 + $0x4]]  ;;  %s2667_s15 = smov [#allocation2 + $0x4]  }
  0x78   :  { %s106_s16 = sshll.u32 %s2667_s15, 4  ;;  %s2844_s17 = sld [smem:[#allocation5 + $0x5]]  ;;  %s107_s16 = int_to_ptr.vmem [resolvable:$true] %s106_s16 }
  0x79   :  { %s2668_s19 = smov [#allocation2 + $0x5]   ;;  %s2846_s23 = sld [smem:[#allocation5 + $0x6]] }
  0x7a   :  { %s121_s20 = sshll.u32 %s2668_s19, 4  ;;  %s2669_s3 = smov [#allocation2 + $0x6]   ;;  %s2848_s20 = int_to_ptr.vmem [resolvable:$true] %s121_s20 }
  0x7b   :  { %s136_s22 = sshll.u32 %s2669_s3, 4  ;;  %s2850_s26 = sld [smem:[#allocation5 + $0x7]]  ;;  %s2852_s22 = int_to_ptr.vmem [resolvable:$true] %s136_s22 }
  0x7d   :  { %s1212_s28 = sshll.u32 %s1211_s24, 4 }
  0x7e   :  { %s97_s30 = scalar_lea.hbm %s3600_s1, %s1212_s28  ;;  %s1214_s6 = sshll.u32 %s2844_s17, 4 }
  0x7f   :  { %s1573_s7 = scalar_lea.hbm %s97_s30, 16  ;;  %p1576_p4 = scmp.lt.u32.totalorder %s97_s30, %s3600_s1 }
  0x80   :  { %p1574_p3 = scmp.ne.s32.totalorder %s97_s30, %s1573_s7  ;;  %p1577_p5 = scmp.lt.u32.totalorder %s2791_s10, %s1573_s7 }
  0x81   :  { %p1579_p7 = scmp.lt.u32.totalorder %s1573_s7, %s97_s30 }
  0x82   :  { %p1578_p6 = por %p1577_p5, %p1576_p4 }
  0x84   :  { %p1580_p8 = por %p1579_p7, %p1578_p6 }
  0x86   :  { %p1581_p9 = pnand %p1580_p8, %p1574_p3 }
  0x88   :  { %1584 = shalt.err (!%p1581_p9)  }
  0x89   :  { %s1585_s8 = scalar_lea.vmem %s107_s16, 16  ;;  %p1590_p11 = scmp.lt.s32.totalorder %s107_s16, %s2770_s18 }
  0x8a   :  { %p1586_p10 = scmp.ne.s32.totalorder %s107_s16, %s1585_s8  ;;  %p1591_p12 = scmp.lt.s32.totalorder %s2800_s13, %s1585_s8 }
  0x8c   :  { %p1592_p13 = por %p1591_p12, %p1590_p11 }
  0x8e   :  { %p1593_p0 = pnand %p1592_p13, %p1586_p10 }
  0x90   :  { %1596 = shalt.err (!%p1593_p0)  }
  0x91   :  { %109 = dma.hbm_to_vmem [thread:$0]  %s97_s30, 16, %s107_s16, [#allocation3] }
  0x92   :  { %s112_s0 = scalar_lea.hbm %s3600_s1, %s1214_s6  ;;  %s1216_s12 = sshll.u32 %s2846_s23, 4 }
  0x93   :  { %s1597_s14 = scalar_lea.hbm %s112_s0, 16  ;;  %p1600_p2 = scmp.lt.u32.totalorder %s112_s0, %s3600_s1 }
  0x94   :  { %p1598_p1 = scmp.ne.s32.totalorder %s112_s0, %s1597_s14  ;;  %p1601_p3 = scmp.lt.u32.totalorder %s2791_s10, %s1597_s14 }
  0x95   :  { %p1603_p5 = scmp.lt.u32.totalorder %s1597_s14, %s112_s0 }
  0x96   :  { %p1602_p4 = por %p1601_p3, %p1600_p2 }
  0x98   :  { %p1604_p6 = por %p1603_p5, %p1602_p4 }
  0x9a   :  { %p1605_p7 = pnand %p1604_p6, %p1598_p1 }
  0x9c   :  { %1608 = shalt.err (!%p1605_p7)  }
  0x9d   :  { %s1609_s16 = scalar_lea.vmem %s2848_s20, 16  ;;  %p1614_p9 = scmp.lt.s32.totalorder %s2848_s20, %s2770_s18 }
  0x9e   :  { %p1610_p8 = scmp.ne.s32.totalorder %s2848_s20, %s1609_s16  ;;  %p1615_p10 = scmp.lt.s32.totalorder %s2800_s13, %s1609_s16 }
  0xa0   :  { %p1616_p11 = por %p1615_p10, %p1614_p9 }
  0xa2   :  { %p1617_p12 = pnand %p1616_p11, %p1610_p8 }
  0xa4   :  { %1620 = shalt.err (!%p1617_p12)  }
  0xa5   :  { %124 = dma.hbm_to_vmem [thread:$0]  %s112_s0, 16, %s2848_s20, [#allocation3] }
  0xa6   :  { %s127_s23 = scalar_lea.hbm %s3600_s1, %s1216_s12  ;;  %s1218_s3 = sshll.u32 %s2850_s26, 4 }
  0xa7   :  { %s1621_s28 = scalar_lea.hbm %s127_s23, 16  ;;  %p1624_p0 = scmp.lt.u32.totalorder %s127_s23, %s3600_s1 }
  0xa8   :  { %p1622_p13 = scmp.ne.s32.totalorder %s127_s23, %s1621_s28  ;;  %p1625_p1 = scmp.lt.u32.totalorder %s2791_s10, %s1621_s28 }
  0xa9   :  { %p1627_p3 = scmp.lt.u32.totalorder %s1621_s28, %s127_s23 }
  0xaa   :  { %p1626_p2 = por %p1625_p1, %p1624_p0 }
  0xac   :  { %p1628_p4 = por %p1627_p3, %p1626_p2 }
  0xae   :  { %p1629_p5 = pnand %p1628_p4, %p1622_p13 }
  0xb0   :  { %1632 = shalt.err (!%p1629_p5)  }
  0xb1   :  { %s1633_s20 = scalar_lea.vmem %s2852_s22, 16  ;;  %p1638_p7 = scmp.lt.s32.totalorder %s2852_s22, %s2770_s18 }
  0xb2   :  { %p1634_p6 = scmp.ne.s32.totalorder %s2852_s22, %s1633_s20  ;;  %p1639_p8 = scmp.lt.s32.totalorder %s2800_s13, %s1633_s20 }
  0xb4   :  { %p1640_p9 = por %p1639_p8, %p1638_p7 }
  0xb6   :  { %p1641_p10 = pnand %p1640_p9, %p1634_p6 }
  0xb8   :  { %1644 = shalt.err (!%p1641_p10)  }
  0xb9   :  { %139 = dma.hbm_to_vmem [thread:$0]  %s127_s23, 16, %s2852_s22, [#allocation3] }
  0xba   :  { %s142_s6 = scalar_lea.hbm %s3600_s1, %s1218_s3  ;;  %s2670_s7 = smov [#allocation2 + $0x7]  }
  0xbb   :  { %s151_s21 = sshll.u32 %s2670_s7, 4  ;;  %s2895_s25 = sld [smem:[#allocation5 + $0x8]]  ;;  %s152_s21 = int_to_ptr.vmem [resolvable:$true] %s151_s21 }
  0xbc   :  { %s1645_s8 = scalar_lea.hbm %s142_s6, 16  ;;  %p1648_p12 = scmp.lt.u32.totalorder %s142_s6, %s3600_s1 }
  0xbd   :  { %p1646_p11 = scmp.ne.s32.totalorder %s142_s6, %s1645_s8  ;;  %p1649_p13 = scmp.lt.u32.totalorder %s2791_s10, %s1645_s8 }
  0xbe   :  { %p1651_p1 = scmp.lt.u32.totalorder %s1645_s8, %s142_s6 }
  0xbf   :  { %p1650_p0 = por %p1649_p13, %p1648_p12 }
  0xc1   :  { %p1652_p2 = por %p1651_p1, %p1650_p0 }
  0xc3   :  { %p1653_p3 = pnand %p1652_p2, %p1646_p11 }
  0xc5   :  { %1656 = shalt.err (!%p1653_p3)  }
  0xc6   :  { %s1657_s22 = scalar_lea.vmem %s152_s21, 16  ;;  %p1662_p5 = scmp.lt.s32.totalorder %s152_s21, %s2770_s18 }
  0xc7   :  { %p1658_p4 = scmp.ne.s32.totalorder %s152_s21, %s1657_s22  ;;  %p1663_p6 = scmp.lt.s32.totalorder %s2800_s13, %s1657_s22 }
  0xc9   :  { %p1664_p7 = por %p1663_p6, %p1662_p5 }
  0xcb   :  { %p1665_p8 = pnand %p1664_p7, %p1658_p4 }
  0xcd   :  { %1668 = shalt.err (!%p1665_p8)  }
  0xce   :  { %154 = dma.hbm_to_vmem [thread:$0]  %s142_s6, 16, %s152_s21, [#allocation3] }
  0xcf   :  { %s2671_s0 = smov [#allocation2 + $0x8]   ;;  %s2903_s14 = sld [smem:[#allocation5 + $0x9]] }
  0xd0   :  { %s166_s12 = sshll.u32 %s2671_s0, 4  ;;  %s2672_s24 = smov [#allocation2 + $0x9]   ;;  %s167_s12 = int_to_ptr.vmem [resolvable:$true] %s166_s12 }
  0xd1   :  { %s181_s15 = sshll.u32 %s2672_s24, 4  ;;  %s2905_s16 = sld [smem:[#allocation5 + $0xa]]  ;;  %s2908_s15 = int_to_ptr.vmem [resolvable:$true] %s181_s15 }
  0xd2   :  { %s1220_s17 = sshll.u32 %s2895_s25, 4 }
  0xd3   :  { %s157_s3 = scalar_lea.hbm %s3600_s1, %s1220_s17 }
  0xd4   :  { %s1669_s28 = scalar_lea.hbm %s157_s3, 16  ;;  %p1672_p10 = scmp.lt.u32.totalorder %s157_s3, %s3600_s1 }
  0xd5   :  { %p1670_p9 = scmp.ne.s32.totalorder %s157_s3, %s1669_s28  ;;  %p1673_p11 = scmp.lt.u32.totalorder %s2791_s10, %s1669_s28 }
  0xd6   :  { %p1675_p13 = scmp.lt.u32.totalorder %s1669_s28, %s157_s3 }
  0xd7   :  { %p1674_p12 = por %p1673_p11, %p1672_p10 }
  0xd9   :  { %p1676_p0 = por %p1675_p13, %p1674_p12 }
  0xdb   :  { %p1677_p1 = pnand %p1676_p0, %p1670_p9 }
  0xdd   :  { %1680 = shalt.err (!%p1677_p1)  }
  0xde   :  { %s1681_s20 = scalar_lea.vmem %s167_s12, 16  ;;  %p1686_p3 = scmp.lt.s32.totalorder %s167_s12, %s2770_s18 }
  0xdf   :  { %p1682_p2 = scmp.ne.s32.totalorder %s167_s12, %s1681_s20  ;;  %p1687_p4 = scmp.lt.s32.totalorder %s2800_s13, %s1681_s20 }
  0xe1   :  { %p1688_p5 = por %p1687_p4, %p1686_p3 }
  0xe3   :  { %p1689_p6 = pnand %p1688_p5, %p1682_p2 }
  0xe5   :  { %1692 = shalt.err (!%p1689_p6)  }
  0xe6   :  { %169 = dma.hbm_to_vmem [thread:$0]  %s157_s3, 16, %s167_s12, [#allocation3] }
  0xe7   :  { %s1222_s26 = sshll.u32 %s2903_s14, 4  ;;  %s2673_s30 = smov [#allocation2 + $0xa]  }
  0xe8   :  { %s196_s6 = sshll.u32 %s2673_s30, 4  ;;  %s172_s25 = scalar_lea.hbm %s3600_s1, %s1222_s26  ;;  %s2923_s6 = int_to_ptr.vmem [resolvable:$true] %s196_s6 }
  0xe9   :  { %s1693_s8 = scalar_lea.hbm %s172_s25, 16  ;;  %p1696_p8 = scmp.lt.u32.totalorder %s172_s25, %s3600_s1 }
  0xea   :  { %p1694_p7 = scmp.ne.s32.totalorder %s172_s25, %s1693_s8  ;;  %p1697_p9 = scmp.lt.u32.totalorder %s2791_s10, %s1693_s8 }
  0xeb   :  { %p1699_p11 = scmp.lt.u32.totalorder %s1693_s8, %s172_s25 }
  0xec   :  { %p1698_p10 = por %p1697_p9, %p1696_p8 }
  0xee   :  { %p1700_p12 = por %p1699_p11, %p1698_p10 }
  0xf0   :  { %p1701_p13 = pnand %p1700_p12, %p1694_p7 }
  0xf2   :  { %1704 = shalt.err (!%p1701_p13)  }
  0xf3   :  { %s1705_s22 = scalar_lea.vmem %s2908_s15, 16  ;;  %p1710_p1 = scmp.lt.s32.totalorder %s2908_s15, %s2770_s18 }
  0xf4   :  { %p1706_p0 = scmp.ne.s32.totalorder %s2908_s15, %s1705_s22  ;;  %p1711_p2 = scmp.lt.s32.totalorder %s2800_s13, %s1705_s22 }
  0xf6   :  { %p1712_p3 = por %p1711_p2, %p1710_p1 }
  0xf8   :  { %p1713_p4 = pnand %p1712_p3, %p1706_p0 }
  0xfa   :  { %1716 = shalt.err (!%p1713_p4)  }
  0xfb   :  { %184 = dma.hbm_to_vmem [thread:$0]  %s172_s25, 16, %s2908_s15, [#allocation3] }
  0xfc   :  { %s1224_s0 = sshll.u32 %s2905_s16, 4  ;;  %s2936_s12 = sld [smem:[#allocation5 + $0xb]] }
  0xfd   :  { %s187_s17 = scalar_lea.hbm %s3600_s1, %s1224_s0 }
  0xfe   :  { %s1717_s19 = scalar_lea.hbm %s187_s17, 16  ;;  %p1720_p6 = scmp.lt.u32.totalorder %s187_s17, %s3600_s1 }
  0xff   :  { %p1718_p5 = scmp.ne.s32.totalorder %s187_s17, %s1717_s19  ;;  %p1721_p7 = scmp.lt.u32.totalorder %s2791_s10, %s1717_s19 }
 0x100   :  { %p1723_p9 = scmp.lt.u32.totalorder %s1717_s19, %s187_s17 }
 0x101   :  { %p1722_p8 = por %p1721_p7, %p1720_p6 }
 0x103   :  { %p1724_p10 = por %p1723_p9, %p1722_p8 }
 0x105   :  { %p1725_p11 = pnand %p1724_p10, %p1718_p5 }
 0x107   :  { %1728 = shalt.err (!%p1725_p11)  }
 0x108   :  { %s1729_s15 = scalar_lea.vmem %s2923_s6, 16  ;;  %p1734_p13 = scmp.lt.s32.totalorder %s2923_s6, %s2770_s18 }
 0x109   :  { %p1730_p12 = scmp.ne.s32.totalorder %s2923_s6, %s1729_s15  ;;  %p1735_p0 = scmp.lt.s32.totalorder %s2800_s13, %s1729_s15 }
 0x10b   :  { %p1736_p1 = por %p1735_p0, %p1734_p13 }
 0x10d   :  { %p1737_p2 = pnand %p1736_p1, %p1730_p12 }
 0x10f   :  { %1740 = shalt.err (!%p1737_p2)  }
 0x110   :  { %199 = dma.hbm_to_vmem [thread:$0]  %s187_s17, 16, %s2923_s6, [#allocation3] }
 0x111   :  { %s2674_s16 = smov [#allocation2 + $0xb]   ;;  %s2951_s27 = sld [smem:[#allocation5 + $0xc]] }
 0x112   :  { %s211_s28 = sshll.u32 %s2674_s16, 4  ;;  %s2675_s29 = smov [#allocation2 + $0xc]   ;;  %s212_s28 = int_to_ptr.vmem [resolvable:$true] %s211_s28 }
 0x113   :  { %s226_s20 = sshll.u32 %s2675_s29, 4  ;;  %s2953_s26 = sld [smem:[#allocation5 + $0xd]]  ;;  %s2956_s20 = int_to_ptr.vmem [resolvable:$true] %s226_s20 }
 0x114   :  { %s1226_s30 = sshll.u32 %s2936_s12, 4 }
 0x115   :  { %s202_s25 = scalar_lea.hbm %s3600_s1, %s1226_s30 }
 0x116   :  { %s1741_s8 = scalar_lea.hbm %s202_s25, 16  ;;  %p1744_p4 = scmp.lt.u32.totalorder %s202_s25, %s3600_s1 }
 0x117   :  { %p1742_p3 = scmp.ne.s32.totalorder %s202_s25, %s1741_s8  ;;  %p1745_p5 = scmp.lt.u32.totalorder %s2791_s10, %s1741_s8 }
 0x118   :  { %p1747_p7 = scmp.lt.u32.totalorder %s1741_s8, %s202_s25 }
 0x119   :  { %p1746_p6 = por %p1745_p5, %p1744_p4 }
 0x11b   :  { %p1748_p8 = por %p1747_p7, %p1746_p6 }
 0x11d   :  { %p1749_p9 = pnand %p1748_p8, %p1742_p3 }
 0x11f   :  { %1752 = shalt.err (!%p1749_p9)  }
 0x120   :  { %s1753_s11 = scalar_lea.vmem %s212_s28, 16  ;;  %p1758_p11 = scmp.lt.s32.totalorder %s212_s28, %s2770_s18 }
 0x121   :  { %p1754_p10 = scmp.ne.s32.totalorder %s212_s28, %s1753_s11  ;;  %p1759_p12 = scmp.lt.s32.totalorder %s2800_s13, %s1753_s11 }
 0x123   :  { %p1760_p13 = por %p1759_p12, %p1758_p11 }
 0x125   :  { %p1761_p0 = pnand %p1760_p13, %p1754_p10 }
 0x127   :  { %1764 = shalt.err (!%p1761_p0)  }
 0x128   :  { %214 = dma.hbm_to_vmem [thread:$0]  %s202_s25, 16, %s212_s28, [#allocation3] }
 0x129   :  { %s1228_s22 = sshll.u32 %s2951_s27, 4  ;;  %s2676_s0 = smov [#allocation2 + $0xd]  }
 0x12a   :  { %s241_s12 = sshll.u32 %s2676_s0, 4  ;;  %s217_s17 = scalar_lea.hbm %s3600_s1, %s1228_s22  ;;  %s2971_s12 = int_to_ptr.vmem [resolvable:$true] %s241_s12 }
 0x12b   :  { %s1765_s19 = scalar_lea.hbm %s217_s17, 16  ;;  %p1768_p2 = scmp.lt.u32.totalorder %s217_s17, %s3600_s1 }
 0x12c   :  { %p1766_p1 = scmp.ne.s32.totalorder %s217_s17, %s1765_s19  ;;  %p1769_p3 = scmp.lt.u32.totalorder %s2791_s10, %s1765_s19 }
 0x12d   :  { %p1771_p5 = scmp.lt.u32.totalorder %s1765_s19, %s217_s17 }
 0x12e   :  { %p1770_p4 = por %p1769_p3, %p1768_p2 }
 0x130   :  { %p1772_p6 = por %p1771_p5, %p1770_p4 }
 0x132   :  { %p1773_p7 = pnand %p1772_p6, %p1766_p1 }
 0x134   :  { %1776 = shalt.err (!%p1773_p7)  }
 0x135   :  { %s1777_s15 = scalar_lea.vmem %s2956_s20, 16  ;;  %p1782_p9 = scmp.lt.s32.totalorder %s2956_s20, %s2770_s18 }
 0x136   :  { %p1778_p8 = scmp.ne.s32.totalorder %s2956_s20, %s1777_s15  ;;  %p1783_p10 = scmp.lt.s32.totalorder %s2800_s13, %s1777_s15 }
 0x138   :  { %p1784_p11 = por %p1783_p10, %p1782_p9 }
 0x13a   :  { %p1785_p12 = pnand %p1784_p11, %p1778_p8 }
 0x13c   :  { %1788 = shalt.err (!%p1785_p12)  }
 0x13d   :  { %229 = dma.hbm_to_vmem [thread:$0]  %s217_s17, 16, %s2956_s20, [#allocation3] }
 0x13e   :  { %s1230_s16 = sshll.u32 %s2953_s26, 4  ;;  %s2984_s28 = sld [smem:[#allocation5 + $0xe]] }
 0x13f   :  { %s232_s30 = scalar_lea.hbm %s3600_s1, %s1230_s16 }
 0x140   :  { %s1789_s7 = scalar_lea.hbm %s232_s30, 16  ;;  %p1792_p0 = scmp.lt.u32.totalorder %s232_s30, %s3600_s1 }
 0x141   :  { %p1790_p13 = scmp.ne.s32.totalorder %s232_s30, %s1789_s7  ;;  %p1793_p1 = scmp.lt.u32.totalorder %s2791_s10, %s1789_s7 }
 0x142   :  { %p1795_p3 = scmp.lt.u32.totalorder %s1789_s7, %s232_s30 }
 0x143   :  { %p1794_p2 = por %p1793_p1, %p1792_p0 }
 0x145   :  { %p1796_p4 = por %p1795_p3, %p1794_p2 }
 0x147   :  { %p1797_p5 = pnand %p1796_p4, %p1790_p13 }
 0x149   :  { %1800 = shalt.err (!%p1797_p5)  }
 0x14a   :  { %s1801_s20 = scalar_lea.vmem %s2971_s12, 16  ;;  %p1806_p7 = scmp.lt.s32.totalorder %s2971_s12, %s2770_s18 }
 0x14b   :  { %p1802_p6 = scmp.ne.s32.totalorder %s2971_s12, %s1801_s20  ;;  %p1807_p8 = scmp.lt.s32.totalorder %s2800_s13, %s1801_s20 }
 0x14d   :  { %p1808_p9 = por %p1807_p8, %p1806_p7 }
 0x14f   :  { %p1809_p10 = pnand %p1808_p9, %p1802_p6 }
 0x151   :  { %1812 = shalt.err (!%p1809_p10)  }
 0x152   :  { %244 = dma.hbm_to_vmem [thread:$0]  %s232_s30, 16, %s2971_s12, [#allocation3] }
 0x153   :  { %s2677_s26 = smov [#allocation2 + $0xe]   ;;  %s2999_s9 = sld [smem:[#allocation5 + $0xf]] }
 0x154   :  { %s256_s8 = sshll.u32 %s2677_s26, 4  ;;  %s2678_s6 = smov [#allocation2 + $0xf]   ;;  %s257_s8 = int_to_ptr.vmem [resolvable:$true] %s256_s8 }
 0x155   :  { %s271_s11 = sshll.u32 %s2678_s6, 4  ;;  %s3001_s22 = sld [smem:[#allocation5 + $0x10]]  ;;  %s3004_s11 = int_to_ptr.vmem [resolvable:$true] %s271_s11 }
 0x156   :  { %s1232_s0 = sshll.u32 %s2984_s28, 4 }
 0x157   :  { %s247_s17 = scalar_lea.hbm %s3600_s1, %s1232_s0 }
 0x158   :  { %s1813_s19 = scalar_lea.hbm %s247_s17, 16  ;;  %p1816_p12 = scmp.lt.u32.totalorder %s247_s17, %s3600_s1 }
 0x159   :  { %p1814_p11 = scmp.ne.s32.totalorder %s247_s17, %s1813_s19  ;;  %p1817_p13 = scmp.lt.u32.totalorder %s2791_s10, %s1813_s19 }
 0x15a   :  { %p1819_p1 = scmp.lt.u32.totalorder %s1813_s19, %s247_s17 }
 0x15b   :  { %p1818_p0 = por %p1817_p13, %p1816_p12 }
 0x15d   :  { %p1820_p2 = por %p1819_p1, %p1818_p0 }
 0x15f   :  { %p1821_p3 = pnand %p1820_p2, %p1814_p11 }
 0x161   :  { %1824 = shalt.err (!%p1821_p3)  }
 0x162   :  { %s1825_s3 = scalar_lea.vmem %s257_s8, 16  ;;  %p1830_p5 = scmp.lt.s32.totalorder %s257_s8, %s2770_s18 }
 0x163   :  { %p1826_p4 = scmp.ne.s32.totalorder %s257_s8, %s1825_s3  ;;  %p1831_p6 = scmp.lt.s32.totalorder %s2800_s13, %s1825_s3 }
 0x165   :  { %p1832_p7 = por %p1831_p6, %p1830_p5 }
 0x167   :  { %p1833_p8 = pnand %p1832_p7, %p1826_p4 }
 0x169   :  { %1836 = shalt.err (!%p1833_p8)  }
 0x16a   :  { %259 = dma.hbm_to_vmem [thread:$0]  %s247_s17, 16, %s257_s8, [#allocation3] }
 0x16b   :  { %s1234_s15 = sshll.u32 %s2999_s9, 4  ;;  %s2679_s16 = smov [#allocation2 + $0x10]  }
 0x16c   :  { %s286_s28 = sshll.u32 %s2679_s16, 4  ;;  %s262_s30 = scalar_lea.hbm %s3600_s1, %s1234_s15  ;;  %s3019_s28 = int_to_ptr.vmem [resolvable:$true] %s286_s28 }
 0x16d   :  { %s1837_s7 = scalar_lea.hbm %s262_s30, 16  ;;  %p1840_p10 = scmp.lt.u32.totalorder %s262_s30, %s3600_s1 }
 0x16e   :  { %p1838_p9 = scmp.ne.s32.totalorder %s262_s30, %s1837_s7  ;;  %p1841_p11 = scmp.lt.u32.totalorder %s2791_s10, %s1837_s7 }
 0x16f   :  { %p1843_p13 = scmp.lt.u32.totalorder %s1837_s7, %s262_s30 }
 0x170   :  { %p1842_p12 = por %p1841_p11, %p1840_p10 }
 0x172   :  { %p1844_p0 = por %p1843_p13, %p1842_p12 }
 0x174   :  { %p1845_p1 = pnand %p1844_p0, %p1838_p9 }
 0x176   :  { %1848 = shalt.err (!%p1845_p1)  }
 0x177   :  { %s1849_s20 = scalar_lea.vmem %s3004_s11, 16  ;;  %p1854_p3 = scmp.lt.s32.totalorder %s3004_s11, %s2770_s18 }
 0x178   :  { %p1850_p2 = scmp.ne.s32.totalorder %s3004_s11, %s1849_s20  ;;  %p1855_p4 = scmp.lt.s32.totalorder %s2800_s13, %s1849_s20 }
 0x17a   :  { %p1856_p5 = por %p1855_p4, %p1854_p3 }
 0x17c   :  { %p1857_p6 = pnand %p1856_p5, %p1850_p2 }
 0x17e   :  { %1860 = shalt.err (!%p1857_p6)  }
 0x17f   :  { %274 = dma.hbm_to_vmem [thread:$0]  %s262_s30, 16, %s3004_s11, [#allocation3] }
 0x180   :  { %s1236_s26 = sshll.u32 %s3001_s22, 4  ;;  %s3032_s8 = sld [smem:[#allocation5 + $0x11]] }
 0x181   :  { %s277_s0 = scalar_lea.hbm %s3600_s1, %s1236_s26 }
 0x182   :  { %s1861_s14 = scalar_lea.hbm %s277_s0, 16  ;;  %p1864_p8 = scmp.lt.u32.totalorder %s277_s0, %s3600_s1 }
 0x183   :  { %p1862_p7 = scmp.ne.s32.totalorder %s277_s0, %s1861_s14  ;;  %p1865_p9 = scmp.lt.u32.totalorder %s2791_s10, %s1861_s14 }
 0x184   :  { %p1867_p11 = scmp.lt.u32.totalorder %s1861_s14, %s277_s0 }
 0x185   :  { %p1866_p10 = por %p1865_p9, %p1864_p8 }
 0x187   :  { %p1868_p12 = por %p1867_p11, %p1866_p10 }
 0x189   :  { %p1869_p13 = pnand %p1868_p12, %p1862_p7 }
 0x18b   :  { %1872 = shalt.err (!%p1869_p13)  }
 0x18c   :  { %s1873_s11 = scalar_lea.vmem %s3019_s28, 16  ;;  %p1878_p1 = scmp.lt.s32.totalorder %s3019_s28, %s2770_s18 }
 0x18d   :  { %p1874_p0 = scmp.ne.s32.totalorder %s3019_s28, %s1873_s11  ;;  %p1879_p2 = scmp.lt.s32.totalorder %s2800_s13, %s1873_s11 }
 0x18f   :  { %p1880_p3 = por %p1879_p2, %p1878_p1 }
 0x191   :  { %p1881_p4 = pnand %p1880_p3, %p1874_p0 }
 0x193   :  { %1884 = shalt.err (!%p1881_p4)  }
 0x194   :  { %289 = dma.hbm_to_vmem [thread:$0]  %s277_s0, 16, %s3019_s28, [#allocation3] }
 0x195   :  { %s2680_s22 = smov [#allocation2 + $0x11]   ;;  %s3047_s23 = sld [smem:[#allocation5 + $0x12]] }
 0x196   :  { %s301_s19 = sshll.u32 %s2680_s22, 4  ;;  %s2681_s12 = smov [#allocation2 + $0x12]   ;;  %s302_s19 = int_to_ptr.vmem [resolvable:$true] %s301_s19 }
 0x197   :  { %s316_s3 = sshll.u32 %s2681_s12, 4  ;;  %s3049_s15 = sld [smem:[#allocation5 + $0x13]]  ;;  %s3052_s3 = int_to_ptr.vmem [resolvable:$true] %s316_s3 }
 0x198   :  { %s1238_s16 = sshll.u32 %s3032_s8, 4 }
 0x199   :  { %s292_s30 = scalar_lea.hbm %s3600_s1, %s1238_s16 }
 0x19a   :  { %s1885_s7 = scalar_lea.hbm %s292_s30, 16  ;;  %p1888_p6 = scmp.lt.u32.totalorder %s292_s30, %s3600_s1 }
 0x19b   :  { %p1886_p5 = scmp.ne.s32.totalorder %s292_s30, %s1885_s7  ;;  %p1889_p7 = scmp.lt.u32.totalorder %s2791_s10, %s1885_s7 }
 0x19c   :  { %p1891_p9 = scmp.lt.u32.totalorder %s1885_s7, %s292_s30 }
 0x19d   :  { %p1890_p8 = por %p1889_p7, %p1888_p6 }
 0x19f   :  { %p1892_p10 = por %p1891_p9, %p1890_p8 }
 0x1a1   :  { %p1893_p11 = pnand %p1892_p10, %p1886_p5 }
 0x1a3   :  { %1896 = shalt.err (!%p1893_p11)  }
 0x1a4   :  { %s1897_s25 = scalar_lea.vmem %s302_s19, 16  ;;  %p1902_p13 = scmp.lt.s32.totalorder %s302_s19, %s2770_s18 }
 0x1a5   :  { %p1898_p12 = scmp.ne.s32.totalorder %s302_s19, %s1897_s25  ;;  %p1903_p0 = scmp.lt.s32.totalorder %s2800_s13, %s1897_s25 }
 0x1a7   :  { %p1904_p1 = por %p1903_p0, %p1902_p13 }
 0x1a9   :  { %p1905_p2 = pnand %p1904_p1, %p1898_p12 }
 0x1ab   :  { %1908 = shalt.err (!%p1905_p2)  }
 0x1ac   :  { %304 = dma.hbm_to_vmem [thread:$0]  %s292_s30, 16, %s302_s19, [#allocation3] }
 0x1ad   :  { %s1240_s20 = sshll.u32 %s3047_s23, 4  ;;  %s2682_s26 = smov [#allocation2 + $0x13]  }
 0x1ae   :  { %s331_s8 = sshll.u32 %s2682_s26, 4  ;;  %s307_s0 = scalar_lea.hbm %s3600_s1, %s1240_s20  ;;  %s3067_s8 = int_to_ptr.vmem [resolvable:$true] %s331_s8 }
 0x1af   :  { %s1909_s14 = scalar_lea.hbm %s307_s0, 16  ;;  %p1912_p4 = scmp.lt.u32.totalorder %s307_s0, %s3600_s1 }
 0x1b0   :  { %p1910_p3 = scmp.ne.s32.totalorder %s307_s0, %s1909_s14  ;;  %p1913_p5 = scmp.lt.u32.totalorder %s2791_s10, %s1909_s14 }
 0x1b1   :  { %p1915_p7 = scmp.lt.u32.totalorder %s1909_s14, %s307_s0 }
 0x1b2   :  { %p1914_p6 = por %p1913_p5, %p1912_p4 }
 0x1b4   :  { %p1916_p8 = por %p1915_p7, %p1914_p6 }
 0x1b6   :  { %p1917_p9 = pnand %p1916_p8, %p1910_p3 }
 0x1b8   :  { %1920 = shalt.err (!%p1917_p9)  }
 0x1b9   :  { %s1921_s11 = scalar_lea.vmem %s3052_s3, 16  ;;  %p1926_p11 = scmp.lt.s32.totalorder %s3052_s3, %s2770_s18 }
 0x1ba   :  { %p1922_p10 = scmp.ne.s32.totalorder %s3052_s3, %s1921_s11  ;;  %p1927_p12 = scmp.lt.s32.totalorder %s2800_s13, %s1921_s11 }
 0x1bc   :  { %p1928_p13 = por %p1927_p12, %p1926_p11 }
 0x1be   :  { %p1929_p0 = pnand %p1928_p13, %p1922_p10 }
 0x1c0   :  { %1932 = shalt.err (!%p1929_p0)  }
 0x1c1   :  { %319 = dma.hbm_to_vmem [thread:$0]  %s307_s0, 16, %s3052_s3, [#allocation3] }
 0x1c2   :  { %s1242_s22 = sshll.u32 %s3049_s15, 4  ;;  %s3080_s19 = sld [smem:[#allocation5 + $0x14]] }
 0x1c3   :  { %s322_s16 = scalar_lea.hbm %s3600_s1, %s1242_s22 }
 0x1c4   :  { %s1933_s27 = scalar_lea.hbm %s322_s16, 16  ;;  %p1936_p2 = scmp.lt.u32.totalorder %s322_s16, %s3600_s1 }
 0x1c5   :  { %p1934_p1 = scmp.ne.s32.totalorder %s322_s16, %s1933_s27  ;;  %p1937_p3 = scmp.lt.u32.totalorder %s2791_s10, %s1933_s27 }
 0x1c6   :  { %p1939_p5 = scmp.lt.u32.totalorder %s1933_s27, %s322_s16 }
 0x1c7   :  { %p1938_p4 = por %p1937_p3, %p1936_p2 }
 0x1c9   :  { %p1940_p6 = por %p1939_p5, %p1938_p4 }
 0x1cb   :  { %p1941_p7 = pnand %p1940_p6, %p1934_p1 }
 0x1cd   :  { %1944 = shalt.err (!%p1941_p7)  }
 0x1ce   :  { %s1945_s3 = scalar_lea.vmem %s3067_s8, 16  ;;  %p1950_p9 = scmp.lt.s32.totalorder %s3067_s8, %s2770_s18 }
 0x1cf   :  { %p1946_p8 = scmp.ne.s32.totalorder %s3067_s8, %s1945_s3  ;;  %p1951_p10 = scmp.lt.s32.totalorder %s2800_s13, %s1945_s3 }
 0x1d1   :  { %p1952_p11 = por %p1951_p10, %p1950_p9 }
 0x1d3   :  { %p1953_p12 = pnand %p1952_p11, %p1946_p8 }
 0x1d5   :  { %1956 = shalt.err (!%p1953_p12)  }
 0x1d6   :  { %334 = dma.hbm_to_vmem [thread:$0]  %s322_s16, 16, %s3067_s8, [#allocation3] }
 0x1d7   :  { %s2683_s15 = smov [#allocation2 + $0x14]   ;;  %s3095_s21 = sld [smem:[#allocation5 + $0x15]] }
 0x1d8   :  { %s346_s7 = sshll.u32 %s2683_s15, 4  ;;  %s2684_s28 = smov [#allocation2 + $0x15]   ;;  %s347_s7 = int_to_ptr.vmem [resolvable:$true] %s346_s7 }
 0x1d9   :  { %s361_s25 = sshll.u32 %s2684_s28, 4  ;;  %s3097_s20 = sld [smem:[#allocation5 + $0x16]]  ;;  %s3100_s25 = int_to_ptr.vmem [resolvable:$true] %s361_s25 }
 0x1da   :  { %s1244_s26 = sshll.u32 %s3080_s19, 4 }
 0x1db   :  { %s337_s0 = scalar_lea.hbm %s3600_s1, %s1244_s26 }
 0x1dc   :  { %s1957_s14 = scalar_lea.hbm %s337_s0, 16  ;;  %p1960_p0 = scmp.lt.u32.totalorder %s337_s0, %s3600_s1 }
 0x1dd   :  { %p1958_p13 = scmp.ne.s32.totalorder %s337_s0, %s1957_s14  ;;  %p1961_p1 = scmp.lt.u32.totalorder %s2791_s10, %s1957_s14 }
 0x1de   :  { %p1963_p3 = scmp.lt.u32.totalorder %s1957_s14, %s337_s0 }
 0x1df   :  { %p1962_p2 = por %p1961_p1, %p1960_p0 }
 0x1e1   :  { %p1964_p4 = por %p1963_p3, %p1962_p2 }
 0x1e3   :  { %p1965_p5 = pnand %p1964_p4, %p1958_p13 }
 0x1e5   :  { %1968 = shalt.err (!%p1965_p5)  }
 0x1e6   :  { %s1969_s17 = scalar_lea.vmem %s347_s7, 16  ;;  %p1974_p7 = scmp.lt.s32.totalorder %s347_s7, %s2770_s18 }
 0x1e7   :  { %p1970_p6 = scmp.ne.s32.totalorder %s347_s7, %s1969_s17  ;;  %p1975_p8 = scmp.lt.s32.totalorder %s2800_s13, %s1969_s17 }
 0x1e9   :  { %p1976_p9 = por %p1975_p8, %p1974_p7 }
 0x1eb   :  { %p1977_p10 = pnand %p1976_p9, %p1970_p6 }
 0x1ed   :  { %1980 = shalt.err (!%p1977_p10)  }
 0x1ee   :  { %349 = dma.hbm_to_vmem [thread:$0]  %s337_s0, 16, %s347_s7, [#allocation3] }
 0x1ef   :  { %s1246_s11 = sshll.u32 %s3095_s21, 4  ;;  %s2685_s22 = smov [#allocation2 + $0x16]  }
 0x1f0   :  { %s376_s19 = sshll.u32 %s2685_s22, 4  ;;  %s352_s16 = scalar_lea.hbm %s3600_s1, %s1246_s11  ;;  %s3115_s19 = int_to_ptr.vmem [resolvable:$true] %s376_s19 }
 0x1f1   :  { %s1981_s27 = scalar_lea.hbm %s352_s16, 16  ;;  %p1984_p12 = scmp.lt.u32.totalorder %s352_s16, %s3600_s1 }
 0x1f2   :  { %p1982_p11 = scmp.ne.s32.totalorder %s352_s16, %s1981_s27  ;;  %p1985_p13 = scmp.lt.u32.totalorder %s2791_s10, %s1981_s27 }
 0x1f3   :  { %p1987_p1 = scmp.lt.u32.totalorder %s1981_s27, %s352_s16 }
 0x1f4   :  { %p1986_p0 = por %p1985_p13, %p1984_p12 }
 0x1f6   :  { %p1988_p2 = por %p1987_p1, %p1986_p0 }
 0x1f8   :  { %p1989_p3 = pnand %p1988_p2, %p1982_p11 }
 0x1fa   :  { %1992 = shalt.err (!%p1989_p3)  }
 0x1fb   :  { %s1993_s3 = scalar_lea.vmem %s3100_s25, 16  ;;  %p1998_p5 = scmp.lt.s32.totalorder %s3100_s25, %s2770_s18 }
 0x1fc   :  { %p1994_p4 = scmp.ne.s32.totalorder %s3100_s25, %s1993_s3  ;;  %p1999_p6 = scmp.lt.s32.totalorder %s2800_s13, %s1993_s3 }
 0x1fe   :  { %p2000_p7 = por %p1999_p6, %p1998_p5 }
 0x200   :  { %p2001_p8 = pnand %p2000_p7, %p1994_p4 }
 0x202   :  { %2004 = shalt.err (!%p2001_p8)  }
 0x203   :  { %364 = dma.hbm_to_vmem [thread:$0]  %s352_s16, 16, %s3100_s25, [#allocation3] }
 0x204   :  { %s1248_s15 = sshll.u32 %s3097_s20, 4  ;;  %s3128_s7 = sld [smem:[#allocation5 + $0x17]] }
 0x205   :  { %s367_s26 = scalar_lea.hbm %s3600_s1, %s1248_s15 }
 0x206   :  { %s2005_s9 = scalar_lea.hbm %s367_s26, 16  ;;  %p2008_p10 = scmp.lt.u32.totalorder %s367_s26, %s3600_s1 }
 0x207   :  { %p2006_p9 = scmp.ne.s32.totalorder %s367_s26, %s2005_s9  ;;  %p2009_p11 = scmp.lt.u32.totalorder %s2791_s10, %s2005_s9 }
 0x208   :  { %p2011_p13 = scmp.lt.u32.totalorder %s2005_s9, %s367_s26 }
 0x209   :  { %p2010_p12 = por %p2009_p11, %p2008_p10 }
 0x20b   :  { %p2012_p0 = por %p2011_p13, %p2010_p12 }
 0x20d   :  { %p2013_p1 = pnand %p2012_p0, %p2006_p9 }
 0x20f   :  { %2016 = shalt.err (!%p2013_p1)  }
 0x210   :  { %s2017_s25 = scalar_lea.vmem %s3115_s19, 16  ;;  %p2022_p3 = scmp.lt.s32.totalorder %s3115_s19, %s2770_s18 }
 0x211   :  { %p2018_p2 = scmp.ne.s32.totalorder %s3115_s19, %s2017_s25  ;;  %p2023_p4 = scmp.lt.s32.totalorder %s2800_s13, %s2017_s25 }
 0x213   :  { %p2024_p5 = por %p2023_p4, %p2022_p3 }
 0x215   :  { %p2025_p6 = pnand %p2024_p5, %p2018_p2 }
 0x217   :  { %2028 = shalt.err (!%p2025_p6)  }
 0x218   :  { %379 = dma.hbm_to_vmem [thread:$0]  %s367_s26, 16, %s3115_s19, [#allocation3] }
 0x219   :  { %s2686_s20 = smov [#allocation2 + $0x17]   ;;  %s3143_s24 = sld [smem:[#allocation5 + $0x18]] }
 0x21a   :  { %s391_s14 = sshll.u32 %s2686_s20, 4  ;;  %s2687_s8 = smov [#allocation2 + $0x18]   ;;  %s392_s14 = int_to_ptr.vmem [resolvable:$true] %s391_s14 }
 0x21b   :  { %s406_s17 = sshll.u32 %s2687_s8, 4  ;;  %s3145_s11 = sld [smem:[#allocation5 + $0x19]]  ;;  %s3148_s17 = int_to_ptr.vmem [resolvable:$true] %s406_s17 }
 0x21c   :  { %s1250_s22 = sshll.u32 %s3128_s7, 4 }
 0x21d   :  { %s382_s16 = scalar_lea.hbm %s3600_s1, %s1250_s22 }
 0x21e   :  { %s2029_s27 = scalar_lea.hbm %s382_s16, 16  ;;  %p2032_p8 = scmp.lt.u32.totalorder %s382_s16, %s3600_s1 }
 0x21f   :  { %p2030_p7 = scmp.ne.s32.totalorder %s382_s16, %s2029_s27  ;;  %p2033_p9 = scmp.lt.u32.totalorder %s2791_s10, %s2029_s27 }
 0x220   :  { %p2035_p11 = scmp.lt.u32.totalorder %s2029_s27, %s382_s16 }
 0x221   :  { %p2034_p10 = por %p2033_p9, %p2032_p8 }
 0x223   :  { %p2036_p12 = por %p2035_p11, %p2034_p10 }
 0x225   :  { %p2037_p13 = pnand %p2036_p12, %p2030_p7 }
 0x227   :  { %2040 = shalt.err (!%p2037_p13)  }
 0x228   :  { %s2041_s30 = scalar_lea.vmem %s392_s14, 16  ;;  %p2046_p1 = scmp.lt.s32.totalorder %s392_s14, %s2770_s18 }
 0x229   :  { %p2042_p0 = scmp.ne.s32.totalorder %s392_s14, %s2041_s30  ;;  %p2047_p2 = scmp.lt.s32.totalorder %s2800_s13, %s2041_s30 }
 0x22b   :  { %p2048_p3 = por %p2047_p2, %p2046_p1 }
 0x22d   :  { %p2049_p4 = pnand %p2048_p3, %p2042_p0 }
 0x22f   :  { %2052 = shalt.err (!%p2049_p4)  }
 0x230   :  { %394 = dma.hbm_to_vmem [thread:$0]  %s382_s16, 16, %s392_s14, [#allocation3] }
 0x231   :  { %s1252_s3 = sshll.u32 %s3143_s24, 4  ;;  %s2688_s15 = smov [#allocation2 + $0x19]  }
 0x232   :  { %s421_s7 = sshll.u32 %s2688_s15, 4  ;;  %s397_s26 = scalar_lea.hbm %s3600_s1, %s1252_s3  ;;  %s3163_s7 = int_to_ptr.vmem [resolvable:$true] %s421_s7 }
 0x233   :  { %s2053_s9 = scalar_lea.hbm %s397_s26, 16  ;;  %p2056_p6 = scmp.lt.u32.totalorder %s397_s26, %s3600_s1 }
 0x234   :  { %p2054_p5 = scmp.ne.s32.totalorder %s397_s26, %s2053_s9  ;;  %p2057_p7 = scmp.lt.u32.totalorder %s2791_s10, %s2053_s9 }
 0x235   :  { %p2059_p9 = scmp.lt.u32.totalorder %s2053_s9, %s397_s26 }
 0x236   :  { %p2058_p8 = por %p2057_p7, %p2056_p6 }
 0x238   :  { %p2060_p10 = por %p2059_p9, %p2058_p8 }
 0x23a   :  { %p2061_p11 = pnand %p2060_p10, %p2054_p5 }
 0x23c   :  { %2064 = shalt.err (!%p2061_p11)  }
 0x23d   :  { %s2065_s25 = scalar_lea.vmem %s3148_s17, 16  ;;  %p2070_p13 = scmp.lt.s32.totalorder %s3148_s17, %s2770_s18 }
 0x23e   :  { %p2066_p12 = scmp.ne.s32.totalorder %s3148_s17, %s2065_s25  ;;  %p2071_p0 = scmp.lt.s32.totalorder %s2800_s13, %s2065_s25 }
 0x240   :  { %p2072_p1 = por %p2071_p0, %p2070_p13 }
 0x242   :  { %p2073_p2 = pnand %p2072_p1, %p2066_p12 }
 0x244   :  { %2076 = shalt.err (!%p2073_p2)  }
 0x245   :  { %409 = dma.hbm_to_vmem [thread:$0]  %s397_s26, 16, %s3148_s17, [#allocation3] }
 0x246   :  { %s1254_s20 = sshll.u32 %s3145_s11, 4  ;;  %s3176_s14 = sld [smem:[#allocation5 + $0x1a]] }
 0x247   :  { %s412_s22 = scalar_lea.hbm %s3600_s1, %s1254_s20 }
 0x248   :  { %s2077_s23 = scalar_lea.hbm %s412_s22, 16  ;;  %p2080_p4 = scmp.lt.u32.totalorder %s412_s22, %s3600_s1 }
 0x249   :  { %p2078_p3 = scmp.ne.s32.totalorder %s412_s22, %s2077_s23  ;;  %p2081_p5 = scmp.lt.u32.totalorder %s2791_s10, %s2077_s23 }
 0x24a   :  { %p2083_p7 = scmp.lt.u32.totalorder %s2077_s23, %s412_s22 }
 0x24b   :  { %p2082_p6 = por %p2081_p5, %p2080_p4 }
 0x24d   :  { %p2084_p8 = por %p2083_p7, %p2082_p6 }
 0x24f   :  { %p2085_p9 = pnand %p2084_p8, %p2078_p3 }
 0x251   :  { %2088 = shalt.err (!%p2085_p9)  }
 0x252   :  { %s2089_s17 = scalar_lea.vmem %s3163_s7, 16  ;;  %p2094_p11 = scmp.lt.s32.totalorder %s3163_s7, %s2770_s18 }
 0x253   :  { %p2090_p10 = scmp.ne.s32.totalorder %s3163_s7, %s2089_s17  ;;  %p2095_p12 = scmp.lt.s32.totalorder %s2800_s13, %s2089_s17 }
 0x255   :  { %p2096_p13 = por %p2095_p12, %p2094_p11 }
 0x257   :  { %p2097_p0 = pnand %p2096_p13, %p2090_p10 }
 0x259   :  { %2100 = shalt.err (!%p2097_p0)  }
 0x25a   :  { %424 = dma.hbm_to_vmem [thread:$0]  %s412_s22, 16, %s3163_s7, [#allocation3] }
 0x25b   :  { %s2689_s11 = smov [#allocation2 + $0x1a]   ;;  %s3191_s29 = sld [smem:[#allocation5 + $0x1b]] }
 0x25c   :  { %s436_s27 = sshll.u32 %s2689_s11, 4  ;;  %s2690_s19 = smov [#allocation2 + $0x1b]   ;;  %s437_s27 = int_to_ptr.vmem [resolvable:$true] %s436_s27 }
 0x25d   :  { %s451_s30 = sshll.u32 %s2690_s19, 4  ;;  %s3193_s3 = sld [smem:[#allocation5 + $0x1c]]  ;;  %s3196_s30 = int_to_ptr.vmem [resolvable:$true] %s451_s30 }
 0x25e   :  { %s1256_s15 = sshll.u32 %s3176_s14, 4 }
 0x25f   :  { %s427_s26 = scalar_lea.hbm %s3600_s1, %s1256_s15 }
 0x260   :  { %s2101_s9 = scalar_lea.hbm %s427_s26, 16  ;;  %p2104_p2 = scmp.lt.u32.totalorder %s427_s26, %s3600_s1 }
 0x261   :  { %p2102_p1 = scmp.ne.s32.totalorder %s427_s26, %s2101_s9  ;;  %p2105_p3 = scmp.lt.u32.totalorder %s2791_s10, %s2101_s9 }
 0x262   :  { %p2107_p5 = scmp.lt.u32.totalorder %s2101_s9, %s427_s26 }
 0x263   :  { %p2106_p4 = por %p2105_p3, %p2104_p2 }
 0x265   :  { %p2108_p6 = por %p2107_p5, %p2106_p4 }
 0x267   :  { %p2109_p7 = pnand %p2108_p6, %p2102_p1 }
 0x269   :  { %2112 = shalt.err (!%p2109_p7)  }
 0x26a   :  { %s2113_s0 = scalar_lea.vmem %s437_s27, 16  ;;  %p2118_p9 = scmp.lt.s32.totalorder %s437_s27, %s2770_s18 }
 0x26b   :  { %p2114_p8 = scmp.ne.s32.totalorder %s437_s27, %s2113_s0  ;;  %p2119_p10 = scmp.lt.s32.totalorder %s2800_s13, %s2113_s0 }
 0x26d   :  { %p2120_p11 = por %p2119_p10, %p2118_p9 }
 0x26f   :  { %p2121_p12 = pnand %p2120_p11, %p2114_p8 }
 0x271   :  { %2124 = shalt.err (!%p2121_p12)  }
 0x272   :  { %439 = dma.hbm_to_vmem [thread:$0]  %s427_s26, 16, %s437_s27, [#allocation3] }
 0x273   :  { %s1258_s25 = sshll.u32 %s3191_s29, 4  ;;  %s2691_s20 = smov [#allocation2 + $0x1c]  }
 0x274   :  { %s466_s14 = sshll.u32 %s2691_s20, 4  ;;  %s442_s22 = scalar_lea.hbm %s3600_s1, %s1258_s25  ;;  %s3211_s14 = int_to_ptr.vmem [resolvable:$true] %s466_s14 }
 0x275   :  { %s2125_s23 = scalar_lea.hbm %s442_s22, 16  ;;  %p2128_p0 = scmp.lt.u32.totalorder %s442_s22, %s3600_s1 }
 0x276   :  { %p2126_p13 = scmp.ne.s32.totalorder %s442_s22, %s2125_s23  ;;  %p2129_p1 = scmp.lt.u32.totalorder %s2791_s10, %s2125_s23 }
 0x277   :  { %p2131_p3 = scmp.lt.u32.totalorder %s2125_s23, %s442_s22 }
 0x278   :  { %p2130_p2 = por %p2129_p1, %p2128_p0 }
 0x27a   :  { %p2132_p4 = por %p2131_p3, %p2130_p2 }
 0x27c   :  { %p2133_p5 = pnand %p2132_p4, %p2126_p13 }
 0x27e   :  { %2136 = shalt.err (!%p2133_p5)  }
 0x27f   :  { %s2137_s17 = scalar_lea.vmem %s3196_s30, 16  ;;  %p2142_p7 = scmp.lt.s32.totalorder %s3196_s30, %s2770_s18 }
 0x280   :  { %p2138_p6 = scmp.ne.s32.totalorder %s3196_s30, %s2137_s17  ;;  %p2143_p8 = scmp.lt.s32.totalorder %s2800_s13, %s2137_s17 }
 0x282   :  { %p2144_p9 = por %p2143_p8, %p2142_p7 }
 0x284   :  { %p2145_p10 = pnand %p2144_p9, %p2138_p6 }
 0x286   :  { %2148 = shalt.err (!%p2145_p10)  }
 0x287   :  { %454 = dma.hbm_to_vmem [thread:$0]  %s442_s22, 16, %s3196_s30, [#allocation3] }
 0x288   :  { %s1260_s11 = sshll.u32 %s3193_s3, 4  ;;  %s3224_s27 = sld [smem:[#allocation5 + $0x1d]] }
 0x289   :  { %s457_s15 = scalar_lea.hbm %s3600_s1, %s1260_s11 }
 0x28a   :  { %s2149_s21 = scalar_lea.hbm %s457_s15, 16  ;;  %p2152_p12 = scmp.lt.u32.totalorder %s457_s15, %s3600_s1 }
 0x28b   :  { %p2150_p11 = scmp.ne.s32.totalorder %s457_s15, %s2149_s21  ;;  %p2153_p13 = scmp.lt.u32.totalorder %s2791_s10, %s2149_s21 }
 0x28c   :  { %p2155_p1 = scmp.lt.u32.totalorder %s2149_s21, %s457_s15 }
 0x28d   :  { %p2154_p0 = por %p2153_p13, %p2152_p12 }
 0x28f   :  { %p2156_p2 = por %p2155_p1, %p2154_p0 }
 0x291   :  { %p2157_p3 = pnand %p2156_p2, %p2150_p11 }
 0x293   :  { %2160 = shalt.err (!%p2157_p3)  }
 0x294   :  { %s2161_s30 = scalar_lea.vmem %s3211_s14, 16  ;;  %p2166_p5 = scmp.lt.s32.totalorder %s3211_s14, %s2770_s18 }
 0x295   :  { %p2162_p4 = scmp.ne.s32.totalorder %s3211_s14, %s2161_s30  ;;  %p2167_p6 = scmp.lt.s32.totalorder %s2800_s13, %s2161_s30 }
 0x297   :  { %p2168_p7 = por %p2167_p6, %p2166_p5 }
 0x299   :  { %p2169_p8 = pnand %p2168_p7, %p2162_p4 }
 0x29b   :  { %2172 = shalt.err (!%p2169_p8)  }
 0x29c   :  { %469 = dma.hbm_to_vmem [thread:$0]  %s457_s15, 16, %s3211_s14, [#allocation3] }
 0x29d   :  { %s2692_s3 = smov [#allocation2 + $0x1d]   ;;  %s3239_s6 = sld [smem:[#allocation5 + $0x1e]] }
 0x29e   :  { %s481_s9 = sshll.u32 %s2692_s3, 4  ;;  %s2693_s7 = smov [#allocation2 + $0x1e]   ;;  %s482_s9 = int_to_ptr.vmem [resolvable:$true] %s481_s9 }
 0x29f   :  { %s496_s0 = sshll.u32 %s2693_s7, 4  ;;  %s3241_s25 = sld [smem:[#allocation5 + $0x1f]]  ;;  %s3244_s0 = int_to_ptr.vmem [resolvable:$true] %s496_s0 }
 0x2a0   :  { %s1262_s20 = sshll.u32 %s3224_s27, 4 }
 0x2a1   :  { %s472_s22 = scalar_lea.hbm %s3600_s1, %s1262_s20 }
 0x2a2   :  { %s2173_s23 = scalar_lea.hbm %s472_s22, 16  ;;  %p2176_p10 = scmp.lt.u32.totalorder %s472_s22, %s3600_s1 }
 0x2a3   :  { %p2174_p9 = scmp.ne.s32.totalorder %s472_s22, %s2173_s23  ;;  %p2177_p11 = scmp.lt.u32.totalorder %s2791_s10, %s2173_s23 }
 0x2a4   :  { %p2179_p13 = scmp.lt.u32.totalorder %s2173_s23, %s472_s22 }
 0x2a5   :  { %p2178_p12 = por %p2177_p11, %p2176_p10 }
 0x2a7   :  { %p2180_p0 = por %p2179_p13, %p2178_p12 }
 0x2a9   :  { %p2181_p1 = pnand %p2180_p0, %p2174_p9 }
 0x2ab   :  { %2184 = shalt.err (!%p2181_p1)  }
 0x2ac   :  { %s2185_s16 = scalar_lea.vmem %s482_s9, 16  ;;  %p2190_p3 = scmp.lt.s32.totalorder %s482_s9, %s2770_s18 }
 0x2ad   :  { %p2186_p2 = scmp.ne.s32.totalorder %s482_s9, %s2185_s16  ;;  %p2191_p4 = scmp.lt.s32.totalorder %s2800_s13, %s2185_s16 }
 0x2af   :  { %p2192_p5 = por %p2191_p4, %p2190_p3 }
 0x2b1   :  { %p2193_p6 = pnand %p2192_p5, %p2186_p2 }
 0x2b3   :  { %2196 = shalt.err (!%p2193_p6)  }
 0x2b4   :  { %484 = dma.hbm_to_vmem [thread:$0]  %s472_s22, 16, %s482_s9, [#allocation3] }
 0x2b5   :  { %s1264_s17 = sshll.u32 %s3239_s6, 4  ;;  %s2694_s11 = smov [#allocation2 + $0x1f]  }
 0x2b6   :  { %s511_s27 = sshll.u32 %s2694_s11, 4  ;;  %s487_s15 = scalar_lea.hbm %s3600_s1, %s1264_s17  ;;  %s3259_s27 = int_to_ptr.vmem [resolvable:$true] %s511_s27 }
 0x2b7   :  { %s2197_s21 = scalar_lea.hbm %s487_s15, 16  ;;  %p2200_p8 = scmp.lt.u32.totalorder %s487_s15, %s3600_s1 }
 0x2b8   :  { %p2198_p7 = scmp.ne.s32.totalorder %s487_s15, %s2197_s21  ;;  %p2201_p9 = scmp.lt.u32.totalorder %s2791_s10, %s2197_s21 }
 0x2b9   :  { %p2203_p11 = scmp.lt.u32.totalorder %s2197_s21, %s487_s15 }
 0x2ba   :  { %p2202_p10 = por %p2201_p9, %p2200_p8 }
 0x2bc   :  { %p2204_p12 = por %p2203_p11, %p2202_p10 }
 0x2be   :  { %p2205_p13 = pnand %p2204_p12, %p2198_p7 }
 0x2c0   :  { %2208 = shalt.err (!%p2205_p13)  }
 0x2c1   :  { %s2209_s30 = scalar_lea.vmem %s3244_s0, 16  ;;  %p2214_p1 = scmp.lt.s32.totalorder %s3244_s0, %s2770_s18 }
 0x2c2   :  { %p2210_p0 = scmp.ne.s32.totalorder %s3244_s0, %s2209_s30  ;;  %p2215_p2 = scmp.lt.s32.totalorder %s2800_s13, %s2209_s30 }
 0x2c4   :  { %p2216_p3 = por %p2215_p2, %p2214_p1 }
 0x2c6   :  { %p2217_p4 = pnand %p2216_p3, %p2210_p0 }
 0x2c8   :  { %2220 = shalt.err (!%p2217_p4)  }
 0x2c9   :  { %499 = dma.hbm_to_vmem [thread:$0]  %s487_s15, 16, %s3244_s0, [#allocation3] }
 0x2ca   :  { %s1266_s3 = sshll.u32 %s3241_s25, 4  ;;  %s3272_s9 = sld [smem:[#allocation5 + $0x20]] }
 0x2cb   :  { %s502_s20 = scalar_lea.hbm %s3600_s1, %s1266_s3 }
 0x2cc   :  { %s2221_s24 = scalar_lea.hbm %s502_s20, 16  ;;  %p2224_p6 = scmp.lt.u32.totalorder %s502_s20, %s3600_s1 }
 0x2cd   :  { %p2222_p5 = scmp.ne.s32.totalorder %s502_s20, %s2221_s24  ;;  %p2225_p7 = scmp.lt.u32.totalorder %s2791_s10, %s2221_s24 }
 0x2ce   :  { %p2227_p9 = scmp.lt.u32.totalorder %s2221_s24, %s502_s20 }
 0x2cf   :  { %p2226_p8 = por %p2225_p7, %p2224_p6 }
 0x2d1   :  { %p2228_p10 = por %p2227_p9, %p2226_p8 }
 0x2d3   :  { %p2229_p11 = pnand %p2228_p10, %p2222_p5 }
 0x2d5   :  { %2232 = shalt.err (!%p2229_p11)  }
 0x2d6   :  { %s2233_s0 = scalar_lea.vmem %s3259_s27, 16  ;;  %p2238_p13 = scmp.lt.s32.totalorder %s3259_s27, %s2770_s18 }
 0x2d7   :  { %p2234_p12 = scmp.ne.s32.totalorder %s3259_s27, %s2233_s0  ;;  %p2239_p0 = scmp.lt.s32.totalorder %s2800_s13, %s2233_s0 }
 0x2d9   :  { %p2240_p1 = por %p2239_p0, %p2238_p13 }
 0x2db   :  { %p2241_p2 = pnand %p2240_p1, %p2234_p12 }
 0x2dd   :  { %2244 = shalt.err (!%p2241_p2)  }
 0x2de   :  { %514 = dma.hbm_to_vmem [thread:$0]  %s502_s20, 16, %s3259_s27, [#allocation3] }
 0x2df   :  { %s2695_s25 = smov [#allocation2 + $0x20]   ;;  %s3287_s12 = sld [smem:[#allocation5 + $0x21]] }
 0x2e0   :  { %s526_s23 = sshll.u32 %s2695_s25, 4  ;;  %s2696_s14 = smov [#allocation2 + $0x21]   ;;  %s527_s23 = int_to_ptr.vmem [resolvable:$true] %s526_s23 }
 0x2e1   :  { %s541_s16 = sshll.u32 %s2696_s14, 4  ;;  %s3289_s17 = sld [smem:[#allocation5 + $0x22]]  ;;  %s3292_s16 = int_to_ptr.vmem [resolvable:$true] %s541_s16 }
 0x2e2   :  { %s1268_s11 = sshll.u32 %s3272_s9, 4 }
 0x2e3   :  { %s517_s15 = scalar_lea.hbm %s3600_s1, %s1268_s11 }
 0x2e4   :  { %s2245_s21 = scalar_lea.hbm %s517_s15, 16  ;;  %p2248_p4 = scmp.lt.u32.totalorder %s517_s15, %s3600_s1 }
 0x2e5   :  { %p2246_p3 = scmp.ne.s32.totalorder %s517_s15, %s2245_s21  ;;  %p2249_p5 = scmp.lt.u32.totalorder %s2791_s10, %s2245_s21 }
 0x2e6   :  { %p2251_p7 = scmp.lt.u32.totalorder %s2245_s21, %s517_s15 }
 0x2e7   :  { %p2250_p6 = por %p2249_p5, %p2248_p4 }
 0x2e9   :  { %p2252_p8 = por %p2251_p7, %p2250_p6 }
 0x2eb   :  { %p2253_p9 = pnand %p2252_p8, %p2246_p3 }
 0x2ed   :  { %2256 = shalt.err (!%p2253_p9)  }
 0x2ee   :  { %s2257_s26 = scalar_lea.vmem %s527_s23, 16  ;;  %p2262_p11 = scmp.lt.s32.totalorder %s527_s23, %s2770_s18 }
 0x2ef   :  { %p2258_p10 = scmp.ne.s32.totalorder %s527_s23, %s2257_s26  ;;  %p2263_p12 = scmp.lt.s32.totalorder %s2800_s13, %s2257_s26 }
 0x2f1   :  { %p2264_p13 = por %p2263_p12, %p2262_p11 }
 0x2f3   :  { %p2265_p0 = pnand %p2264_p13, %p2258_p10 }
 0x2f5   :  { %2268 = shalt.err (!%p2265_p0)  }
 0x2f6   :  { %529 = dma.hbm_to_vmem [thread:$0]  %s517_s15, 16, %s527_s23, [#allocation3] }
 0x2f7   :  { %s1270_s30 = sshll.u32 %s3287_s12, 4  ;;  %s2697_s3 = smov [#allocation2 + $0x22]  }
 0x2f8   :  { %s556_s9 = sshll.u32 %s2697_s3, 4  ;;  %s532_s20 = scalar_lea.hbm %s3600_s1, %s1270_s30  ;;  %s3307_s9 = int_to_ptr.vmem [resolvable:$true] %s556_s9 }
 0x2f9   :  { %s2269_s24 = scalar_lea.hbm %s532_s20, 16  ;;  %p2272_p2 = scmp.lt.u32.totalorder %s532_s20, %s3600_s1 }
 0x2fa   :  { %p2270_p1 = scmp.ne.s32.totalorder %s532_s20, %s2269_s24  ;;  %p2273_p3 = scmp.lt.u32.totalorder %s2791_s10, %s2269_s24 }
 0x2fb   :  { %p2275_p5 = scmp.lt.u32.totalorder %s2269_s24, %s532_s20 }
 0x2fc   :  { %p2274_p4 = por %p2273_p3, %p2272_p2 }
 0x2fe   :  { %p2276_p6 = por %p2275_p5, %p2274_p4 }
 0x300   :  { %p2277_p7 = pnand %p2276_p6, %p2270_p1 }
 0x302   :  { %2280 = shalt.err (!%p2277_p7)  }
 0x303   :  { %s2281_s0 = scalar_lea.vmem %s3292_s16, 16  ;;  %p2286_p9 = scmp.lt.s32.totalorder %s3292_s16, %s2770_s18 }
 0x304   :  { %p2282_p8 = scmp.ne.s32.totalorder %s3292_s16, %s2281_s0  ;;  %p2287_p10 = scmp.lt.s32.totalorder %s2800_s13, %s2281_s0 }
 0x306   :  { %p2288_p11 = por %p2287_p10, %p2286_p9 }
 0x308   :  { %p2289_p12 = pnand %p2288_p11, %p2282_p8 }
 0x30a   :  { %2292 = shalt.err (!%p2289_p12)  }
 0x30b   :  { %544 = dma.hbm_to_vmem [thread:$0]  %s532_s20, 16, %s3292_s16, [#allocation3] }
 0x30c   :  { %s1272_s25 = sshll.u32 %s3289_s17, 4  ;;  %s3320_s23 = sld [smem:[#allocation5 + $0x23]] }
 0x30d   :  { %s547_s11 = scalar_lea.hbm %s3600_s1, %s1272_s25 }
 0x30e   :  { %s2293_s29 = scalar_lea.hbm %s547_s11, 16  ;;  %p2296_p0 = scmp.lt.u32.totalorder %s547_s11, %s3600_s1 }
 0x30f   :  { %p2294_p13 = scmp.ne.s32.totalorder %s547_s11, %s2293_s29  ;;  %p2297_p1 = scmp.lt.u32.totalorder %s2791_s10, %s2293_s29 }
 0x310   :  { %p2299_p3 = scmp.lt.u32.totalorder %s2293_s29, %s547_s11 }
 0x311   :  { %p2298_p2 = por %p2297_p1, %p2296_p0 }
 0x313   :  { %p2300_p4 = por %p2299_p3, %p2298_p2 }
 0x315   :  { %p2301_p5 = pnand %p2300_p4, %p2294_p13 }
 0x317   :  { %2304 = shalt.err (!%p2301_p5)  }
 0x318   :  { %s2305_s16 = scalar_lea.vmem %s3307_s9, 16  ;;  %p2310_p7 = scmp.lt.s32.totalorder %s3307_s9, %s2770_s18 }
 0x319   :  { %p2306_p6 = scmp.ne.s32.totalorder %s3307_s9, %s2305_s16  ;;  %p2311_p8 = scmp.lt.s32.totalorder %s2800_s13, %s2305_s16 }
 0x31b   :  { %p2312_p9 = por %p2311_p8, %p2310_p7 }
 0x31d   :  { %p2313_p10 = pnand %p2312_p9, %p2306_p6 }
 0x31f   :  { %2316 = shalt.err (!%p2313_p10)  }
 0x320   :  { %559 = dma.hbm_to_vmem [thread:$0]  %s547_s11, 16, %s3307_s9, [#allocation3] }
 0x321   :  { %s2698_s17 = smov [#allocation2 + $0x23]   ;;  %s3335_s28 = sld [smem:[#allocation5 + $0x24]] }
 0x322   :  { %s571_s21 = sshll.u32 %s2698_s17, 4  ;;  %s2699_s27 = smov [#allocation2 + $0x24]   ;;  %s572_s21 = int_to_ptr.vmem [resolvable:$true] %s571_s21 }
 0x323   :  { %s586_s26 = sshll.u32 %s2699_s27, 4  ;;  %s3337_s30 = sld [smem:[#allocation5 + $0x25]]  ;;  %s3340_s26 = int_to_ptr.vmem [resolvable:$true] %s586_s26 }
 0x324   :  { %s1274_s3 = sshll.u32 %s3320_s23, 4 }
 0x325   :  { %s562_s20 = scalar_lea.hbm %s3600_s1, %s1274_s3 }
 0x326   :  { %s2317_s24 = scalar_lea.hbm %s562_s20, 16  ;;  %p2320_p12 = scmp.lt.u32.totalorder %s562_s20, %s3600_s1 }
 0x327   :  { %p2318_p11 = scmp.ne.s32.totalorder %s562_s20, %s2317_s24  ;;  %p2321_p13 = scmp.lt.u32.totalorder %s2791_s10, %s2317_s24 }
 0x328   :  { %p2323_p1 = scmp.lt.u32.totalorder %s2317_s24, %s562_s20 }
 0x329   :  { %p2322_p0 = por %p2321_p13, %p2320_p12 }
 0x32b   :  { %p2324_p2 = por %p2323_p1, %p2322_p0 }
 0x32d   :  { %p2325_p3 = pnand %p2324_p2, %p2318_p11 }
 0x32f   :  { %2328 = shalt.err (!%p2325_p3)  }
 0x330   :  { %s2329_s22 = scalar_lea.vmem %s572_s21, 16  ;;  %p2334_p5 = scmp.lt.s32.totalorder %s572_s21, %s2770_s18 }
 0x331   :  { %p2330_p4 = scmp.ne.s32.totalorder %s572_s21, %s2329_s22  ;;  %p2335_p6 = scmp.lt.s32.totalorder %s2800_s13, %s2329_s22 }
 0x333   :  { %p2336_p7 = por %p2335_p6, %p2334_p5 }
 0x335   :  { %p2337_p8 = pnand %p2336_p7, %p2330_p4 }
 0x337   :  { %2340 = shalt.err (!%p2337_p8)  }
 0x338   :  { %574 = dma.hbm_to_vmem [thread:$0]  %s562_s20, 16, %s572_s21, [#allocation3] }
 0x339   :  { %s1276_s0 = sshll.u32 %s3335_s28, 4  ;;  %s2700_s25 = smov [#allocation2 + $0x25]  }
 0x33a   :  { %s601_s23 = sshll.u32 %s2700_s25, 4  ;;  %s577_s11 = scalar_lea.hbm %s3600_s1, %s1276_s0  ;;  %s3355_s23 = int_to_ptr.vmem [resolvable:$true] %s601_s23 }
 0x33b   :  { %s2341_s29 = scalar_lea.hbm %s577_s11, 16  ;;  %p2344_p10 = scmp.lt.u32.totalorder %s577_s11, %s3600_s1 }
 0x33c   :  { %p2342_p9 = scmp.ne.s32.totalorder %s577_s11, %s2341_s29  ;;  %p2345_p11 = scmp.lt.u32.totalorder %s2791_s10, %s2341_s29 }
 0x33d   :  { %p2347_p13 = scmp.lt.u32.totalorder %s2341_s29, %s577_s11 }
 0x33e   :  { %p2346_p12 = por %p2345_p11, %p2344_p10 }
 0x340   :  { %p2348_p0 = por %p2347_p13, %p2346_p12 }
 0x342   :  { %p2349_p1 = pnand %p2348_p0, %p2342_p9 }
 0x344   :  { %2352 = shalt.err (!%p2349_p1)  }
 0x345   :  { %s2353_s16 = scalar_lea.vmem %s3340_s26, 16  ;;  %p2358_p3 = scmp.lt.s32.totalorder %s3340_s26, %s2770_s18 }
 0x346   :  { %p2354_p2 = scmp.ne.s32.totalorder %s3340_s26, %s2353_s16  ;;  %p2359_p4 = scmp.lt.s32.totalorder %s2800_s13, %s2353_s16 }
 0x348   :  { %p2360_p5 = por %p2359_p4, %p2358_p3 }
 0x34a   :  { %p2361_p6 = pnand %p2360_p5, %p2354_p2 }
 0x34c   :  { %2364 = shalt.err (!%p2361_p6)  }
 0x34d   :  { %589 = dma.hbm_to_vmem [thread:$0]  %s577_s11, 16, %s3340_s26, [#allocation3] }
 0x34e   :  { %s1278_s17 = sshll.u32 %s3337_s30, 4  ;;  %s3368_s21 = sld [smem:[#allocation5 + $0x26]] }
 0x34f   :  { %s592_s3 = scalar_lea.hbm %s3600_s1, %s1278_s17 }
 0x350   :  { %s2365_s6 = scalar_lea.hbm %s592_s3, 16  ;;  %p2368_p8 = scmp.lt.u32.totalorder %s592_s3, %s3600_s1 }
 0x351   :  { %p2366_p7 = scmp.ne.s32.totalorder %s592_s3, %s2365_s6  ;;  %p2369_p9 = scmp.lt.u32.totalorder %s2791_s10, %s2365_s6 }
 0x352   :  { %p2371_p11 = scmp.lt.u32.totalorder %s2365_s6, %s592_s3 }
 0x353   :  { %p2370_p10 = por %p2369_p9, %p2368_p8 }
 0x355   :  { %p2372_p12 = por %p2371_p11, %p2370_p10 }
 0x357   :  { %p2373_p13 = pnand %p2372_p12, %p2366_p7 }
 0x359   :  { %2376 = shalt.err (!%p2373_p13)  }
 0x35a   :  { %s2377_s26 = scalar_lea.vmem %s3355_s23, 16  ;;  %p2382_p1 = scmp.lt.s32.totalorder %s3355_s23, %s2770_s18 }
 0x35b   :  { %p2378_p0 = scmp.ne.s32.totalorder %s3355_s23, %s2377_s26  ;;  %p2383_p2 = scmp.lt.s32.totalorder %s2800_s13, %s2377_s26 }
 0x35d   :  { %p2384_p3 = por %p2383_p2, %p2382_p1 }
 0x35f   :  { %p2385_p4 = pnand %p2384_p3, %p2378_p0 }
 0x361   :  { %2388 = shalt.err (!%p2385_p4)  }
 0x362   :  { %604 = dma.hbm_to_vmem [thread:$0]  %s592_s3, 16, %s3355_s23, [#allocation3] }
 0x363   :  { %s2701_s30 = smov [#allocation2 + $0x26]   ;;  %s3383_s8 = sld [smem:[#allocation5 + $0x27]] }
 0x364   :  { %s616_s24 = sshll.u32 %s2701_s30, 4  ;;  %s2702_s9 = smov [#allocation2 + $0x27]   ;;  %s617_s24 = int_to_ptr.vmem [resolvable:$true] %s616_s24 }
 0x365   :  { %s631_s22 = sshll.u32 %s2702_s9, 4  ;;  %s3385_s0 = sld [smem:[#allocation5 + $0x28]]  ;;  %s3388_s22 = int_to_ptr.vmem [resolvable:$true] %s631_s22 }
 0x366   :  { %s1280_s25 = sshll.u32 %s3368_s21, 4 }
 0x367   :  { %s607_s11 = scalar_lea.hbm %s3600_s1, %s1280_s25 }
 0x368   :  { %s2389_s29 = scalar_lea.hbm %s607_s11, 16  ;;  %p2392_p6 = scmp.lt.u32.totalorder %s607_s11, %s3600_s1 }
 0x369   :  { %p2390_p5 = scmp.ne.s32.totalorder %s607_s11, %s2389_s29  ;;  %p2393_p7 = scmp.lt.u32.totalorder %s2791_s10, %s2389_s29 }
 0x36a   :  { %p2395_p9 = scmp.lt.u32.totalorder %s2389_s29, %s607_s11 }
 0x36b   :  { %p2394_p8 = por %p2393_p7, %p2392_p6 }
 0x36d   :  { %p2396_p10 = por %p2395_p9, %p2394_p8 }
 0x36f   :  { %p2397_p11 = pnand %p2396_p10, %p2390_p5 }
 0x371   :  { %2400 = shalt.err (!%p2397_p11)  }
 0x372   :  { %s2401_s15 = scalar_lea.vmem %s617_s24, 16  ;;  %p2406_p13 = scmp.lt.s32.totalorder %s617_s24, %s2770_s18 }
 0x373   :  { %p2402_p12 = scmp.ne.s32.totalorder %s617_s24, %s2401_s15  ;;  %p2407_p0 = scmp.lt.s32.totalorder %s2800_s13, %s2401_s15 }
 0x375   :  { %p2408_p1 = por %p2407_p0, %p2406_p13 }
 0x377   :  { %p2409_p2 = pnand %p2408_p1, %p2402_p12 }
 0x379   :  { %2412 = shalt.err (!%p2409_p2)  }
 0x37a   :  { %619 = dma.hbm_to_vmem [thread:$0]  %s607_s11, 16, %s617_s24, [#allocation3] }
 0x37b   :  { %s1282_s16 = sshll.u32 %s3383_s8, 4  ;;  %s2703_s17 = smov [#allocation2 + $0x28]  }
 0x37c   :  { %s646_s21 = sshll.u32 %s2703_s17, 4  ;;  %s622_s3 = scalar_lea.hbm %s3600_s1, %s1282_s16  ;;  %s3403_s21 = int_to_ptr.vmem [resolvable:$true] %s646_s21 }
 0x37d   :  { %s2413_s6 = scalar_lea.hbm %s622_s3, 16  ;;  %p2416_p4 = scmp.lt.u32.totalorder %s622_s3, %s3600_s1 }
 0x37e   :  { %p2414_p3 = scmp.ne.s32.totalorder %s622_s3, %s2413_s6  ;;  %p2417_p5 = scmp.lt.u32.totalorder %s2791_s10, %s2413_s6 }
 0x37f   :  { %p2419_p7 = scmp.lt.u32.totalorder %s2413_s6, %s622_s3 }
 0x380   :  { %p2418_p6 = por %p2417_p5, %p2416_p4 }
 0x382   :  { %p2420_p8 = por %p2419_p7, %p2418_p6 }
 0x384   :  { %p2421_p9 = pnand %p2420_p8, %p2414_p3 }
 0x386   :  { %2424 = shalt.err (!%p2421_p9)  }
 0x387   :  { %s2425_s26 = scalar_lea.vmem %s3388_s22, 16  ;;  %p2430_p11 = scmp.lt.s32.totalorder %s3388_s22, %s2770_s18 }
 0x388   :  { %p2426_p10 = scmp.ne.s32.totalorder %s3388_s22, %s2425_s26  ;;  %p2431_p12 = scmp.lt.s32.totalorder %s2800_s13, %s2425_s26 }
 0x38a   :  { %p2432_p13 = por %p2431_p12, %p2430_p11 }
 0x38c   :  { %p2433_p0 = pnand %p2432_p13, %p2426_p10 }
 0x38e   :  { %2436 = shalt.err (!%p2433_p0)  }
 0x38f   :  { %634 = dma.hbm_to_vmem [thread:$0]  %s622_s3, 16, %s3388_s22, [#allocation3] }
 0x390   :  { %s1284_s30 = sshll.u32 %s3385_s0, 4  ;;  %s3416_s24 = sld [smem:[#allocation5 + $0x29]] }
 0x391   :  { %s637_s25 = scalar_lea.hbm %s3600_s1, %s1284_s30 }
 0x392   :  { %s2437_s12 = scalar_lea.hbm %s637_s25, 16  ;;  %p2440_p2 = scmp.lt.u32.totalorder %s637_s25, %s3600_s1 }
 0x393   :  { %p2438_p1 = scmp.ne.s32.totalorder %s637_s25, %s2437_s12  ;;  %p2441_p3 = scmp.lt.u32.totalorder %s2791_s10, %s2437_s12 }
 0x394   :  { %p2443_p5 = scmp.lt.u32.totalorder %s2437_s12, %s637_s25 }
 0x395   :  { %p2442_p4 = por %p2441_p3, %p2440_p2 }
 0x397   :  { %p2444_p6 = por %p2443_p5, %p2442_p4 }
 0x399   :  { %p2445_p7 = pnand %p2444_p6, %p2438_p1 }
 0x39b   :  { %2448 = shalt.err (!%p2445_p7)  }
 0x39c   :  { %s2449_s22 = scalar_lea.vmem %s3403_s21, 16  ;;  %p2454_p9 = scmp.lt.s32.totalorder %s3403_s21, %s2770_s18 }
 0x39d   :  { %p2450_p8 = scmp.ne.s32.totalorder %s3403_s21, %s2449_s22  ;;  %p2455_p10 = scmp.lt.s32.totalorder %s2800_s13, %s2449_s22 }
 0x39f   :  { %p2456_p11 = por %p2455_p10, %p2454_p9 }
 0x3a1   :  { %p2457_p12 = pnand %p2456_p11, %p2450_p8 }
 0x3a3   :  { %2460 = shalt.err (!%p2457_p12)  }
 0x3a4   :  { %649 = dma.hbm_to_vmem [thread:$0]  %s637_s25, 16, %s3403_s21, [#allocation3] }
 0x3a5   :  { %s2704_s0 = smov [#allocation2 + $0x29]   ;;  %s3431_s19 = sld [smem:[#allocation5 + $0x2a]] }
 0x3a6   :  { %s661_s29 = sshll.u32 %s2704_s0, 4  ;;  %s2705_s23 = smov [#allocation2 + $0x2a]   ;;  %s662_s29 = int_to_ptr.vmem [resolvable:$true] %s661_s29 }
 0x3a7   :  { %s676_s15 = sshll.u32 %s2705_s23, 4  ;;  %s3433_s16 = sld [smem:[#allocation5 + $0x2b]]  ;;  %s3436_s15 = int_to_ptr.vmem [resolvable:$true] %s676_s15 }
 0x3a8   :  { %s1286_s17 = sshll.u32 %s3416_s24, 4 }
 0x3a9   :  { %s652_s3 = scalar_lea.hbm %s3600_s1, %s1286_s17 }
 0x3aa   :  { %s2461_s6 = scalar_lea.hbm %s652_s3, 16  ;;  %p2464_p0 = scmp.lt.u32.totalorder %s652_s3, %s3600_s1 }
 0x3ab   :  { %p2462_p13 = scmp.ne.s32.totalorder %s652_s3, %s2461_s6  ;;  %p2465_p1 = scmp.lt.u32.totalorder %s2791_s10, %s2461_s6 }
 0x3ac   :  { %p2467_p3 = scmp.lt.u32.totalorder %s2461_s6, %s652_s3 }
 0x3ad   :  { %p2466_p2 = por %p2465_p1, %p2464_p0 }
 0x3af   :  { %p2468_p4 = por %p2467_p3, %p2466_p2 }
 0x3b1   :  { %p2469_p5 = pnand %p2468_p4, %p2462_p13 }
 0x3b3   :  { %2472 = shalt.err (!%p2469_p5)  }
 0x3b4   :  { %s2473_s20 = scalar_lea.vmem %s662_s29, 16  ;;  %p2478_p7 = scmp.lt.s32.totalorder %s662_s29, %s2770_s18 }
 0x3b5   :  { %p2474_p6 = scmp.ne.s32.totalorder %s662_s29, %s2473_s20  ;;  %p2479_p8 = scmp.lt.s32.totalorder %s2800_s13, %s2473_s20 }
 0x3b7   :  { %p2480_p9 = por %p2479_p8, %p2478_p7 }
 0x3b9   :  { %p2481_p10 = pnand %p2480_p9, %p2474_p6 }
 0x3bb   :  { %2484 = shalt.err (!%p2481_p10)  }
 0x3bc   :  { %664 = dma.hbm_to_vmem [thread:$0]  %s652_s3, 16, %s662_s29, [#allocation3] }
 0x3bd   :  { %s1288_s26 = sshll.u32 %s3431_s19, 4  ;;  %s2706_s30 = smov [#allocation2 + $0x2b]  }
 0x3be   :  { %s691_s24 = sshll.u32 %s2706_s30, 4  ;;  %s667_s25 = scalar_lea.hbm %s3600_s1, %s1288_s26  ;;  %s3451_s24 = int_to_ptr.vmem [resolvable:$true] %s691_s24 }
 0x3bf   :  { %s2485_s12 = scalar_lea.hbm %s667_s25, 16  ;;  %p2488_p12 = scmp.lt.u32.totalorder %s667_s25, %s3600_s1 }
 0x3c0   :  { %p2486_p11 = scmp.ne.s32.totalorder %s667_s25, %s2485_s12  ;;  %p2489_p13 = scmp.lt.u32.totalorder %s2791_s10, %s2485_s12 }
 0x3c1   :  { %p2491_p1 = scmp.lt.u32.totalorder %s2485_s12, %s667_s25 }
 0x3c2   :  { %p2490_p0 = por %p2489_p13, %p2488_p12 }
 0x3c4   :  { %p2492_p2 = por %p2491_p1, %p2490_p0 }
 0x3c6   :  { %p2493_p3 = pnand %p2492_p2, %p2486_p11 }
 0x3c8   :  { %2496 = shalt.err (!%p2493_p3)  }
 0x3c9   :  { %s2497_s22 = scalar_lea.vmem %s3436_s15, 16  ;;  %p2502_p5 = scmp.lt.s32.totalorder %s3436_s15, %s2770_s18 }
 0x3ca   :  { %p2498_p4 = scmp.ne.s32.totalorder %s3436_s15, %s2497_s22  ;;  %p2503_p6 = scmp.lt.s32.totalorder %s2800_s13, %s2497_s22 }
 0x3cc   :  { %p2504_p7 = por %p2503_p6, %p2502_p5 }
 0x3ce   :  { %p2505_p8 = pnand %p2504_p7, %p2498_p4 }
 0x3d0   :  { %2508 = shalt.err (!%p2505_p8)  }
 0x3d1   :  { %679 = dma.hbm_to_vmem [thread:$0]  %s667_s25, 16, %s3436_s15, [#allocation3] }
 0x3d2   :  { %s1290_s0 = sshll.u32 %s3433_s16, 4  ;;  %s3464_s29 = sld [smem:[#allocation5 + $0x2c]] }
 0x3d3   :  { %s682_s17 = scalar_lea.hbm %s3600_s1, %s1290_s0 }
 0x3d4   :  { %s2509_s28 = scalar_lea.hbm %s682_s17, 16  ;;  %p2512_p10 = scmp.lt.u32.totalorder %s682_s17, %s3600_s1 }
 0x3d5   :  { %p2510_p9 = scmp.ne.s32.totalorder %s682_s17, %s2509_s28  ;;  %p2513_p11 = scmp.lt.u32.totalorder %s2791_s10, %s2509_s28 }
 0x3d6   :  { %p2515_p13 = scmp.lt.u32.totalorder %s2509_s28, %s682_s17 }
 0x3d7   :  { %p2514_p12 = por %p2513_p11, %p2512_p10 }
 0x3d9   :  { %p2516_p0 = por %p2515_p13, %p2514_p12 }
 0x3db   :  { %p2517_p1 = pnand %p2516_p0, %p2510_p9 }
 0x3dd   :  { %2520 = shalt.err (!%p2517_p1)  }
 0x3de   :  { %s2521_s15 = scalar_lea.vmem %s3451_s24, 16  ;;  %p2526_p3 = scmp.lt.s32.totalorder %s3451_s24, %s2770_s18 }
 0x3df   :  { %p2522_p2 = scmp.ne.s32.totalorder %s3451_s24, %s2521_s15  ;;  %p2527_p4 = scmp.lt.s32.totalorder %s2800_s13, %s2521_s15 }
 0x3e1   :  { %p2528_p5 = por %p2527_p4, %p2526_p3 }
 0x3e3   :  { %p2529_p6 = pnand %p2528_p5, %p2522_p2 }
 0x3e5   :  { %2532 = shalt.err (!%p2529_p6)  }
 0x3e6   :  { %694 = dma.hbm_to_vmem [thread:$0]  %s682_s17, 16, %s3451_s24, [#allocation3] }
 0x3e7   :  { %s2707_s16 = smov [#allocation2 + $0x2c]   ;;  %s3479_s7 = sld [smem:[#allocation5 + $0x2d]] }
 0x3e8   :  { %s706_s6 = sshll.u32 %s2707_s16, 4  ;;  %s2708_s21 = smov [#allocation2 + $0x2d]   ;;  %s707_s6 = int_to_ptr.vmem [resolvable:$true] %s706_s6 }
 0x3e9   :  { %s721_s20 = sshll.u32 %s2708_s21, 4  ;;  %s3481_s26 = sld [smem:[#allocation5 + $0x2e]]  ;;  %s3484_s20 = int_to_ptr.vmem [resolvable:$true] %s721_s20 }
 0x3ea   :  { %s1292_s30 = sshll.u32 %s3464_s29, 4 }
 0x3eb   :  { %s697_s25 = scalar_lea.hbm %s3600_s1, %s1292_s30 }
 0x3ec   :  { %s2533_s12 = scalar_lea.hbm %s697_s25, 16  ;;  %p2536_p8 = scmp.lt.u32.totalorder %s697_s25, %s3600_s1 }
 0x3ed   :  { %p2534_p7 = scmp.ne.s32.totalorder %s697_s25, %s2533_s12  ;;  %p2537_p9 = scmp.lt.u32.totalorder %s2791_s10, %s2533_s12 }
 0x3ee   :  { %p2539_p11 = scmp.lt.u32.totalorder %s2533_s12, %s697_s25 }
 0x3ef   :  { %p2538_p10 = por %p2537_p9, %p2536_p8 }
 0x3f1   :  { %p2540_p12 = por %p2539_p11, %p2538_p10 }
 0x3f3   :  { %p2541_p13 = pnand %p2540_p12, %p2534_p7 }
 0x3f5   :  { %2544 = shalt.err (!%p2541_p13)  }
 0x3f6   :  { %s2545_s11 = scalar_lea.vmem %s707_s6, 16  ;;  %p2550_p1 = scmp.lt.s32.totalorder %s707_s6, %s2770_s18 }
 0x3f7   :  { %p2546_p0 = scmp.ne.s32.totalorder %s707_s6, %s2545_s11  ;;  %p2551_p2 = scmp.lt.s32.totalorder %s2800_s13, %s2545_s11 }
 0x3f9   :  { %p2552_p3 = por %p2551_p2, %p2550_p1 }
 0x3fb   :  { %p2553_p4 = pnand %p2552_p3, %p2546_p0 }
 0x3fd   :  { %2556 = shalt.err (!%p2553_p4)  }
 0x3fe   :  { %709 = dma.hbm_to_vmem [thread:$0]  %s697_s25, 16, %s707_s6, [#allocation3] }
 0x3ff   :  { %s1294_s22 = sshll.u32 %s3479_s7, 4  ;;  %s2709_s0 = smov [#allocation2 + $0x2e]  }
 0x400   :  { %s736_s29 = sshll.u32 %s2709_s0, 4  ;;  %s712_s17 = scalar_lea.hbm %s3600_s1, %s1294_s22  ;;  %s3499_s29 = int_to_ptr.vmem [resolvable:$true] %s736_s29 }
 0x401   :  { %s2557_s28 = scalar_lea.hbm %s712_s17, 16  ;;  %p2560_p6 = scmp.lt.u32.totalorder %s712_s17, %s3600_s1 }
 0x402   :  { %p2558_p5 = scmp.ne.s32.totalorder %s712_s17, %s2557_s28  ;;  %p2561_p7 = scmp.lt.u32.totalorder %s2791_s10, %s2557_s28 }
 0x403   :  { %p2563_p9 = scmp.lt.u32.totalorder %s2557_s28, %s712_s17 }
 0x404   :  { %p2562_p8 = por %p2561_p7, %p2560_p6 }
 0x406   :  { %p2564_p10 = por %p2563_p9, %p2562_p8 }
 0x408   :  { %p2565_p11 = pnand %p2564_p10, %p2558_p5 }
 0x40a   :  { %2568 = shalt.err (!%p2565_p11)  }
 0x40b   :  { %s2569_s15 = scalar_lea.vmem %s3484_s20, 16  ;;  %p2574_p13 = scmp.lt.s32.totalorder %s3484_s20, %s2770_s18 }
 0x40c   :  { %p2570_p12 = scmp.ne.s32.totalorder %s3484_s20, %s2569_s15  ;;  %p2575_p0 = scmp.lt.s32.totalorder %s2800_s13, %s2569_s15 }
 0x40e   :  { %p2576_p1 = por %p2575_p0, %p2574_p13 }
 0x410   :  { %p2577_p2 = pnand %p2576_p1, %p2570_p12 }
 0x412   :  { %2580 = shalt.err (!%p2577_p2)  }
 0x413   :  { %724 = dma.hbm_to_vmem [thread:$0]  %s712_s17, 16, %s3484_s20, [#allocation3] }
 0x414   :  { %s1296_s16 = sshll.u32 %s3481_s26, 4  ;;  %s1297_s6 = sld [smem:[#allocation5 + $0x2f]] }
 0x415   :  { %s727_s30 = scalar_lea.hbm %s3600_s1, %s1296_s16 }
 0x416   :  { %s2581_s8 = scalar_lea.hbm %s727_s30, 16  ;;  %p2584_p4 = scmp.lt.u32.totalorder %s727_s30, %s3600_s1 }
 0x417   :  { %p2582_p3 = scmp.ne.s32.totalorder %s727_s30, %s2581_s8  ;;  %p2585_p5 = scmp.lt.u32.totalorder %s2791_s10, %s2581_s8 }
 0x418   :  { %p2587_p7 = scmp.lt.u32.totalorder %s2581_s8, %s727_s30 }
 0x419   :  { %p2586_p6 = por %p2585_p5, %p2584_p4 }
 0x41b   :  { %p2588_p8 = por %p2587_p7, %p2586_p6 }
 0x41d   :  { %p2589_p9 = pnand %p2588_p8, %p2582_p3 }
 0x41f   :  { %2592 = shalt.err (!%p2589_p9)  }
 0x420   :  { %s2593_s20 = scalar_lea.vmem %s3499_s29, 16  ;;  %p2598_p11 = scmp.lt.s32.totalorder %s3499_s29, %s2770_s18 }
 0x421   :  { %p2594_p10 = scmp.ne.s32.totalorder %s3499_s29, %s2593_s20  ;;  %p2599_p12 = scmp.lt.s32.totalorder %s2800_s13, %s2593_s20 }
 0x423   :  { %p2600_p13 = por %p2599_p12, %p2598_p11 }
 0x425   :  { %p2601_p0 = pnand %p2600_p13, %p2594_p10 }
 0x427   :  { %2604 = shalt.err (!%p2601_p0)  }
 0x428   :  { %739 = dma.hbm_to_vmem [thread:$0]  %s727_s30, 16, %s3499_s29, [#allocation3] }
 0x429   :  { %s2710_s26 = smov [#allocation2 + $0x2f]   ;;  %s1298_s14 = sshll.u32 %s1297_s6, 4 }
 0x42a   :  { %s751_s12 = sshll.u32 %s2710_s26, 4  ;;  %s742_s22 = scalar_lea.hbm %s3600_s1, %s1298_s14  ;;  %s752_s12 = int_to_ptr.vmem [resolvable:$true] %s751_s12 }
 0x42b   :  { %s2605_s0 = scalar_lea.hbm %s742_s22, 16  ;;  %p2608_p2 = scmp.lt.u32.totalorder %s742_s22, %s3600_s1 }
 0x42c   :  { %p2606_p1 = scmp.ne.s32.totalorder %s742_s22, %s2605_s0  ;;  %p2609_p3 = scmp.lt.u32.totalorder %s2791_s10, %s2605_s0 }
 0x42d   :  { %p2611_p5 = scmp.lt.u32.totalorder %s2605_s0, %s742_s22 }
 0x42e   :  { %p2610_p4 = por %p2609_p3, %p2608_p2 }
 0x430   :  { %p2612_p6 = por %p2611_p5, %p2610_p4 }
 0x432   :  { %p2613_p7 = pnand %p2612_p6, %p2606_p1 }
 0x434   :  { %2616 = shalt.err (!%p2613_p7)  }
 0x435   :  { %s2617_s29 = scalar_lea.vmem %s752_s12, 16  ;;  %p2622_p9 = scmp.lt.s32.totalorder %s752_s12, %s2770_s18 }
 0x436   :  { %p2618_p8 = scmp.ne.s32.totalorder %s752_s12, %s2617_s29  ;;  %p2623_p10 = scmp.lt.s32.totalorder %s2800_s13, %s2617_s29 }
 0x438   :  { %p2624_p11 = por %p2623_p10, %p2622_p9 }
 0x43a   :  { %p2625_p12 = pnand %p2624_p11, %p2618_p8 }
 0x43c   :  { %2628 = shalt.err (!%p2625_p12)  }
 0x43d   :  { %754 = dma.hbm_to_vmem [thread:$0]  %s742_s22, 16, %s752_s12, [#allocation3] }
 0x43e   :  { %2655 = dma.done.wait [#allocation3], 768 }
 0x43f   :  { %2656 = vsyncadd [#allocation3], 4294966528  ;;  %v2711_v0 = vmov 0.0   ;;  %vm2712_vm0 = vmmov 0   ;;  %v852_v1 = vld [vmem:[#allocation2] sm:$0xff]  ;;  %v853_v2 = vld [vmem:[#allocation2 + $0x8] sm:$0xff] }
 0x440   :  { %1331 = vmatprep.subr.bf16.mxu0 %v2711_v0  ;;  %1337 = vmatprep.mubr.msk.bf16.mxu0 %vm2712_vm0, %v2711_v0  ;;  %v854_v3 = vld [vmem:[#allocation2 + $0x10] sm:$0xff]  ;;  %v858_v4 = vpack.c.bf16 %v853_v2, %v852_v1  ;;  %v855_v5 = vld [vmem:[#allocation2 + $0x18] sm:$0xff]  ;;  %v856_v7 = vld [vmem:[#allocation2 + $0x20] sm:$0xff]  ;;  %vm882_vm1 = vcmask 392192   ;;  %s2713_s9 = smov [#allocation9]  }
 0x441   :  { %1349 = vmatprep.subr.bf16.mxu1 %v2711_v0  ;;  %1365 = vmatprep.mubr.msk.bf16.mxu1 %vm2712_vm0, %v2711_v0  ;;  %v859_v6 = vpack.c.bf16 %v855_v5, %v854_v3  ;;  %v857_v8 = vld [vmem:[#allocation2 + $0x28] sm:$0xff]  ;;  %v1437_v9 = vld [vmem:[#allocation6] sm:$0xff]   ;;  %v1438_v11 = vld [vmem:[#allocation6 + $0x8] sm:$0xff]   ;;  %s1090_s25 = sshll.u32 %s2713_s9, 4  ;;  %s1091_s25 = int_to_ptr.vmem [resolvable:$true] %s1090_s25 }
 0x442   :  { %1332 = vmatpush3.bf16.msra.mxu0 %v858_v4  ;;  %v860_v10 = vpack.c.bf16 %v857_v8, %v856_v7  ;;  %1350 = vmatpush3.bf16.msra.mxu1 %v1437_v9  ;;  %v1434_v12 = vld [vmem:[%s3601_s2] sm:$0xff]   ;;  %v1440_v14 = vld [vmem:[#allocation6 + $0x18] sm:$0xff]   ;;  %v1441_v16 = vld [vmem:[#allocation6 + $0x20] sm:$0xff]   ;;  %s2629_s12 = scalar_lea.vmem %s1091_s25, 768  ;;  %p2634_p0 = scmp.lt.s32.totalorder %s1091_s25, %s1091_s25 }
 0x443   :  { %1333 = vmatprep.subr.bf16.mxu0 %v2711_v0  ;;  %1351 = vmatprep.subr.bf16.mxu1 %v2711_v0  ;;  %v1439_v13 = vld [vmem:[#allocation6 + $0x10] sm:$0xff]   ;;  %v1435_v15 = vld [vmem:[%s3601_s2 + $0x8] sm:$0xff]   ;;  %v1442_v17 = vld [vmem:[#allocation6 + $0x28] sm:$0xff]   ;;  %p2630_p13 = scmp.ne.s32.totalorder %s1091_s25, %s2629_s12  ;;  %p2635_p1 = scmp.lt.s32.totalorder %s2629_s12, %s2629_s12 }
 0x444   :  { %v1436_v18 = vld [vmem:[%s3601_s2 + $0x10] sm:$0xff]   ;;  %v1443_v19 = vld [vmem:[#allocation6 + $0x30] sm:$0xff]   ;;  %v1444_v20 = vld [vmem:[#allocation6 + $0x38] sm:$0xff]  }
 0x445   :  { %v968_v36 = vld [vmem:[%s3603_s4] sm:$0xff]  ;;  %v969_v38 = vld [vmem:[%s3603_s4 + $0x8] sm:$0xff]  ;;  %v970_v44 = vld [vmem:[%s3603_s4 + $0x10] sm:$0xff]  ;;  %p2636_p2 = por %p2635_p1, %p2634_p0 }
 0x446   :  { %1334 = vmatpush3.bf16.msra.mxu0 %v859_v6  ;;  %1352 = vmatpush3.bf16.msra.mxu1 %v1438_v11  ;;  %v971_v46 = vld [vmem:[%s3603_s4 + $0x18] sm:$0xff]  ;;  %v972_v52 = vld [vmem:[%s3603_s4 + $0x20] sm:$0xff]  ;;  %v973_v54 = vld [vmem:[%s3603_s4 + $0x28] sm:$0xff] }
 0x447   :  { %1335 = vmatprep.subr.bf16.mxu0 %v2711_v0  ;;  %1353 = vmatprep.subr.bf16.mxu1 %v2711_v0  ;;  %p2637_p3 = pnand %p2636_p2, %p2630_p13 }
 0x44a   :  { %1336 = vmatpush3.bf16.msra.mxu0 %v860_v10  ;;  %1354 = vmatpush3.bf16.msra.mxu1 %v1439_v13 }
 0x44b   :  { %1355 = vmatprep.subr.bf16.mxu1 %v2711_v0 }
 0x44d   :  { %1338 = vmatmul.mubr.msk.bf16.vlgmr.msra.gmra.mrb[0].mxu0 %vm882_vm1, %v1434_v12 }
 0x44e   :  { %1341 = vmatprep.mubr.msk.bf16.mxu0 %vm2712_vm0, %v2711_v0  ;;  %1356 = vmatpush3.bf16.msra.mxu1 %v1440_v14 }
 0x44f   :  { %1357 = vmatprep.subr.bf16.mxu1 %v2711_v0 }
 0x452   :  { %1358 = vmatpush3.bf16.msra.mxu1 %v1441_v16 }
 0x453   :  { %1359 = vmatprep.subr.bf16.mxu1 %v2711_v0 }
 0x455   :  { %1342 = vmatmul.mubr.msk.bf16.gmra.mrb[4].mxu0 %vm882_vm1, %v1435_v15 }
 0x456   :  { %1345 = vmatprep.mubr.msk.bf16.mxu0 %vm2712_vm0, %v2711_v0  ;;  %1360 = vmatpush3.bf16.msra.mxu1 %v1442_v17 }
 0x457   :  { %1361 = vmatprep.subr.bf16.mxu1 %v2711_v0 }
 0x45a   :  { %1362 = vmatpush3.bf16.msra.mxu1 %v1443_v19 }
 0x45b   :  { %1363 = vmatprep.subr.bf16.mxu1 %v2711_v0 }
 0x45d   :  { %1346 = vmatmul.mubr.msk.bf16.gmra.mrb[8].mxu0 %vm882_vm1, %v1436_v18 }
 0x45e   :  { %1364 = vmatpush3.bf16.msra.mxu1 %v1444_v20 }
 0x520   :  { %v926_v21 = vpop.f32.mrb[0].mxu0 }
 0x521   :  { %v1339_v22 = vpop.f32.mrb[1].mxu0 }
 0x522   :  { %v929_v23 = vpop.f32.mrb[2].mxu0 }
 0x523   :  { %v949_v24 = vpack.c.bf16 %v929_v23, %v926_v21  ;;  %v1340_v25 = vpop.f32.mrb[3].mxu0 }
 0x525   :  { %1366 = vmatmul.mubr.bf16.vlgmr.msra.gmra.mrb[0].mxu1 %v949_v24 }
 0x526   :  { %1369 = vmatprep.mubr.msk.bf16.mxu1 %vm2712_vm0, %v2711_v0 }
 0x528   :  { %v934_v26 = vpop.f32.mrb[4].mxu0 }
 0x529   :  { %v1343_v27 = vpop.f32.mrb[5].mxu0 }
 0x52a   :  { %v937_v28 = vpop.f32.mrb[6].mxu0 }
 0x52b   :  { %v950_v29 = vpack.c.bf16 %v937_v28, %v934_v26  ;;  %v1344_v30 = vpop.f32.mrb[7].mxu0 }
 0x52d   :  { %1370 = vmatmul.mubr.bf16.gmra.mrb[4].mxu1 %v950_v29 }
 0x52e   :  { %1373 = vmatprep.mubr.msk.bf16.mxu1 %vm2712_vm0, %v2711_v0 }
 0x530   :  { %v942_v31 = vpop.f32.mrb[8].mxu0 }
 0x531   :  { %v1347_v32 = vpop.f32.mrb[9].mxu0 }
 0x532   :  { %v945_v33 = vpop.f32.mrb[10].mxu0 }
 0x533   :  { %v951_v34 = vpack.c.bf16 %v945_v33, %v942_v31  ;;  %v1348_v35 = vpop.f32.mrb[11].mxu0 }
 0x535   :  { %1374 = vmatmul.mubr.bf16.gmra.mrb[8].mxu1 %v951_v34 }
 0x5f8   :  { %v1056_v37 = vpop.f32.mrb[0].mxu1 }
 0x5f9   :  { %v1057_v39 = vadd.f32 %v1056_v37, %v968_v36  ;;  %v1367_v40 = vpop.f32.mrb[1].mxu1 }
 0x5fa   :  { %v1059_v41 = vpop.f32.mrb[2].mxu1 }
 0x5fb   :  { %1079 = vst [vmem:[#allocation9] sm:$0xff] %v1057_v39  ;;  %v1060_v42 = vadd.f32 %v1059_v41, %v969_v38  ;;  %v1368_v43 = vpop.f32.mrb[3].mxu1 }
 0x5fd   :  { %1080 = vst [vmem:[#allocation9 + $0x8] sm:$0xff] %v1060_v42 }
 0x600   :  { %v1064_v45 = vpop.f32.mrb[4].mxu1 }
 0x601   :  { %v1065_v47 = vadd.f32 %v1064_v45, %v970_v44  ;;  %v1371_v48 = vpop.f32.mrb[5].mxu1 }
 0x602   :  { %v1067_v49 = vpop.f32.mrb[6].mxu1 }
 0x603   :  { %1081 = vst [vmem:[#allocation9 + $0x10] sm:$0xff] %v1065_v47  ;;  %v1068_v50 = vadd.f32 %v1067_v49, %v971_v46  ;;  %v1372_v51 = vpop.f32.mrb[7].mxu1 }
 0x605   :  { %1082 = vst [vmem:[#allocation9 + $0x18] sm:$0xff] %v1068_v50 }
 0x608   :  { %v1072_v53 = vpop.f32.mrb[8].mxu1 }
 0x609   :  { %v1073_v55 = vadd.f32 %v1072_v53, %v972_v52  ;;  %v1375_v56 = vpop.f32.mrb[9].mxu1 }
 0x60a   :  { %v1075_v57 = vpop.f32.mrb[10].mxu1 }
 0x60b   :  { %1083 = vst [vmem:[#allocation9 + $0x20] sm:$0xff] %v1073_v55  ;;  %v1076_v58 = vadd.f32 %v1075_v57, %v973_v54  ;;  %v1376_v59 = vpop.f32.mrb[11].mxu1 }
 0x60d   :  { %1084 = vst [vmem:[#allocation9 + $0x28] sm:$0xff] %v1076_v58 }
 0x60e   :  { %2640 = shalt.err (!%p2637_p3)
}
 0x60f   :  { %s2641_s11 = scalar_lea.hbm %s3604_s5, 768 }
 0x610   :  { %p2642_p4 = scmp.ne.s32.totalorder %s3604_s5, %s2641_s11  ;;  %p2645_p5 = scmp.lt.u32.totalorder %s2641_s11, %s3604_s5 }
 0x612   :  { %p2647_p6 = pnand %p2645_p5, %p2642_p4 }
 0x614   :  { %2650 = shalt.err (!%p2647_p6)
}
 0x615   :  { %s2714_s23 = smov 128   ;;  %s2715_s29 = smov 8  }
 0x616   :  { %1096 = dma.vmem_to_hbm [thread:$0]  %s1091_s25, 768, %s3604_s5, [#allocation8], %s2714_s23, %s2714_s23, %s2715_s29  }
 0x617   :  { %2657 = dma.done.wait [#allocation8], 768  }
 0x618   :  { %2658 = vsyncadd [#allocation8], 4294966528 }
 0x619   :  { %1100 = vsyncpa [#allocation7], 1 }
 0x61a   :  { %1101 = vsyncpa [#allocation8], 1 }
 0x61b   :  { %1102 = vsyncmov [#allocation3] }
 0x61e   :  { %s1103_s10 = vpop.sfrf %1102 }
 0x61f   :  { %p1313_p7 = scmp.ne.s32.totalorder %s1103_s10, 0 }
 0x621   :  { %1107 = shalt.err (%p1313_p7)  }

</bundles_post_ra>
